<compile_context>
chip_gen: v5e
topology: v5e:2x2
jax: 0.10.0
libtpu: 0.0.40
codegen_flags: <defaults>
</compile_context>

<pallas_src>
import jax
import jax.numpy as jnp
from jax import lax
from jax.experimental import pallas as pl
from jax.experimental.pallas import tpu as pltpu

LANE = 128      # TPU lane width; channels are padded to a multiple of this.
ROW_TILE = 8    # output rows per grid step. Per-generation knob: use ~2x larger
                # tiles on v5e/v6e (128 MiB VMEM) than on v7x (64 MiB) at real
                # UNet widths; 8 is plenty for the demo shapes.


def _double_conv_kernel(x_ref, w1_ref, b1_ref, w2_ref, b2_ref, o_ref, mid_ref):
    """One row tile of fused Conv3x3+BN+ReLU -> Conv3x3+BN+ReLU.

    Shapes (channels already padded to a multiple of 128):
      x_ref  : (TH+4, W+2, Ci)   input tile, pre-padded with its zero halo
                                 (2 rows top/bottom for conv1 + conv2-halo
                                 recompute, 1 column left/right for conv1)
      w1_ref : (9, Ci, Cm)       per-tap conv1 weights, BN1 scale folded in
      b1_ref : (1, Cm)  f32      folded conv1 bias + BN1 shift
      w2_ref : (9, Cm, Co)       per-tap conv2 weights, BN2 scale folded in
      b2_ref : (1, Co)  f32
      o_ref  : (TH, W, Co)       output row tile
    Scratch:
      mid_ref: (TH+2, W+2, Cm)   stage-1 activations with a 1-column zero halo
                                 (persists across grid steps; the interior is
                                 fully rewritten every step).
    """
    Ci = x_ref.shape[-1]
    TH, W, Co = o_ref.shape
    Cm = mid_ref.shape[-1]
    cdt = mid_ref.dtype

    t = pl.program_id(1)
    nt = pl.num_programs(1)

    # Zero only the 1-wide column halo of the persistent scratch.  Gated on
    # t == 0 (start of each batch element): under megacore batch-parallelism
    # each core owns its scratch and processes whole batch elements
    # sequentially, so this runs before any row tile of that element and the
    # halo columns are never written non-zero afterwards.
    @pl.when(t == 0)
    def _():
        mid_ref[:, 0:1, :] = jnp.zeros((TH + 2, 1, Cm), cdt)
        mid_ref[:, W + 1:W + 2, :] = jnp.zeros((TH + 2, 1, Cm), cdt)

    # ---- stage 1: conv1 (+BN1 folded) + ReLU on TH+2 rows (halo recompute) --
    # 9 accumulated tap matmuls; no im2col materialization, f32 accumulator.
    M1 = (TH + 2) * W
    acc1 = jnp.zeros((M1, Cm), jnp.float32)
    for dy in range(3):
        for dx in range(3):
            # TODO(synk): dx in {1,2} starts at a sublane-misaligned offset; a
            # pltpu.roll-based shift on the XLU would avoid the relayout copy.
            patch = x_ref[dy:dy + TH + 2, dx:dx + W, :].reshape(M1, Ci)
            acc1 += jnp.dot(patch, w1_ref[dy * 3 + dx],
                            preferred_element_type=jnp.float32)
    y1 = jnp.maximum(acc1 + b1_ref[0], 0.0)
    mid_ref[:, 1:W + 1, :] = y1.reshape(TH + 2, W, Cm).astype(cdt)

    # conv2's zero padding at the image top/bottom: recomputed halo rows that
    # fall outside the image must be zero, not conv1(zero-padded input).
    @pl.when(t == 0)
    def _():
        mid_ref[0:1, :, :] = jnp.zeros((1, W + 2, Cm), cdt)

    @pl.when(t == nt - 1)
    def _():
        mid_ref[TH + 1:TH + 2, :, :] = jnp.zeros((1, W + 2, Cm), cdt)

    # ---- stage 2: conv2 (+BN2 folded) + ReLU on the TH output rows ----------
    M2 = TH * W
    acc2 = jnp.zeros((M2, Co), jnp.float32)
    for dy in range(3):
        for dx in range(3):
            patch = mid_ref[dy:dy + TH, dx:dx + W, :].reshape(M2, Cm)
            acc2 += jnp.dot(patch, w2_ref[dy * 3 + dx],
                            preferred_element_type=jnp.float32)
    y2 = jnp.maximum(acc2 + b2_ref[0], 0.0)
    o_ref[...] = y2.reshape(TH, W, Co).astype(o_ref.dtype)


def _round_up(n, m):
    return (n + m - 1) // m * m


def _fold_bn(conv_w, conv_b, gamma, beta, mean, var, eps=1e-5):
    """Fold inference-mode BN into the conv: y = conv(x, w*s) + (beta + (b-mean)*s)."""
    scale = gamma / jnp.sqrt(var + eps)
    w = conv_w * scale[None, None, None, :]   # HWIO, scale on output channels
    b = beta + (conv_b - mean) * scale
    return w, b


def double_conv_forward(x_nchw, params, *, compute_dtype=jnp.bfloat16,
                        out_dtype=None):
    """DoubleConv forward. Input: NCHW float32; output: NCHW `out_dtype`."""
    if out_dtype is None:
        out_dtype = compute_dtype
    N, Cin, H, W = x_nchw.shape
    Cmid = params["w1"].shape[-1]
    Cout = params["w2"].shape[-1]
    Ci = _round_up(Cin, LANE)
    Cm = _round_up(Cmid, LANE)
    Co = _round_up(Cout, LANE)

    TH = ROW_TILE if H % ROW_TILE == 0 else H   # fall back to whole-image tiles
    nt = H // TH

    # NCHW -> NHWC, pad channels to the lane width, add the spatial zero halo
    # once in HBM (2 rows top/bottom: conv1 halo + conv2-halo recompute;
    # 1 column left/right: conv1 halo).
    x = jnp.transpose(x_nchw, (0, 2, 3, 1))
    x = jnp.pad(x, ((0, 0), (2, 2), (1, 1), (0, Ci - Cin))).astype(compute_dtype)
    # Overlapping row tiles (TH+4 rows each) so the auto-pipeline fetches each
    # halo'd tile with a plain Blocked BlockSpec (HBM halo duplication is only
    # 4/TH of the input).
    x_tiles = jnp.stack([x[:, t * TH:t * TH + TH + 4] for t in range(nt)],
                        axis=1)                       # (N, nt, TH+4, W+2, Ci)

    # Fold BN into conv weights/bias, pad channels, split per tap:
    # HWIO (3,3,Ci,C) -> (9, Ci, C), tap index ordered (dy, dx).
    w1, b1 = _fold_bn(params["w1"], params["b1"], params["gamma1"],
                      params["beta1"], params["mean1"], params["var1"])
    w2, b2 = _fold_bn(params["w2"], params["b2"], params["gamma2"],
                      params["beta2"], params["mean2"], params["var2"])
    w1 = jnp.pad(w1, ((0, 0), (0, 0), (0, Ci - Cin), (0, Cm - Cmid)))
    w2 = jnp.pad(w2, ((0, 0), (0, 0), (0, Cm - Cmid), (0, Co - Cout)))
    w1 = w1.reshape(9, Ci, Cm).astype(compute_dtype)
    w2 = w2.reshape(9, Cm, Co).astype(compute_dtype)
    b1 = jnp.pad(b1, (0, Cm - Cmid)).reshape(1, Cm).astype(jnp.float32)
    b2 = jnp.pad(b2, (0, Co - Cout)).reshape(1, Co).astype(jnp.float32)

    out = pl.pallas_call(
        _double_conv_kernel,
        out_shape=jax.ShapeDtypeStruct((N, H, W, Co), out_dtype),
        grid=(N, nt),
        in_specs=[
            # None squeezes the batch / row-tile axes out of the kernel ref.
            pl.BlockSpec((None, None, TH + 4, W + 2, Ci),
                         lambda n, t: (n, t, 0, 0, 0)),
            # TODO(synk): mark the constant weight/bias inputs single-buffered
            # (pipeline_mode=pl.Buffered(1)) to reclaim VMEM at real widths.
            pl.BlockSpec((9, Ci, Cm), lambda n, t: (0, 0, 0)),
            pl.BlockSpec((1, Cm), lambda n, t: (0, 0)),
            pl.BlockSpec((9, Cm, Co), lambda n, t: (0, 0, 0)),
            pl.BlockSpec((1, Co), lambda n, t: (0, 0)),
        ],
        out_specs=pl.BlockSpec((None, TH, W, Co), lambda n, t: (n, t, 0, 0)),
        scratch_shapes=[
            pltpu.VMEM((TH + 2, W + 2, Cm), compute_dtype),  # stage-1 activations
        ],
        compiler_params=pltpu.CompilerParams(
            # batch across TensorCores (v7x megacore); row tiles sequential.
            dimension_semantics=("parallel", "arbitrary"),
            # Leave headroom on v7x (64 MiB physical VMEM); plenty on v5e/v6e.
            vmem_limit_bytes=48 * 1024 * 1024,
        ),
    )(x_tiles, w1, b1, w2, b2)

    # Drop channel padding, back to NCHW.
    return jnp.transpose(out[..., :Cout], (0, 3, 1, 2))


def _reference_forward(x_nchw, params):
    """Pure-JAX reference (lax conv) for correctness checking."""
    x = jnp.transpose(x_nchw, (0, 2, 3, 1))

    def block(x, w, cb, g, be, m, v):
        y = lax.conv_general_dilated(
            x, w, window_strides=(1, 1), padding=((1, 1), (1, 1)),
            dimension_numbers=("NHWC", "HWIO", "NHWC"))
        y = y + cb
        y = (y - m) / jnp.sqrt(v + 1e-5) * g + be
        return jnp.maximum(y, 0.0)

    y = block(x, params["w1"], params["b1"], params["gamma1"],
              params["beta1"], params["mean1"], params["var1"])
    y = block(y, params["w2"], params["b2"], params["gamma2"],
              params["beta2"], params["mean2"], params["var2"])
    return jnp.transpose(y, (0, 3, 1, 2))


def make_params(key, in_ch, out_ch):
    ks = jax.random.split(key, 6)
    return {
        # conv weights stored directly in HWIO (3, 3, Cin, Cout)
        "w1": jax.random.normal(ks[0], (3, 3, in_ch, out_ch), jnp.float32) * 0.1,
        "b1": jax.random.normal(ks[1], (out_ch,), jnp.float32) * 0.1,
        "w2": jax.random.normal(ks[2], (3, 3, out_ch, out_ch), jnp.float32) * 0.1,
        "b2": jax.random.normal(ks[3], (out_ch,), jnp.float32) * 0.1,
        # BN params / running stats (deterministic, non-trivial)
        "gamma1": jnp.linspace(0.5, 1.5, out_ch, dtype=jnp.float32),
        "beta1": jnp.linspace(-0.1, 0.1, out_ch, dtype=jnp.float32),
        "mean1": jax.random.normal(ks[4], (out_ch,), jnp.float32) * 0.05,
        "var1": jnp.linspace(0.8, 1.2, out_ch, dtype=jnp.float32),
        "gamma2": jnp.linspace(1.2, 0.8, out_ch, dtype=jnp.float32),
        "beta2": jnp.linspace(0.05, -0.05, out_ch, dtype=jnp.float32),
        "mean2": jax.random.normal(ks[5], (out_ch,), jnp.float32) * 0.05,
        "var2": jnp.linspace(0.9, 1.1, out_ch, dtype=jnp.float32),
    }


if __name__ == "__main__":
    key = jax.random.PRNGKey(0)
    kx, kp = jax.random.split(key)

    N, in_ch, out_ch, H, W = 2, 4, 8, 16, 16
    x = jax.random.normal(kx, (N, in_ch, H, W), jnp.float32)   # NCHW input
    params = make_params(kp, in_ch, out_ch)

    ref = jax.block_until_ready(_reference_forward(x, params))

    # f32 compute path (f32 output): structural correctness at tight tolerance.
    out_f32 = jax.block_until_ready(
        double_conv_forward(x, params, compute_dtype=jnp.float32))
    assert out_f32.shape == (N, out_ch, H, W)
    assert out_f32.dtype == jnp.float32
    assert jnp.allclose(out_f32, ref, atol=1e-4, rtol=1e-4)

    # bf16 compute path (default, MXU-native, bf16 output): looser tolerance.
    out_bf16 = jax.block_until_ready(double_conv_forward(x, params))
    assert out_bf16.shape == (N, out_ch, H, W)
    assert out_bf16.dtype == jnp.bfloat16
    assert jnp.allclose(out_bf16.astype(jnp.float32), ref, atol=3e-2, rtol=3e-2)

    print("KERNEL_OK")
</pallas_src>

<mosaic_0001>
module attributes {stable_mosaic.version = 11 : i64} {
  func.func @_double_conv_kernel(%arg0: i32, %arg1: i32, %arg2: memref<1x1x12x18x128xf32, #tpu.memory_space<vmem>>, %arg3: memref<9x128x128xf32, #tpu.memory_space<vmem>>, %arg4: memref<1x128xf32, #tpu.memory_space<vmem>>, %arg5: memref<9x128x128xf32, #tpu.memory_space<vmem>>, %arg6: memref<1x128xf32, #tpu.memory_space<vmem>>, %arg7: memref<1x8x16x128xf32, #tpu.memory_space<vmem>>, %arg8: memref<10x18x128xf32, #tpu.memory_space<vmem>>) attributes {dimension_semantics = [#tpu.dimension_semantics<parallel>, #tpu.dimension_semantics<arbitrary>], iteration_bounds = array<i64: 2, 2>, scalar_prefetch = 0 : i64, scratch_operands = 1 : i64, tpu.core_type = #tpu.core_type<tc>, window_params = [{transform_indices = @transform_0, window_bounds = array<i64: 1, 1, 12, 18, 128>}, {pipeline_mode = #tpu.pipeline_mode<synchronous>, transform_indices = @transform_1, window_bounds = array<i64: 9, 128, 128>}, {pipeline_mode = #tpu.pipeline_mode<synchronous>, transform_indices = @transform_2, window_bounds = array<i64: 1, 128>}, {pipeline_mode = #tpu.pipeline_mode<synchronous>, transform_indices = @transform_3, window_bounds = array<i64: 9, 128, 128>}, {pipeline_mode = #tpu.pipeline_mode<synchronous>, transform_indices = @transform_4, window_bounds = array<i64: 1, 128>}, {transform_indices = @transform_5, window_bounds = array<i64: 1, 8, 16, 128>}]} {
    %c0_i32 = arith.constant 0 : i32
    %0 = arith.cmpi eq, %arg1, %c0_i32 : i32
    %1 = arith.extui %0 : i1 to i32
    %c0_i32_0 = arith.constant 0 : i32
    %2 = arith.cmpi ne, %1, %c0_i32_0 : i32
    scf.if %2 {
      %cst_153 = arith.constant 0.000000e+00 : f32
      %148 = vector.broadcast %cst_153 : f32 to vector<10x1x128xf32>
      %c0_154 = arith.constant 0 : index
      %c0_155 = arith.constant 0 : index
      %c0_156 = arith.constant 0 : index
      %149 = vector.load %arg8[%c0_154, %c0_155, %c0_156] : memref<10x18x128xf32, #tpu.memory_space<vmem>>, vector<10x1x128xf32>
      tpu.vector_store %arg8[%c0_154, %c0_155, %c0_156], %148 {strides = array<i32>} : memref<10x18x128xf32, #tpu.memory_space<vmem>>, vector<10x1x128xf32>,
      %cst_157 = arith.constant 0.000000e+00 : f32
      %150 = vector.broadcast %cst_157 : f32 to vector<10x1x128xf32>
      %c0_158 = arith.constant 0 : index
      %c17 = arith.constant 17 : index
      %c0_159 = arith.constant 0 : index
      %151 = vector.load %arg8[%c0_158, %c17, %c0_159] : memref<10x18x128xf32, #tpu.memory_space<vmem>>, vector<10x1x128xf32>
      tpu.vector_store %arg8[%c0_158, %c17, %c0_159], %150 {strides = array<i32>} : memref<10x18x128xf32, #tpu.memory_space<vmem>>, vector<10x1x128xf32>,
    } else {
    }
    %cst = arith.constant 0.000000e+00 : f32
    %3 = vector.broadcast %cst : f32 to vector<160x128xf32>
    %c0 = arith.constant 0 : index
    %c0_1 = arith.constant 0 : index
    %c0_2 = arith.constant 0 : index
    %c0_3 = arith.constant 0 : index
    %c0_4 = arith.constant 0 : index
    %4 = vector.load %arg2[%c0, %c0_1, %c0_2, %c0_3, %c0_4] : memref<1x1x12x18x128xf32, #tpu.memory_space<vmem>>, vector<1x1x10x16x128xf32>
    %5 = vector.shape_cast %4 : vector<1x1x10x16x128xf32> to vector<10x16x128xf32>
    %6 = vector.shape_cast %5 : vector<10x16x128xf32> to vector<160x128xf32>
    %c0_5 = arith.constant 0 : index
    %c0_6 = arith.constant 0 : index
    %c0_7 = arith.constant 0 : index
    %7 = vector.load %arg3[%c0_5, %c0_6, %c0_7] : memref<9x128x128xf32, #tpu.memory_space<vmem>>, vector<1x128x128xf32>
    %8 = vector.shape_cast %7 : vector<1x128x128xf32> to vector<128x128xf32>
    %cst_8 = arith.constant dense<0.000000e+00> : vector<160x128xf32>
    %9 = tpu.matmul %6, %8, %cst_8 {dimension_numbers = #tpu.dot_dimension_numbers<[1], [0], [0], [1], [0, 0, 1, 1], [], []>} : vector<160x128xf32>, vector<128x128xf32>, vector<160x128xf32> -> vector<160x128xf32>
    %10 = arith.addf %3, %9 : vector<160x128xf32>
    %c0_9 = arith.constant 0 : index
    %c0_10 = arith.constant 0 : index
    %c0_11 = arith.constant 0 : index
    %c1 = arith.constant 1 : index
    %c0_12 = arith.constant 0 : index
    %11 = vector.load %arg2[%c0_9, %c0_10, %c0_11, %c1, %c0_12] : memref<1x1x12x18x128xf32, #tpu.memory_space<vmem>>, vector<1x1x10x16x128xf32>
    %12 = vector.shape_cast %11 : vector<1x1x10x16x128xf32> to vector<10x16x128xf32>
    %13 = vector.shape_cast %12 : vector<10x16x128xf32> to vector<160x128xf32>
    %c1_13 = arith.constant 1 : index
    %c0_14 = arith.constant 0 : index
    %c0_15 = arith.constant 0 : index
    %14 = vector.load %arg3[%c1_13, %c0_14, %c0_15] : memref<9x128x128xf32, #tpu.memory_space<vmem>>, vector<1x128x128xf32>
    %15 = vector.shape_cast %14 : vector<1x128x128xf32> to vector<128x128xf32>
    %cst_16 = arith.constant dense<0.000000e+00> : vector<160x128xf32>
    %16 = tpu.matmul %13, %15, %cst_16 {dimension_numbers = #tpu.dot_dimension_numbers<[1], [0], [0], [1], [0, 0, 1, 1], [], []>} : vector<160x128xf32>, vector<128x128xf32>, vector<160x128xf32> -> vector<160x128xf32>
    %17 = arith.addf %10, %16 : vector<160x128xf32>
    %c0_17 = arith.constant 0 : index
    %c0_18 = arith.constant 0 : index
    %c0_19 = arith.constant 0 : index
    %c2 = arith.constant 2 : index
    %c0_20 = arith.constant 0 : index
    %18 = vector.load %arg2[%c0_17, %c0_18, %c0_19, %c2, %c0_20] : memref<1x1x12x18x128xf32, #tpu.memory_space<vmem>>, vector<1x1x10x16x128xf32>
    %19 = vector.shape_cast %18 : vector<1x1x10x16x128xf32> to vector<10x16x128xf32>
    %20 = vector.shape_cast %19 : vector<10x16x128xf32> to vector<160x128xf32>
    %c2_21 = arith.constant 2 : index
    %c0_22 = arith.constant 0 : index
    %c0_23 = arith.constant 0 : index
    %21 = vector.load %arg3[%c2_21, %c0_22, %c0_23] : memref<9x128x128xf32, #tpu.memory_space<vmem>>, vector<1x128x128xf32>
    %22 = vector.shape_cast %21 : vector<1x128x128xf32> to vector<128x128xf32>
    %cst_24 = arith.constant dense<0.000000e+00> : vector<160x128xf32>
    %23 = tpu.matmul %20, %22, %cst_24 {dimension_numbers = #tpu.dot_dimension_numbers<[1], [0], [0], [1], [0, 0, 1, 1], [], []>} : vector<160x128xf32>, vector<128x128xf32>, vector<160x128xf32> -> vector<160x128xf32>
    %24 = arith.addf %17, %23 : vector<160x128xf32>
    %c0_25 = arith.constant 0 : index
    %c0_26 = arith.constant 0 : index
    %c1_27 = arith.constant 1 : index
    %c0_28 = arith.constant 0 : index
    %c0_29 = arith.constant 0 : index
    %25 = vector.load %arg2[%c0_25, %c0_26, %c1_27, %c0_28, %c0_29] : memref<1x1x12x18x128xf32, #tpu.memory_space<vmem>>, vector<1x1x10x16x128xf32>
    %26 = vector.shape_cast %25 : vector<1x1x10x16x128xf32> to vector<10x16x128xf32>
    %27 = vector.shape_cast %26 : vector<10x16x128xf32> to vector<160x128xf32>
    %c3 = arith.constant 3 : index
    %c0_30 = arith.constant 0 : index
    %c0_31 = arith.constant 0 : index
    %28 = vector.load %arg3[%c3, %c0_30, %c0_31] : memref<9x128x128xf32, #tpu.memory_space<vmem>>, vector<1x128x128xf32>
    %29 = vector.shape_cast %28 : vector<1x128x128xf32> to vector<128x128xf32>
    %cst_32 = arith.constant dense<0.000000e+00> : vector<160x128xf32>
    %30 = tpu.matmul %27, %29, %cst_32 {dimension_numbers = #tpu.dot_dimension_numbers<[1], [0], [0], [1], [0, 0, 1, 1], [], []>} : vector<160x128xf32>, vector<128x128xf32>, vector<160x128xf32> -> vector<160x128xf32>
    %31 = arith.addf %24, %30 : vector<160x128xf32>
    %c0_33 = arith.constant 0 : index
    %c0_34 = arith.constant 0 : index
    %c1_35 = arith.constant 1 : index
    %c1_36 = arith.constant 1 : index
    %c0_37 = arith.constant 0 : index
    %32 = vector.load %arg2[%c0_33, %c0_34, %c1_35, %c1_36, %c0_37] : memref<1x1x12x18x128xf32, #tpu.memory_space<vmem>>, vector<1x1x10x16x128xf32>
    %33 = vector.shape_cast %32 : vector<1x1x10x16x128xf32> to vector<10x16x128xf32>
    %34 = vector.shape_cast %33 : vector<10x16x128xf32> to vector<160x128xf32>
    %c4 = arith.constant 4 : index
    %c0_38 = arith.constant 0 : index
    %c0_39 = arith.constant 0 : index
    %35 = vector.load %arg3[%c4, %c0_38, %c0_39] : memref<9x128x128xf32, #tpu.memory_space<vmem>>, vector<1x128x128xf32>
    %36 = vector.shape_cast %35 : vector<1x128x128xf32> to vector<128x128xf32>
    %cst_40 = arith.constant dense<0.000000e+00> : vector<160x128xf32>
    %37 = tpu.matmul %34, %36, %cst_40 {dimension_numbers = #tpu.dot_dimension_numbers<[1], [0], [0], [1], [0, 0, 1, 1], [], []>} : vector<160x128xf32>, vector<128x128xf32>, vector<160x128xf32> -> vector<160x128xf32>
    %38 = arith.addf %31, %37 : vector<160x128xf32>
    %c0_41 = arith.constant 0 : index
    %c0_42 = arith.constant 0 : index
    %c1_43 = arith.constant 1 : index
    %c2_44 = arith.constant 2 : index
    %c0_45 = arith.constant 0 : index
    %39 = vector.load %arg2[%c0_41, %c0_42, %c1_43, %c2_44, %c0_45] : memref<1x1x12x18x128xf32, #tpu.memory_space<vmem>>, vector<1x1x10x16x128xf32>
    %40 = vector.shape_cast %39 : vector<1x1x10x16x128xf32> to vector<10x16x128xf32>
    %41 = vector.shape_cast %40 : vector<10x16x128xf32> to vector<160x128xf32>
    %c5 = arith.constant 5 : index
    %c0_46 = arith.constant 0 : index
    %c0_47 = arith.constant 0 : index
    %42 = vector.load %arg3[%c5, %c0_46, %c0_47] : memref<9x128x128xf32, #tpu.memory_space<vmem>>, vector<1x128x128xf32>
    %43 = vector.shape_cast %42 : vector<1x128x128xf32> to vector<128x128xf32>
    %cst_48 = arith.constant dense<0.000000e+00> : vector<160x128xf32>
    %44 = tpu.matmul %41, %43, %cst_48 {dimension_numbers = #tpu.dot_dimension_numbers<[1], [0], [0], [1], [0, 0, 1, 1], [], []>} : vector<160x128xf32>, vector<128x128xf32>, vector<160x128xf32> -> vector<160x128xf32>
    %45 = arith.addf %38, %44 : vector<160x128xf32>
    %c0_49 = arith.constant 0 : index
    %c0_50 = arith.constant 0 : index
    %c2_51 = arith.constant 2 : index
    %c0_52 = arith.constant 0 : index
    %c0_53 = arith.constant 0 : index
    %46 = vector.load %arg2[%c0_49, %c0_50, %c2_51, %c0_52, %c0_53] : memref<1x1x12x18x128xf32, #tpu.memory_space<vmem>>, vector<1x1x10x16x128xf32>
    %47 = vector.shape_cast %46 : vector<1x1x10x16x128xf32> to vector<10x16x128xf32>
    %48 = vector.shape_cast %47 : vector<10x16x128xf32> to vector<160x128xf32>
    %c6 = arith.constant 6 : index
    %c0_54 = arith.constant 0 : index
    %c0_55 = arith.constant 0 : index
    %49 = vector.load %arg3[%c6, %c0_54, %c0_55] : memref<9x128x128xf32, #tpu.memory_space<vmem>>, vector<1x128x128xf32>
    %50 = vector.shape_cast %49 : vector<1x128x128xf32> to vector<128x128xf32>
    %cst_56 = arith.constant dense<0.000000e+00> : vector<160x128xf32>
    %51 = tpu.matmul %48, %50, %cst_56 {dimension_numbers = #tpu.dot_dimension_numbers<[1], [0], [0], [1], [0, 0, 1, 1], [], []>} : vector<160x128xf32>, vector<128x128xf32>, vector<160x128xf32> -> vector<160x128xf32>
    %52 = arith.addf %45, %51 : vector<160x128xf32>
    %c0_57 = arith.constant 0 : index
    %c0_58 = arith.constant 0 : index
    %c2_59 = arith.constant 2 : index
    %c1_60 = arith.constant 1 : index
    %c0_61 = arith.constant 0 : index
    %53 = vector.load %arg2[%c0_57, %c0_58, %c2_59, %c1_60, %c0_61] : memref<1x1x12x18x128xf32, #tpu.memory_space<vmem>>, vector<1x1x10x16x128xf32>
    %54 = vector.shape_cast %53 : vector<1x1x10x16x128xf32> to vector<10x16x128xf32>
    %55 = vector.shape_cast %54 : vector<10x16x128xf32> to vector<160x128xf32>
    %c7 = arith.constant 7 : index
    %c0_62 = arith.constant 0 : index
    %c0_63 = arith.constant 0 : index
    %56 = vector.load %arg3[%c7, %c0_62, %c0_63] : memref<9x128x128xf32, #tpu.memory_space<vmem>>, vector<1x128x128xf32>
    %57 = vector.shape_cast %56 : vector<1x128x128xf32> to vector<128x128xf32>
    %cst_64 = arith.constant dense<0.000000e+00> : vector<160x128xf32>
    %58 = tpu.matmul %55, %57, %cst_64 {dimension_numbers = #tpu.dot_dimension_numbers<[1], [0], [0], [1], [0, 0, 1, 1], [], []>} : vector<160x128xf32>, vector<128x128xf32>, vector<160x128xf32> -> vector<160x128xf32>
    %59 = arith.addf %52, %58 : vector<160x128xf32>
    %c0_65 = arith.constant 0 : index
    %c0_66 = arith.constant 0 : index
    %c2_67 = arith.constant 2 : index
    %c2_68 = arith.constant 2 : index
    %c0_69 = arith.constant 0 : index
    %60 = vector.load %arg2[%c0_65, %c0_66, %c2_67, %c2_68, %c0_69] : memref<1x1x12x18x128xf32, #tpu.memory_space<vmem>>, vector<1x1x10x16x128xf32>
    %61 = vector.shape_cast %60 : vector<1x1x10x16x128xf32> to vector<10x16x128xf32>
    %62 = vector.shape_cast %61 : vector<10x16x128xf32> to vector<160x128xf32>
    %c8 = arith.constant 8 : index
    %c0_70 = arith.constant 0 : index
    %c0_71 = arith.constant 0 : index
    %63 = vector.load %arg3[%c8, %c0_70, %c0_71] : memref<9x128x128xf32, #tpu.memory_space<vmem>>, vector<1x128x128xf32>
    %64 = vector.shape_cast %63 : vector<1x128x128xf32> to vector<128x128xf32>
    %cst_72 = arith.constant dense<0.000000e+00> : vector<160x128xf32>
    %65 = tpu.matmul %62, %64, %cst_72 {dimension_numbers = #tpu.dot_dimension_numbers<[1], [0], [0], [1], [0, 0, 1, 1], [], []>} : vector<160x128xf32>, vector<128x128xf32>, vector<160x128xf32> -> vector<160x128xf32>
    %66 = arith.addf %59, %65 : vector<160x128xf32>
    %c0_73 = arith.constant 0 : index
    %c0_74 = arith.constant 0 : index
    %67 = vector.load %arg4[%c0_73, %c0_74] : memref<1x128xf32, #tpu.memory_space<vmem>>, vector<1x128xf32>
    %68 = vector.shape_cast %67 : vector<1x128xf32> to vector<128xf32>
    %69 = vector.shape_cast %68 : vector<128xf32> to vector<1x128xf32>
    %70 = vector.broadcast %69 : vector<1x128xf32> to vector<160x128xf32>
    %71 = arith.addf %66, %70 : vector<160x128xf32>
    %cst_75 = arith.constant 0.000000e+00 : f32
    %72 = vector.broadcast %cst_75 : f32 to vector<160x128xf32>
    %73 = arith.maximumf %71, %72 : vector<160x128xf32>
    %74 = vector.shape_cast %73 : vector<160x128xf32> to vector<10x16x128xf32>
    %c0_76 = arith.constant 0 : index
    %c1_77 = arith.constant 1 : index
    %c0_78 = arith.constant 0 : index
    %75 = vector.load %arg8[%c0_76, %c1_77, %c0_78] : memref<10x18x128xf32, #tpu.memory_space<vmem>>, vector<10x16x128xf32>
    tpu.vector_store %arg8[%c0_76, %c1_77, %c0_78], %74 {strides = array<i32>} : memref<10x18x128xf32, #tpu.memory_space<vmem>>, vector<10x16x128xf32>,
    %c0_i32_79 = arith.constant 0 : i32
    %76 = arith.cmpi eq, %arg1, %c0_i32_79 : i32
    %77 = arith.extui %76 : i1 to i32
    %c0_i32_80 = arith.constant 0 : i32
    %78 = arith.cmpi ne, %77, %c0_i32_80 : i32
    scf.if %78 {
      %cst_153 = arith.constant 0.000000e+00 : f32
      %148 = vector.broadcast %cst_153 : f32 to vector<1x18x128xf32>
      %c0_154 = arith.constant 0 : index
      %c0_155 = arith.constant 0 : index
      %c0_156 = arith.constant 0 : index
      %149 = vector.load %arg8[%c0_154, %c0_155, %c0_156] : memref<10x18x128xf32, #tpu.memory_space<vmem>>, vector<1x18x128xf32>
      tpu.vector_store %arg8[%c0_154, %c0_155, %c0_156], %148 {strides = array<i32>} : memref<10x18x128xf32, #tpu.memory_space<vmem>>, vector<1x18x128xf32>,
    } else {
    }
    %c1_i32 = arith.constant 1 : i32
    %79 = arith.cmpi eq, %arg1, %c1_i32 : i32
    %80 = arith.extui %79 : i1 to i32
    %c0_i32_81 = arith.constant 0 : i32
    %81 = arith.cmpi ne, %80, %c0_i32_81 : i32
    scf.if %81 {
      %cst_153 = arith.constant 0.000000e+00 : f32
      %148 = vector.broadcast %cst_153 : f32 to vector<1x18x128xf32>
      %c9 = arith.constant 9 : index
      %c0_154 = arith.constant 0 : index
      %c0_155 = arith.constant 0 : index
      %149 = vector.load %arg8[%c9, %c0_154, %c0_155] : memref<10x18x128xf32, #tpu.memory_space<vmem>>, vector<1x18x128xf32>
      tpu.vector_store %arg8[%c9, %c0_154, %c0_155], %148 {strides = array<i32>} : memref<10x18x128xf32, #tpu.memory_space<vmem>>, vector<1x18x128xf32>,
    } else {
    }
    %cst_82 = arith.constant 0.000000e+00 : f32
    %82 = vector.broadcast %cst_82 : f32 to vector<128x128xf32>
    %c0_83 = arith.constant 0 : index
    %c0_84 = arith.constant 0 : index
    %c0_85 = arith.constant 0 : index
    %83 = vector.load %arg8[%c0_83, %c0_84, %c0_85] : memref<10x18x128xf32, #tpu.memory_space<vmem>>, vector<8x16x128xf32>
    %84 = vector.shape_cast %83 : vector<8x16x128xf32> to vector<128x128xf32>
    %c0_86 = arith.constant 0 : index
    %c0_87 = arith.constant 0 : index
    %c0_88 = arith.constant 0 : index
    %85 = vector.load %arg5[%c0_86, %c0_87, %c0_88] : memref<9x128x128xf32, #tpu.memory_space<vmem>>, vector<1x128x128xf32>
    %86 = vector.shape_cast %85 : vector<1x128x128xf32> to vector<128x128xf32>
    %cst_89 = arith.constant dense<0.000000e+00> : vector<128x128xf32>
    %87 = tpu.matmul %84, %86, %cst_89 {dimension_numbers = #tpu.dot_dimension_numbers<[1], [0], [0], [1], [0, 0, 1, 1], [], []>} : vector<128x128xf32>, vector<128x128xf32>, vector<128x128xf32> -> vector<128x128xf32>
    %88 = arith.addf %82, %87 : vector<128x128xf32>
    %c0_90 = arith.constant 0 : index
    %c1_91 = arith.constant 1 : index
    %c0_92 = arith.constant 0 : index
    %89 = vector.load %arg8[%c0_90, %c1_91, %c0_92] : memref<10x18x128xf32, #tpu.memory_space<vmem>>, vector<8x16x128xf32>
    %90 = vector.shape_cast %89 : vector<8x16x128xf32> to vector<128x128xf32>
    %c1_93 = arith.constant 1 : index
    %c0_94 = arith.constant 0 : index
    %c0_95 = arith.constant 0 : index
    %91 = vector.load %arg5[%c1_93, %c0_94, %c0_95] : memref<9x128x128xf32, #tpu.memory_space<vmem>>, vector<1x128x128xf32>
    %92 = vector.shape_cast %91 : vector<1x128x128xf32> to vector<128x128xf32>
    %cst_96 = arith.constant dense<0.000000e+00> : vector<128x128xf32>
    %93 = tpu.matmul %90, %92, %cst_96 {dimension_numbers = #tpu.dot_dimension_numbers<[1], [0], [0], [1], [0, 0, 1, 1], [], []>} : vector<128x128xf32>, vector<128x128xf32>, vector<128x128xf32> -> vector<128x128xf32>
    %94 = arith.addf %88, %93 : vector<128x128xf32>
    %c0_97 = arith.constant 0 : index
    %c2_98 = arith.constant 2 : index
    %c0_99 = arith.constant 0 : index
    %95 = vector.load %arg8[%c0_97, %c2_98, %c0_99] : memref<10x18x128xf32, #tpu.memory_space<vmem>>, vector<8x16x128xf32>
    %96 = vector.shape_cast %95 : vector<8x16x128xf32> to vector<128x128xf32>
    %c2_100 = arith.constant 2 : index
    %c0_101 = arith.constant 0 : index
    %c0_102 = arith.constant 0 : index
    %97 = vector.load %arg5[%c2_100, %c0_101, %c0_102] : memref<9x128x128xf32, #tpu.memory_space<vmem>>, vector<1x128x128xf32>
    %98 = vector.shape_cast %97 : vector<1x128x128xf32> to vector<128x128xf32>
    %cst_103 = arith.constant dense<0.000000e+00> : vector<128x128xf32>
    %99 = tpu.matmul %96, %98, %cst_103 {dimension_numbers = #tpu.dot_dimension_numbers<[1], [0], [0], [1], [0, 0, 1, 1], [], []>} : vector<128x128xf32>, vector<128x128xf32>, vector<128x128xf32> -> vector<128x128xf32>
    %100 = arith.addf %94, %99 : vector<128x128xf32>
    %c1_104 = arith.constant 1 : index
    %c0_105 = arith.constant 0 : index
    %c0_106 = arith.constant 0 : index
    %101 = vector.load %arg8[%c1_104, %c0_105, %c0_106] : memref<10x18x128xf32, #tpu.memory_space<vmem>>, vector<8x16x128xf32>
    %102 = vector.shape_cast %101 : vector<8x16x128xf32> to vector<128x128xf32>
    %c3_107 = arith.constant 3 : index
    %c0_108 = arith.constant 0 : index
    %c0_109 = arith.constant 0 : index
    %103 = vector.load %arg5[%c3_107, %c0_108, %c0_109] : memref<9x128x128xf32, #tpu.memory_space<vmem>>, vector<1x128x128xf32>
    %104 = vector.shape_cast %103 : vector<1x128x128xf32> to vector<128x128xf32>
    %cst_110 = arith.constant dense<0.000000e+00> : vector<128x128xf32>
    %105 = tpu.matmul %102, %104, %cst_110 {dimension_numbers = #tpu.dot_dimension_numbers<[1], [0], [0], [1], [0, 0, 1, 1], [], []>} : vector<128x128xf32>, vector<128x128xf32>, vector<128x128xf32> -> vector<128x128xf32>
    %106 = arith.addf %100, %105 : vector<128x128xf32>
    %c1_111 = arith.constant 1 : index
    %c1_112 = arith.constant 1 : index
    %c0_113 = arith.constant 0 : index
    %107 = vector.load %arg8[%c1_111, %c1_112, %c0_113] : memref<10x18x128xf32, #tpu.memory_space<vmem>>, vector<8x16x128xf32>
    %108 = vector.shape_cast %107 : vector<8x16x128xf32> to vector<128x128xf32>
    %c4_114 = arith.constant 4 : index
    %c0_115 = arith.constant 0 : index
    %c0_116 = arith.constant 0 : index
    %109 = vector.load %arg5[%c4_114, %c0_115, %c0_116] : memref<9x128x128xf32, #tpu.memory_space<vmem>>, vector<1x128x128xf32>
    %110 = vector.shape_cast %109 : vector<1x128x128xf32> to vector<128x128xf32>
    %cst_117 = arith.constant dense<0.000000e+00> : vector<128x128xf32>
    %111 = tpu.matmul %108, %110, %cst_117 {dimension_numbers = #tpu.dot_dimension_numbers<[1], [0], [0], [1], [0, 0, 1, 1], [], []>} : vector<128x128xf32>, vector<128x128xf32>, vector<128x128xf32> -> vector<128x128xf32>
    %112 = arith.addf %106, %111 : vector<128x128xf32>
    %c1_118 = arith.constant 1 : index
    %c2_119 = arith.constant 2 : index
    %c0_120 = arith.constant 0 : index
    %113 = vector.load %arg8[%c1_118, %c2_119, %c0_120] : memref<10x18x128xf32, #tpu.memory_space<vmem>>, vector<8x16x128xf32>
    %114 = vector.shape_cast %113 : vector<8x16x128xf32> to vector<128x128xf32>
    %c5_121 = arith.constant 5 : index
    %c0_122 = arith.constant 0 : index
    %c0_123 = arith.constant 0 : index
    %115 = vector.load %arg5[%c5_121, %c0_122, %c0_123] : memref<9x128x128xf32, #tpu.memory_space<vmem>>, vector<1x128x128xf32>
    %116 = vector.shape_cast %115 : vector<1x128x128xf32> to vector<128x128xf32>
    %cst_124 = arith.constant dense<0.000000e+00> : vector<128x128xf32>
    %117 = tpu.matmul %114, %116, %cst_124 {dimension_numbers = #tpu.dot_dimension_numbers<[1], [0], [0], [1], [0, 0, 1, 1], [], []>} : vector<128x128xf32>, vector<128x128xf32>, vector<128x128xf32> -> vector<128x128xf32>
    %118 = arith.addf %112, %117 : vector<128x128xf32>
    %c2_125 = arith.constant 2 : index
    %c0_126 = arith.constant 0 : index
    %c0_127 = arith.constant 0 : index
    %119 = vector.load %arg8[%c2_125, %c0_126, %c0_127] : memref<10x18x128xf32, #tpu.memory_space<vmem>>, vector<8x16x128xf32>
    %120 = vector.shape_cast %119 : vector<8x16x128xf32> to vector<128x128xf32>
    %c6_128 = arith.constant 6 : index
    %c0_129 = arith.constant 0 : index
    %c0_130 = arith.constant 0 : index
    %121 = vector.load %arg5[%c6_128, %c0_129, %c0_130] : memref<9x128x128xf32, #tpu.memory_space<vmem>>, vector<1x128x128xf32>
    %122 = vector.shape_cast %121 : vector<1x128x128xf32> to vector<128x128xf32>
    %cst_131 = arith.constant dense<0.000000e+00> : vector<128x128xf32>
    %123 = tpu.matmul %120, %122, %cst_131 {dimension_numbers = #tpu.dot_dimension_numbers<[1], [0], [0], [1], [0, 0, 1, 1], [], []>} : vector<128x128xf32>, vector<128x128xf32>, vector<128x128xf32> -> vector<128x128xf32>
    %124 = arith.addf %118, %123 : vector<128x128xf32>
    %c2_132 = arith.constant 2 : index
    %c1_133 = arith.constant 1 : index
    %c0_134 = arith.constant 0 : index
    %125 = vector.load %arg8[%c2_132, %c1_133, %c0_134] : memref<10x18x128xf32, #tpu.memory_space<vmem>>, vector<8x16x128xf32>
    %126 = vector.shape_cast %125 : vector<8x16x128xf32> to vector<128x128xf32>
    %c7_135 = arith.constant 7 : index
    %c0_136 = arith.constant 0 : index
    %c0_137 = arith.constant 0 : index
    %127 = vector.load %arg5[%c7_135, %c0_136, %c0_137] : memref<9x128x128xf32, #tpu.memory_space<vmem>>, vector<1x128x128xf32>
    %128 = vector.shape_cast %127 : vector<1x128x128xf32> to vector<128x128xf32>
    %cst_138 = arith.constant dense<0.000000e+00> : vector<128x128xf32>
    %129 = tpu.matmul %126, %128, %cst_138 {dimension_numbers = #tpu.dot_dimension_numbers<[1], [0], [0], [1], [0, 0, 1, 1], [], []>} : vector<128x128xf32>, vector<128x128xf32>, vector<128x128xf32> -> vector<128x128xf32>
    %130 = arith.addf %124, %129 : vector<128x128xf32>
    %c2_139 = arith.constant 2 : index
    %c2_140 = arith.constant 2 : index
    %c0_141 = arith.constant 0 : index
    %131 = vector.load %arg8[%c2_139, %c2_140, %c0_141] : memref<10x18x128xf32, #tpu.memory_space<vmem>>, vector<8x16x128xf32>
    %132 = vector.shape_cast %131 : vector<8x16x128xf32> to vector<128x128xf32>
    %c8_142 = arith.constant 8 : index
    %c0_143 = arith.constant 0 : index
    %c0_144 = arith.constant 0 : index
    %133 = vector.load %arg5[%c8_142, %c0_143, %c0_144] : memref<9x128x128xf32, #tpu.memory_space<vmem>>, vector<1x128x128xf32>
    %134 = vector.shape_cast %133 : vector<1x128x128xf32> to vector<128x128xf32>
    %cst_145 = arith.constant dense<0.000000e+00> : vector<128x128xf32>
    %135 = tpu.matmul %132, %134, %cst_145 {dimension_numbers = #tpu.dot_dimension_numbers<[1], [0], [0], [1], [0, 0, 1, 1], [], []>} : vector<128x128xf32>, vector<128x128xf32>, vector<128x128xf32> -> vector<128x128xf32>
    %136 = arith.addf %130, %135 : vector<128x128xf32>
    %c0_146 = arith.constant 0 : index
    %c0_147 = arith.constant 0 : index
    %137 = vector.load %arg6[%c0_146, %c0_147] : memref<1x128xf32, #tpu.memory_space<vmem>>, vector<1x128xf32>
    %138 = vector.shape_cast %137 : vector<1x128xf32> to vector<128xf32>
    %139 = vector.shape_cast %138 : vector<128xf32> to vector<1x128xf32>
    %140 = vector.broadcast %139 : vector<1x128xf32> to vector<128x128xf32>
    %141 = arith.addf %136, %140 : vector<128x128xf32>
    %cst_148 = arith.constant 0.000000e+00 : f32
    %142 = vector.broadcast %cst_148 : f32 to vector<128x128xf32>
    %143 = arith.maximumf %141, %142 : vector<128x128xf32>
    %144 = vector.shape_cast %143 : vector<128x128xf32> to vector<8x16x128xf32>
    %c0_149 = arith.constant 0 : index
    %c0_150 = arith.constant 0 : index
    %c0_151 = arith.constant 0 : index
    %c0_152 = arith.constant 0 : index
    %145 = vector.load %arg7[%c0_149, %c0_150, %c0_151, %c0_152] : memref<1x8x16x128xf32, #tpu.memory_space<vmem>>, vector<1x8x16x128xf32>
    %146 = vector.shape_cast %145 : vector<1x8x16x128xf32> to vector<8x16x128xf32>
    %147 = vector.shape_cast %144 : vector<8x16x128xf32> to vector<1x8x16x128xf32>
    tpu.vector_store %arg7[%c0_149, %c0_150, %c0_151, %c0_152], %147 {strides = array<i32>} : memref<1x8x16x128xf32, #tpu.memory_space<vmem>>, vector<1x8x16x128xf32>,
    return
  }
  func.func @transform_0(%arg0: i32, %arg1: i32) -> (i32, i32, i32, i32, i32) {
    %c0_i32 = arith.constant 0 : i32
    %c0_i32_0 = arith.constant 0 : i32
    %c0_i32_1 = arith.constant 0 : i32
    %c0_i32_2 = arith.constant 0 : i32
    return %arg0, %arg1, %c0_i32, %c0_i32_0, %c0_i32_1 : i32, i32, i32, i32, i32
  }
  func.func @transform_1(%arg0: i32, %arg1: i32) -> (i32, i32, i32) {
    %c0_i32 = arith.constant 0 : i32
    %c0_i32_0 = arith.constant 0 : i32
    %c0_i32_1 = arith.constant 0 : i32
    %c0_i32_2 = arith.constant 0 : i32
    return %c0_i32, %c0_i32_0, %c0_i32_1 : i32, i32, i32
  }
  func.func @transform_2(%arg0: i32, %arg1: i32) -> (i32, i32) {
    %c0_i32 = arith.constant 0 : i32
    %c0_i32_0 = arith.constant 0 : i32
    %c0_i32_1 = arith.constant 0 : i32
    return %c0_i32, %c0_i32_0 : i32, i32
  }
  func.func @transform_3(%arg0: i32, %arg1: i32) -> (i32, i32, i32) {
    %c0_i32 = arith.constant 0 : i32
    %c0_i32_0 = arith.constant 0 : i32
    %c0_i32_1 = arith.constant 0 : i32
    %c0_i32_2 = arith.constant 0 : i32
    return %c0_i32, %c0_i32_0, %c0_i32_1 : i32, i32, i32
  }
  func.func @transform_4(%arg0: i32, %arg1: i32) -> (i32, i32) {
    %c0_i32 = arith.constant 0 : i32
    %c0_i32_0 = arith.constant 0 : i32
    %c0_i32_1 = arith.constant 0 : i32
    return %c0_i32, %c0_i32_0 : i32, i32
  }
  func.func @transform_5(%arg0: i32, %arg1: i32) -> (i32, i32, i32, i32) {
    %c0_i32 = arith.constant 0 : i32
    %c0_i32_0 = arith.constant 0 : i32
    %c0_i32_1 = arith.constant 0 : i32
    return %arg0, %arg1, %c0_i32, %c0_i32_0 : i32, i32, i32, i32
  }
}

</mosaic_0001>

<bundles_post_ra>
// kernel: tpu_custom_call.1
= control target key start
LH: loop header
LB: loop body
LE: loop exit
PB: predicated region body
PF: predicated region fallthrough
CT: control target
= control target key end

     0   :  { %10 = vsyncpa [#allocation4], 0  ;;  %s4929_s0 = inlined_call_operand.vmem [shape: f32[2,2,12,18,128], index: 0, kind: input, shape index: {}]   ;;  %s4930_s1 = inlined_call_operand.vmem [shape: f32[9,128,128], index: 1, kind: input, shape index: {}]   ;;  %s4931_s2 = inlined_call_operand.vmem [shape: f32[1,128], index: 2, kind: input, shape index: {}]   ;;  %s4932_s3 = inlined_call_operand.hbm [shape: f32[9,128,128], index: 3, kind: input, shape index: {}]   ;;  %s4933_s4 = inlined_call_operand.vmem [shape: f32[1,128], index: 4, kind: input, shape index: {}]   ;;  %s4934_s5 = inlined_call_operand.hbm [shape: f32[2,16,16,128], index: 5, kind: output, shape index: {}]  }
   0x1   :  { %11 = vsyncpa [#allocation5], 0 }
   0x2   :  { %13 = vsyncpa [#allocation5 + $0x1], 0  ;;  %s3278_s18 = smov 0   ;;  %s3280_s19 = smov 0  }
   0x3   :  { %s3282_s20 = smov 0   ;;  %s3284_s21 = smov 0  }
   0x4   :  { %s3286_s22 = smov 0   ;;  %s3288_s23 = smov 0  }
   0x5   :  { %s3290_s24 = smov 0   ;;  %s3292_s25 = smov 0  }
   0x6 LB: > { %s2701_s26 = sadd.s32 4294967295, %s3238_s25   ;;  %s2702_s27 = sadd.s32 4294967294, %s3238_s25   ;;  %s3238_s25 = sphi %s3292_s25, %s19_s25   ;;  %s3234_s24 = sphi %s3290_s24, %s5017_s24   ;;  %s3230_s23 = sphi %s3288_s23, %s5016_s23   ;;  %s3226_s22 = sphi %s3286_s22, %s5015_s22   ;;  %s3222_s21 = sphi %s3284_s21, %s5014_s21   ;;  %s3218_s20 = sphi %s3282_s20, %s5013_s20   ;;  %s3214_s19 = sphi %s3280_s19, %s5012_s19   ;;  %s3210_s18 = sphi %s3278_s18, %s5011_s18  }
   0x7   : > { %s28_s28 = sadd.s32 1, %s3230_s23  ;;  %s31_s29 = sadd.s32 1, %s3234_s24 }
   0x8   : > { %p29_p0 = scmp.ge.s32.totalorder %s28_s28, 2  ;;  %s152_s30 = sadd.s32 1, %s3218_s20 }
   0x9   : > { %p162_p1 = scmp.ne.s32.totalorder %s3218_s20, %s3214_s19  ;;  %p163_p2 = scmp.eq.s32.totalorder %s2701_s26, 3 }
   0xa   : > { %s5019_s28 = smov (%p29_p0, %s28_s28), 0  ;;  %s5021_s29 = smov (!%p29_p0, %s31_s29), %s3234_s24 }
   0xb   : > { %s148_s6 = ssub.s32 %s3230_s23, %s5019_s28  ;;  %p3330_p3 = por %p163_p2, %p162_p1 }
   0xc   : > { %p33_p4 = scmp.ge.s32.totalorder %s5021_s29, 2  ;;  %p168_p5 = scmp.ne.s32.totalorder %s3214_s19, %s3210_s18 }
   0xd   : > { %p169_p6 = scmp.eq.s32.totalorder %s2702_s27, 3  ;;  %p2703_p7 = scmp.ge.s32.totalorder %s3238_s25, 1 }
   0xe   : > { %s5023_s29 = smov (%p33_p4, %s5021_s29), 0  ;;  %p176_p9 = scmp.lt.s32.totalorder %s3238_s25, 5 }
   0xf   : > { %p3339_p8 = por %p169_p6, %p168_p5  ;;  %s147_s9 = ssub.s32 %s3234_s24, %s5023_s29 }
  0x10   : > { %s149_s10 = sor.u32 %s148_s6, %s147_s9  ;;  %p3346_p10 = pnand %p2703_p7, %p176_p9 }
  0x11   : > { %p150_p11 = scmp.eq.s32.totalorder %s149_s10, 0  ;;  %p3350_p12 = scmp.eq.s32.totalorder %s2701_s26, 0 }
  0x12   : > { %p3025_p13 = pneg %p3346_p10  ;;  %s193_s15 = sshll.u32 %s4932_s3, 4  ;;  %s194_s15 = int_to_ptr.hbm [resolvable:$true] %s193_s15 }
  0x13   : > { %s3360_s16 = scalar_select %p150_p11, %s3218_s20, %s152_s30  }
  0x14   : > { %s3240_s17 = smov [#allocation3]   ;;  %p3026_p0 = pnand %p3350_p12, %p3025_p13 }
  0x15   : > { %s195_s27 = sshll.u32 %s3240_s17, 4  ;;  %s3241_s6 = smov 128   ;;  %s196_s27 = int_to_ptr.vmem [resolvable:$true] %s195_s27 }
  0x16   : > { %s3242_s26 = smov 8   ;;  %226 = sbr.rel (%p3346_p10) target bundleno = 1321 (0x529), region = 40 }
  0x17   : > { %3028 = dma.hbm_to_vmem [thread:$0]  (!%p3026_p0), %s194_s15, 18432, %s196_s27, [#allocation4], %s3241_s6, %s3241_s6, %s3242_s26  }
  0x1b   : > { %3201 = dma.done.wait (%p3350_p12), [#allocation4], 18432  }
  0x1c   : > { %3203 = vsyncadd (%p3350_p12), [#allocation4], 4294948864  ;;  %s4935_s30 = sand.u32 1, %s3214_s19   ;;  %p259_p1 = scmp.lt.s32.totalorder %s3226_s22, 1 }
  0x1d   : > { %s2708_s9 = sshll.u32 %s4935_s30, 7  ;;  %p261_p2 = scmp.lt.s32.totalorder %s3222_s21, 1 }
  0x1e   : > { %s260_s10 = scalar_select %p259_p1, %s3226_s22, 1 }
  0x1f   : > { %s262_s11 = scalar_select %p261_p2, %s3222_s21, 1 }
  0x20   : > { %s3018_s13 = smul.u32 72, %s260_s10  ;;  %s3382_s26 = scalar_lea.vmem [#allocation6], %s2708_s9 }
  0x21   : > { %s3017_s14 = smul.u32 36, %s262_s11  ;;  %p2710_p4 = scmp.ne.s32.totalorder %s3222_s21, 0 }
  0x23   : > { %s265_s15 = sadd.s32 %s3018_s13, %s3017_s14  ;;  %272 = sbr.rel (%p2710_p4) target bundleno = 61 (0x3d), region = 48 }
  0x24   : > { %s2709_s17 = sshll.u32 %s265_s15, 3 }
  0x25   : > { %s3380_s6 = scalar_lea.vmem %s4929_s0, %s2709_s17 }
  0x28   : > { %v3243_v0 = vmov 0.0  }
  0x29   : > { %273 = vst [vmem:[#allocation2] sm:$0x1] %v3243_v0 }
  0x2a   : > { %274 = vst [vmem:[#allocation2 + $0x18] sm:$0x1] %v3243_v0 }
  0x2b   : > { %275 = vst [vmem:[#allocation2 + $0x30] sm:$0x1] %v3243_v0 }
  0x2c   : > { %276 = vst [vmem:[#allocation2 + $0x48] sm:$0x1] %v3243_v0 }
  0x2d   : > { %277 = vst [vmem:[#allocation2 + $0x60] sm:$0x1] %v3243_v0 }
  0x2e   : > { %278 = vst [vmem:[#allocation2 + $0x78] sm:$0x1] %v3243_v0 }
  0x2f   : > { %279 = vst [vmem:[#allocation2 + $0x90] sm:$0x1] %v3243_v0 }
  0x30   : > { %280 = vst [vmem:[#allocation2 + $0xa8] sm:$0x1] %v3243_v0 }
  0x31   : > { %281 = vst [vmem:[#allocation2 + $0xc0] sm:$0x1] %v3243_v0 }
  0x32   : > { %282 = vst [vmem:[#allocation2 + $0xd8] sm:$0x1] %v3243_v0 }
  0x33   : > { %283 = vst [vmem:[#allocation2 + $0x11] sm:$0x1] %v3243_v0 }
  0x34   : > { %284 = vst [vmem:[#allocation2 + $0x29] sm:$0x1] %v3243_v0 }
  0x35   : > { %285 = vst [vmem:[#allocation2 + $0x41] sm:$0x1] %v3243_v0 }
  0x36   : > { %286 = vst [vmem:[#allocation2 + $0x59] sm:$0x1] %v3243_v0 }
  0x37   : > { %287 = vst [vmem:[#allocation2 + $0x71] sm:$0x1] %v3243_v0 }
  0x38   : > { %288 = vst [vmem:[#allocation2 + $0x89] sm:$0x1] %v3243_v0 }
  0x39   : > { %289 = vst [vmem:[#allocation2 + $0xa1] sm:$0x1] %v3243_v0 }
  0x3a   : > { %290 = vst [vmem:[#allocation2 + $0xb9] sm:$0x1] %v3243_v0 }
  0x3b   : > { %291 = vst [vmem:[#allocation2 + $0xd1] sm:$0x1] %v3243_v0 }
  0x3c   : > { %292 = vst [vmem:[#allocation2 + $0xe9] sm:$0x1] %v3243_v0 }
  0x3d PF: > { %v2726_v1 = vld [vmem:[%s4930_s1 + $0xf8] sm:$0xff]  ;;  %v2725_v3 = vld [vmem:[%s4930_s1 + $0xf0] sm:$0xff]  ;;  %v2724_v5 = vld [vmem:[%s4930_s1 + $0xe8] sm:$0xff] }
  0x3e   : > { %v328_v2 = vld [vmem:[%s4930_s1 + $0x78] sm:$0xff]  ;;  %366 = vmatpush.msra.mxu0 %v2726_v1  ;;  %v327_v4 = vld [vmem:[%s4930_s1 + $0x70] sm:$0xff]  ;;  %v326_v6 = vld [vmem:[%s4930_s1 + $0x68] sm:$0xff] }
  0x3f   : > { %443 = vmatpush.msra.mxu1 %v328_v2  ;;  %2969 = vmatpush.msra.mxu3 %v328_v2  ;;  %v2723_v7 = vld [vmem:[%s4930_s1 + $0xe0] sm:$0xff]  ;;  %v2722_v9 = vld [vmem:[%s4930_s1 + $0xd8] sm:$0xff]  ;;  %v2721_v11 = vld [vmem:[%s4930_s1 + $0xd0] sm:$0xff] }
  0x40   : > { %367 = vmatpush.msra.mxu0 %v2725_v3  ;;  %v325_v8 = vld [vmem:[%s4930_s1 + $0x60] sm:$0xff]  ;;  %v324_v10 = vld [vmem:[%s4930_s1 + $0x58] sm:$0xff]  ;;  %v323_v12 = vld [vmem:[%s4930_s1 + $0x50] sm:$0xff] }
  0x41   : > { %444 = vmatpush.msra.mxu1 %v327_v4  ;;  %2970 = vmatpush.msra.mxu3 %v327_v4  ;;  %v2720_v13 = vld [vmem:[%s4930_s1 + $0xc8] sm:$0xff]  ;;  %v3432_v15 = vld [vmem:[%s4930_s1 + $0x178] sm:$0xff]  ;;  %v2719_v16 = vld [vmem:[%s4930_s1 + $0xc0] sm:$0xff] }
  0x42   : > { %368 = vmatpush.msra.mxu0 %v2724_v5  ;;  %v322_v14 = vld [vmem:[%s4930_s1 + $0x48] sm:$0xff]  ;;  %v321_v17 = vld [vmem:[%s4930_s1 + $0x40] sm:$0xff]  ;;  %2985 = vmatpush.msra.mxu2 %v3432_v15  ;;  %v3444_v18 = vld [vmem:[%s4930_s1 + $0x170] sm:$0xff] }
  0x43   : > { %445 = vmatpush.msra.mxu1 %v326_v6  ;;  %2971 = vmatpush.msra.mxu3 %v326_v6  ;;  %v2718_v19 = vld [vmem:[%s4930_s1 + $0xb8] sm:$0xff]  ;;  %v2717_v21 = vld [vmem:[%s4930_s1 + $0xb0] sm:$0xff]  ;;  %v3462_v23 = vld [vmem:[%s4930_s1 + $0x168] sm:$0xff] }
  0x44   : > { %369 = vmatpush.msra.mxu0 %v2723_v7  ;;  %v320_v20 = vld [vmem:[%s4930_s1 + $0x38] sm:$0xff]  ;;  %2986 = vmatpush.msra.mxu2 %v3444_v18  ;;  %v319_v22 = vld [vmem:[%s4930_s1 + $0x30] sm:$0xff]  ;;  %v2716_v24 = vld [vmem:[%s4930_s1 + $0xa8] sm:$0xff] }
  0x45   : > { %446 = vmatpush.msra.mxu1 %v325_v8  ;;  %2972 = vmatpush.msra.mxu3 %v325_v8  ;;  %v318_v25 = vld [vmem:[%s4930_s1 + $0x28] sm:$0xff]  ;;  %v2715_v26 = vld [vmem:[%s4930_s1 + $0xa0] sm:$0xff]  ;;  %v2714_v28 = vld [vmem:[%s4930_s1 + $0x98] sm:$0xff] }
  0x46   : > { %370 = vmatpush.msra.mxu0 %v2722_v9  ;;  %2987 = vmatpush.msra.mxu2 %v3462_v23  ;;  %v317_v27 = vld [vmem:[%s4930_s1 + $0x20] sm:$0xff]  ;;  %v316_v29 = vld [vmem:[%s4930_s1 + $0x18] sm:$0xff]  ;;  %v2713_v30 = vld [vmem:[%s4930_s1 + $0x90] sm:$0xff] }
  0x47   : > { %447 = vmatpush.msra.mxu1 %v324_v10  ;;  %2973 = vmatpush.msra.mxu3 %v324_v10  ;;  %v315_v31 = vld [vmem:[%s4930_s1 + $0x10] sm:$0xff]  ;;  %v2739_v32 = vld [vmem:[%s4930_s1 + $0x160] sm:$0xff]  ;;  %v2712_v33 = vld [vmem:[%s4930_s1 + $0x88] sm:$0xff] }
  0x48   : > { %371 = vmatpush.msra.mxu0 %v2721_v11  ;;  %v314_v34 = vld [vmem:[%s4930_s1 + $0x8] sm:$0xff]  ;;  %2988 = vmatpush.msra.mxu2 %v2739_v32  ;;  %v2738_v35 = vld [vmem:[%s4930_s1 + $0x158] sm:$0xff]  ;;  %v2737_v36 = vld [vmem:[%s4930_s1 + $0x150] sm:$0xff] }
  0x49   : > { %448 = vmatpush.msra.mxu1 %v323_v12  ;;  %2974 = vmatpush.msra.mxu3 %v323_v12  ;;  %v2711_v37 = vld [vmem:[%s4930_s1 + $0x80] sm:$0xff]  ;;  %v3513_v41 = vld [vmem:[%s3380_s6 + $0x98] sm:$0xff]  ;;  %v2777_v43 = vld [vmem:[%s4930_s1 + $0x1f0] sm:$0xff] }
  0x4a   : > { %372 = vmatpush.msra.mxu0 %v2720_v13  ;;  %v313_v38 = vld [vmem:[%s4930_s1] sm:$0xff]  ;;  %2989 = vmatpush.msra.mxu2 %v2738_v35  ;;  %v2778_v42 = vld [vmem:[%s4930_s1 + $0x1f8] sm:$0xff]  ;;  %v2736_v44 = vld [vmem:[%s4930_s1 + $0x148] sm:$0xff] }
  0x4b   : > { %449 = vmatpush.msra.mxu1 %v322_v14  ;;  %2975 = vmatpush.msra.mxu3 %v322_v14  ;;  %v329_v39 = vld [vmem:[%s3380_s6 + $0x1] sm:$0xff]  ;;  %v2734_v47 = vld [vmem:[%s4930_s1 + $0x138] sm:$0xff]  ;;  %v330_v48 = vld [vmem:[%s3380_s6 + $0x9] sm:$0xff] }
  0x4c   : > { %373 = vmatpush.msra.mxu0 %v2719_v16  ;;  %v293_v40 = vld [vmem:[%s3380_s6] sm:$0xff]  ;;  %2990 = vmatpush.msra.mxu2 %v2737_v36  ;;  %v2776_v46 = vld [vmem:[%s4930_s1 + $0x1e8] sm:$0xff]  ;;  %v2774_v52 = vld [vmem:[%s4930_s1 + $0x1d8] sm:$0xff] }
  0x4d   : > { %450 = vmatpush.msra.mxu1 %v321_v17  ;;  %2976 = vmatpush.msra.mxu3 %v321_v17  ;;  %v2735_v45 = vld [vmem:[%s4930_s1 + $0x140] sm:$0xff]  ;;  %v294_v50 = vld [vmem:[%s3380_s6 + $0x8] sm:$0xff]  ;;  %v2733_v53 = vld [vmem:[%s4930_s1 + $0x130] sm:$0xff] }
  0x4e   : > { %374 = vmatpush.msra.mxu0 %v2718_v19  ;;  %2991 = vmatpush.msra.mxu2 %v2736_v44  ;;  %v2775_v49 = vld [vmem:[%s4930_s1 + $0x1e0] sm:$0xff]  ;;  %v3542_v51 = vld [vmem:[%s3380_s6 + $0xa8] sm:$0xff]  ;;  %v2773_v54 = vld [vmem:[%s4930_s1 + $0x1d0] sm:$0xff] }
  0x4f   : > { %451 = vmatpush.msra.mxu1 %v320_v20  ;;  %2977 = vmatpush.msra.mxu3 %v320_v20  ;;  %v2732_v55 = vld [vmem:[%s4930_s1 + $0x128] sm:$0xff]  ;;  %v2731_v57 = vld [vmem:[%s4930_s1 + $0x120] sm:$0xff]  ;;  %v3571_v60 = vld [vmem:[%s3380_s6 + $0x18] sm:$0xff] }
  0x50   : > { %375 = vmatpush.msra.mxu0 %v2717_v21  ;;  %2992 = vmatpush.msra.mxu2 %v2735_v45  ;;  %v2772_v56 = vld [vmem:[%s4930_s1 + $0x1c8] sm:$0xff]  ;;  %v3565_v58 = vld [vmem:[%s3380_s6 + $0x19] sm:$0xff]  ;;  %v3574_v61 = vld [vmem:[%s3380_s6 + $0xb0] sm:$0xff] }
  0x51   : > { %452 = vmatpush.msra.mxu1 %v319_v22  ;;  %2978 = vmatpush.msra.mxu3 %v319_v22  ;;  %v2771_v59 = vld [vmem:[%s4930_s1 + $0x1c0] sm:$0xff]  ;;  %v2770_v62 = vld [vmem:[%s4930_s1 + $0x1b8] sm:$0xff]  ;;  %v2769_v0 = vld [vmem:[%s4930_s1 + $0x1b0] sm:$0xff] }
  0x52   : > { %376 = vmatpush.msra.mxu0 %v2716_v24  ;;  %2993 = vmatpush.msra.mxu2 %v2734_v47  ;;  %v2730_v63 = vld [vmem:[%s4930_s1 + $0x118] sm:$0xff]  ;;  %v2729_v1 = vld [vmem:[%s4930_s1 + $0x110] sm:$0xff]  ;;  %v2768_v2 = vld [vmem:[%s4930_s1 + $0x1a8] sm:$0xff] }
  0x53   : > { %453 = vmatpush.msra.mxu1 %v318_v25  ;;  %2979 = vmatpush.msra.mxu3 %v318_v25  ;;  %v2728_v3 = vld [vmem:[%s4930_s1 + $0x108] sm:$0xff]  ;;  %v2767_v5 = vld [vmem:[%s4930_s1 + $0x1a0] sm:$0xff]  ;;  %v2766_v8 = vld [vmem:[%s4930_s1 + $0x198] sm:$0xff] }
  0x54   : > { %377 = vmatpush.msra.mxu0 %v2715_v26  ;;  %2994 = vmatpush.msra.mxu2 %v2733_v53  ;;  %v3598_v4 = vld [vmem:[%s3380_s6 + $0x21] sm:$0xff]  ;;  %v3617_v10 = vld [vmem:[%s3380_s6 + $0x52] sm:$0xff]  ;;  %v3658_v21 = vld [vmem:[%s3380_s6 + $0x6a] sm:$0xff] }
  0x55   : > { %454 = vmatpush.msra.mxu1 %v317_v27  ;;  %2980 = vmatpush.msra.mxu3 %v317_v27  ;;  %v3604_v6 = vld [vmem:[%s3380_s6 + $0x20] sm:$0xff]  ;;  %v2765_v11 = vld [vmem:[%s4930_s1 + $0x190] sm:$0xff]  ;;  %v2764_v12 = vld [vmem:[%s4930_s1 + $0x188] sm:$0xff] }
  0x56   : > { %378 = vmatpush.msra.mxu0 %v2714_v28  ;;  %2995 = vmatpush.msra.mxu2 %v2732_v55  ;;  %v3607_v7 = vld [vmem:[%s3380_s6 + $0xc0] sm:$0xff]  ;;  %v3629_v13 = vld [vmem:[%s3380_s6 + $0x31] sm:$0xff]  ;;  %v3638_v16 = vld [vmem:[%s3380_s6 + $0xc8] sm:$0xff] }
  0x57   : > { %455 = vmatpush.msra.mxu1 %v316_v29  ;;  %2981 = vmatpush.msra.mxu3 %v316_v29  ;;  %v2727_v9 = vld [vmem:[%s4930_s1 + $0x100] sm:$0xff]  ;;  %v3651_v19 = vld [vmem:[%s3380_s6 + $0x38] sm:$0xff]  ;;  %v3664_v22 = vld [vmem:[%s3380_s6 + $0x49] sm:$0xff] }
  0x58   : > { %379 = vmatpush.msra.mxu0 %v2713_v30  ;;  %2996 = vmatpush.msra.mxu2 %v2731_v57  ;;  %v2763_v14 = vld [vmem:[%s4930_s1 + $0x180] sm:$0xff]  ;;  %v3654_v20 = vld [vmem:[%s3380_s6 + $0xd8] sm:$0xff]  ;;  %v3683_v27 = vld [vmem:[%s3380_s6 + $0x50] sm:$0xff] }
  0x59   : > { %456 = vmatpush.msra.mxu1 %v315_v31  ;;  %2982 = vmatpush.msra.mxu3 %v315_v31  ;;  %v3642_v17 = vld [vmem:[%s3380_s6 + $0x62] sm:$0xff]  ;;  %v3674_v25 = vld [vmem:[%s3380_s6 + $0x7a] sm:$0xff]  ;;  %v3680_v26 = vld [vmem:[%s3380_s6 + $0x51] sm:$0xff] }
  0x5a   : > { %380 = vmatpush.msra.mxu0 %v2712_v33  ;;  %2997 = vmatpush.msra.mxu2 %v2730_v63  ;;  %v3670_v24 = vld [vmem:[%s3380_s6 + $0xe0] sm:$0xff]  ;;  %v3700_v31 = vld [vmem:[%s3380_s6 + $0x92] sm:$0xff]  ;;  %v3709_v33 = vld [vmem:[%s3380_s6 + $0x68] sm:$0xff] }
  0x5b   : > { %457 = vmatpush.msra.mxu1 %v314_v34  ;;  %2983 = vmatpush.msra.mxu3 %v314_v34  ;;  %v3687_v28 = vld [vmem:[%s3380_s6 + $0x82] sm:$0xff]  ;;  %v3713_v34 = vld [vmem:[%s3380_s6 + $0x9a] sm:$0xff] }
  0x5c   : > { %381 = vmatpush.msra.mxu0 %v2711_v37  ;;  %2998 = vmatpush.msra.mxu2 %v2729_v1  ;;  %v3693_v29 = vld [vmem:[%s3380_s6 + $0x61] sm:$0xff]  ;;  %v3726_v37 = vld [vmem:[%s3380_s6 + $0xaa] sm:$0xff] }
  0x5d   : > { %458 = vmatpush.msra.mxu1 %v313_v38  ;;  %2984 = vmatpush.msra.mxu3 %v313_v38  ;;  %v3696_v30 = vld [vmem:[%s3380_s6 + $0x60] sm:$0xff] }
  0x5e   : > { %382 = vmatmul.f32.vlgmr.msra.gmra.mxu0 %v329_v39  ;;  %459 = vmatmul.f32.vlgmr.msra.gmra.mxu1 %v293_v40  ;;  %v3732_v38 = vld [vmem:[%s3380_s6 + $0x81] sm:$0xff]  ;;  %v3739_v40 = vld [vmem:[%s3380_s6 + $0xb2] sm:$0xff] }
  0x5f   : > { %498 = vmatmul.f32.vlgmr.msra.gmra.mxu3 %v3513_v41  ;;  %557 = vmatpush.msrb.mxu0 %v3432_v15  ;;  %v3635_v15 = vld [vmem:[%s3380_s6 + $0x30] sm:$0xff]  ;;  %v3735_v39 = vld [vmem:[%s3380_s6 + $0x80] sm:$0xff] }
  0x60   : > { %692 = vmatpush.msrb.mxu3 %v2778_v42  ;;  %2999 = vmatpush.msra.mxu2 %v2728_v3  ;;  %v3745_v42 = vld [vmem:[%s3380_s6 + $0x91] sm:$0xff] }
  0x61   : > { %558 = vmatpush.msrb.mxu0 %v3444_v18  ;;  %v3648_v18 = vld [vmem:[%s3380_s6 + $0x39] sm:$0xff] }
  0x62   : > { %693 = vmatpush.msrb.mxu3 %v2777_v43  ;;  %3000 = vmatpush.msra.mxu2 %v2727_v9  ;;  %v3748_v43 = vld [vmem:[%s3380_s6 + $0x90] sm:$0xff] }
  0x63   : > { %559 = vmatpush.msrb.mxu0 %v3462_v23  ;;  %594 = vmatmul.f32.vlgmr.msra.gmra.mxu2 %v3617_v10  ;;  %v3667_v23 = vld [vmem:[%s3380_s6 + $0x48] sm:$0xff] }
  0x64   : > { %694 = vmatpush.msrb.mxu3 %v2776_v46  ;;  %v3762_v46 = vld [vmem:[%s3380_s6 + $0xca] sm:$0xff] }
  0x65   : > { %560 = vmatpush.msrb.mxu0 %v2739_v32  ;;  %v3706_v32 = vld [vmem:[%s3380_s6 + $0x69] sm:$0xff] }
  0x66   : > { %385 = vmatmul.f32.gmra.mxu0 %v330_v48  ;;  %695 = vmatpush.msrb.mxu3 %v2775_v49  ;;  %v3771_v48 = vld [vmem:[%s3380_s6 + $0xda] sm:$0xff]  ;;  %v3776_v49 = vld [vmem:[%s3380_s6 + $0xb1] sm:$0xff] }
  0x67   : > { %462 = vmatmul.f32.gmra.mxu1 %v294_v50  ;;  %501 = vmatmul.f32.gmra.mxu3 %v3542_v51  ;;  %v3780_v50 = vld [vmem:[%s3380_s6 + $0xe2] sm:$0xff] }
  0x68   : > { %696 = vmatpush.msrb.mxu3 %v2774_v52  ;;  %561 = vmatpush.msrb.mxu0 %v2738_v35  ;;  %v3719_v35 = vld [vmem:[%s3380_s6 + $0x79] sm:$0xff] }
  0x6a   : > { %697 = vmatpush.msrb.mxu3 %v2773_v54  ;;  %562 = vmatpush.msrb.mxu0 %v2737_v36  ;;  %v3722_v36 = vld [vmem:[%s3380_s6 + $0x78] sm:$0xff] }
  0x6b   : > { %597 = vmatmul.f32.gmra.mxu2 %v3642_v17  ;;  %v2814_v54 = vld [vmem:[%s4930_s1 + $0x278] sm:$0xff] }
  0x6c   : > { %698 = vmatpush.msrb.mxu3 %v2772_v56  ;;  %563 = vmatpush.msrb.mxu0 %v2736_v44  ;;  %v3752_v44 = vld [vmem:[%s3380_s6 + $0xc2] sm:$0xff]  ;;  %v2813_v56 = vld [vmem:[%s4930_s1 + $0x270] sm:$0xff] }
  0x6e   : > { %388 = vmatmul.f32.gmra.mxu0 %v3565_v58  ;;  %699 = vmatpush.msrb.mxu3 %v2771_v59  ;;  %v3802_v59 = vld [vmem:[%s3380_s6 + $0xc9] sm:$0xff] }
  0x6f   : > { %465 = vmatmul.f32.gmra.mxu1 %v3571_v60  ;;  %504 = vmatmul.f32.gmra.mxu3 %v3574_v61 }
  0x70   : > { %700 = vmatpush.msrb.mxu3 %v2770_v62  ;;  %564 = vmatpush.msrb.mxu0 %v2735_v45  ;;  %v3758_v45 = vld [vmem:[%s3380_s6 + $0x99] sm:$0xff] }
  0x72   : > { %701 = vmatpush.msrb.mxu3 %v2769_v0  ;;  %565 = vmatpush.msrb.mxu0 %v2734_v47  ;;  %v3767_v47 = vld [vmem:[%s3380_s6 + $0xa9] sm:$0xff] }
  0x73   : > { %600 = vmatmul.f32.gmra.mxu2 %v3658_v21 }
  0x74   : > { %702 = vmatpush.msrb.mxu3 %v2768_v2  ;;  %566 = vmatpush.msrb.mxu0 %v2733_v53  ;;  %v3787_v53 = vld [vmem:[%s3380_s6 + $0xc1] sm:$0xff]  ;;  %v2810_v2 = vld [vmem:[%s4930_s1 + $0x258] sm:$0xff] }
  0x76   : > { %391 = vmatmul.f32.gmra.mxu0 %v3598_v4  ;;  %703 = vmatpush.msrb.mxu3 %v2767_v5 }
  0x77   : > { %468 = vmatmul.f32.gmra.mxu1 %v3604_v6  ;;  %507 = vmatmul.f32.gmra.mxu3 %v3607_v7 }
  0x78   : > { %704 = vmatpush.msrb.mxu3 %v2766_v8  ;;  %567 = vmatpush.msrb.mxu0 %v2732_v55  ;;  %v3832_v8 = vld [vmem:[%s3380_s6 + $0xe1] sm:$0xff] }
  0x7a   : > { %705 = vmatpush.msrb.mxu3 %v2765_v11  ;;  %568 = vmatpush.msrb.mxu0 %v2731_v57  ;;  %v2807_v11 = vld [vmem:[%s4930_s1 + $0x240] sm:$0xff] }
  0x7b   : > { %603 = vmatmul.f32.gmra.mxu2 %v3674_v25 }
  0x7c   : > { %706 = vmatpush.msrb.mxu3 %v2764_v12  ;;  %569 = vmatpush.msrb.mxu0 %v2730_v63  ;;  %v2811_v63 = vld [vmem:[%s4930_s1 + $0x260] sm:$0xff]  ;;  %v2885_v12 = vld [vmem:[%s4930_s1 + $0x370] sm:$0xff] }
  0x7e   : > { %394 = vmatmul.f32.gmra.mxu0 %v3629_v13  ;;  %707 = vmatpush.msrb.mxu3 %v2763_v14  ;;  %v2922_v14 = vld [vmem:[%s4930_s1 + $0x3f8] sm:$0xff] }
  0x7f   : > { %471 = vmatmul.f32.gmra.mxu1 %v3635_v15  ;;  %510 = vmatmul.f32.gmra.mxu3 %v3638_v16 }
  0x80   : > { %570 = vmatpush.msrb.mxu0 %v2729_v1  ;;  %v3817_v1 = vld [vmem:[%s3380_s6 + $0xd9] sm:$0xff]  ;;  %1229 = vmatpush.msra.mxu3 %v2922_v14  ;;  %v2848_v14 = vld [vmem:[%s4930_s1 + $0x2e8] sm:$0xff] }
  0x82   : > { %571 = vmatpush.msrb.mxu0 %v2728_v3  ;;  %v2809_v3 = vld [vmem:[%s4930_s1 + $0x250] sm:$0xff] }
  0x83   : > { %606 = vmatmul.f32.gmra.mxu2 %v3687_v28 }
  0x84   : > { %572 = vmatpush.msrb.mxu0 %v2727_v9  ;;  %v2808_v9 = vld [vmem:[%s4930_s1 + $0x248] sm:$0xff] }
  0x86   : > { %397 = vmatmul.f32.gmra.mxu0 %v3648_v18 }
  0x87   : > { %474 = vmatmul.f32.gmra.mxu1 %v3651_v19  ;;  %513 = vmatmul.f32.gmra.mxu3 %v3654_v20 }
  0x88   : > { %826 = vmatpush.msra.mxu0 %v2814_v54  ;;  %v2884_v54 = vld [vmem:[%s4930_s1 + $0x368] sm:$0xff] }
  0x8a   : > { %827 = vmatpush.msra.mxu0 %v2813_v56  ;;  %v2921_v56 = vld [vmem:[%s4930_s1 + $0x3f0] sm:$0xff] }
  0x8b   : > { %609 = vmatmul.f32.gmra.mxu2 %v3700_v31  ;;  %1230 = vmatpush.msra.mxu3 %v2921_v56  ;;  %v2805_v56 = vld [vmem:[%s4930_s1 + $0x230] sm:$0xff] }
  0x8e   : > { %400 = vmatmul.f32.gmra.mxu0 %v3664_v22 }
  0x8f   : > { %477 = vmatmul.f32.gmra.mxu1 %v3667_v23  ;;  %516 = vmatmul.f32.gmra.mxu3 %v3670_v24 }
  0x93   : > { %612 = vmatmul.f32.gmra.mxu2 %v3713_v34 }
  0x96   : > { %403 = vmatmul.f32.gmra.mxu0 %v3680_v26 }
  0x97   : > { %480 = vmatmul.f32.gmra.mxu1 %v3683_v27  ;;  %708 = vmatmul.f32.vlgmr.msrb.gmra.mxu3 %v3571_v60  ;;  %v2812_v60 = vld [vmem:[%s4930_s1 + $0x268] sm:$0xff] }
  0x98   : > { %828 = vmatpush.msra.mxu0 %v2812_v60 }
  0x9a   : > { %829 = vmatpush.msra.mxu0 %v2811_v63  ;;  %v520_v63 = vld [vmem:[%s3380_s6 + $0x2] sm:$0xff] }
  0x9b   : > { %615 = vmatmul.f32.gmra.mxu2 %v3726_v37 }
  0x9c   : > { %830 = vmatpush.msra.mxu0 %v2810_v2  ;;  %v2806_v2 = vld [vmem:[%s4930_s1 + $0x238] sm:$0xff] }
  0x9e   : > { %406 = vmatmul.f32.gmra.mxu0 %v3693_v29 }
  0x9f   : > { %483 = vmatmul.f32.gmra.mxu1 %v3696_v30  ;;  %711 = vmatmul.f32.gmra.mxu3 %v3604_v6 }
  0xa0   : > { %831 = vmatpush.msra.mxu0 %v2809_v3 }
  0xa2   : > { %832 = vmatpush.msra.mxu0 %v2808_v9  ;;  %v2849_v9 = vld [vmem:[%s4930_s1 + $0x2f0] sm:$0xff] }
  0xa3   : > { %618 = vmatmul.f32.gmra.mxu2 %v3739_v40 }
  0xa4   : > { %833 = vmatpush.msra.mxu0 %v2807_v11  ;;  %v2920_v11 = vld [vmem:[%s4930_s1 + $0x3e8] sm:$0xff] }
  0xa5   : > { %1231 = vmatpush.msra.mxu3 %v2920_v11  ;;  %v2917_v11 = vld [vmem:[%s4930_s1 + $0x3d0] sm:$0xff] }
  0xa6   : > { %409 = vmatmul.f32.gmra.mxu0 %v3706_v32 }
  0xa7   : > { %486 = vmatmul.f32.gmra.mxu1 %v3709_v33  ;;  %714 = vmatmul.f32.gmra.mxu3 %v3635_v15 }
  0xa8   : > { %834 = vmatpush.msra.mxu0 %v2806_v2  ;;  %v2847_v2 = vld [vmem:[%s4930_s1 + $0x2e0] sm:$0xff] }
  0xaa   : > { %835 = vmatpush.msra.mxu0 %v2805_v56  ;;  %v521_v56 = vld [vmem:[%s3380_s6 + $0xa] sm:$0xff] }
  0xab   : > { %621 = vmatmul.f32.gmra.mxu2 %v3752_v44 }
  0xae   : > { %412 = vmatmul.f32.gmra.mxu0 %v3719_v35 }
  0xaf   : > { %489 = vmatmul.f32.gmra.mxu1 %v3722_v36  ;;  %717 = vmatmul.f32.gmra.mxu3 %v3651_v19 }
  0xb3   : > { %624 = vmatmul.f32.gmra.mxu2 %v3762_v46 }
  0xb6   : > { %415 = vmatmul.f32.gmra.mxu0 %v3732_v38 }
  0xb7   : > { %492 = vmatmul.f32.gmra.mxu1 %v3735_v39  ;;  %720 = vmatmul.f32.gmra.mxu3 %v3667_v23 }
  0xbb   : > { %627 = vmatmul.f32.gmra.mxu2 %v3771_v48 }
  0xbe   : > { %418 = vmatmul.f32.gmra.mxu0 %v3745_v42 }
  0xbf   : > { %495 = vmatmul.f32.gmra.mxu1 %v3748_v43  ;;  %723 = vmatmul.f32.gmra.mxu3 %v3683_v27 }
  0xc3   : > { %630 = vmatmul.f32.gmra.mxu2 %v3780_v50 }
  0xc6   : > { %421 = vmatmul.f32.gmra.mxu0 %v3758_v45 }
  0xc7   : > { %726 = vmatmul.f32.gmra.mxu3 %v3696_v30 }
  0xce   : > { %424 = vmatmul.f32.gmra.mxu0 %v3767_v47 }
  0xcf   : > { %729 = vmatmul.f32.gmra.mxu3 %v3709_v33 }
  0xd6   : > { %427 = vmatmul.f32.gmra.mxu0 %v3776_v49 }
  0xd7   : > { %732 = vmatmul.f32.gmra.mxu3 %v3722_v36 }
  0xdb   : > { %v3784_v52 = vpop.f32.mrf.mxu0 }
  0xde   : > { %430 = vmatmul.f32.gmra.mxu0 %v3787_v53 }
  0xdf   : > { %735 = vmatmul.f32.gmra.mxu3 %v3735_v39 }
  0xe2   : > { %v3794_v55 = vpop.f32.mrf.mxu3 }
  0xe3   : > { %4940 = vst [vmem:[#allocation9_spill] sm:$0xff] %v3794_v55  ;;  %v3799_v57 = vpop.f32.mrf.mxu0  ;;  %v2841_v55 = vld [vmem:[%s4930_s1 + $0x2b0] sm:$0xff] }
  0xe6   : > { %433 = vmatmul.f32.gmra.mxu0 %v3802_v59 }
  0xe7   : > { %738 = vmatmul.f32.gmra.mxu3 %v3748_v43 }
  0xea   : > { %v3809_v62 = vpop.f32.mrf.mxu3 }
  0xeb   : > { %4941 = vst [vmem:[#allocation10_spill] sm:$0xff] %v3809_v62  ;;  %v3814_v0 = vpop.f32.mrf.mxu0 }
  0xee   : > { %436 = vmatmul.f32.gmra.mxu0 %v3817_v1 }
  0xef   : > { %741 = vmatmul.f32.gmra.mxu3 %v3513_v41  ;;  %v2886_v41 = vld [vmem:[%s4930_s1 + $0x378] sm:$0xff] }
  0xf0   : > { %1095 = vmatpush.msrb.mxu2 %v2886_v41  ;;  %v2883_v41 = vld [vmem:[%s4930_s1 + $0x360] sm:$0xff] }
  0xf2   : > { %v3827_v5 = vpop.f32.mrf.mxu3  ;;  %1096 = vmatpush.msrb.mxu2 %v2885_v12  ;;  %v3877_v12 = vpop.f32.mrf.mxu1 }
  0xf3   : > { %4942 = vst [vmem:[#allocation11_spill] sm:$0xff] %v3827_v5  ;;  %v3829_v6 = vpop.f32.mrf.mxu0  ;;  %v2878_v5 = vld [vmem:[%s4930_s1 + $0x338] sm:$0xff] }
  0xf4   : > { %1097 = vmatpush.msrb.mxu2 %v2884_v54  ;;  %v2919_v54 = vld [vmem:[%s4930_s1 + $0x3e0] sm:$0xff] }
  0xf5   : > { %1232 = vmatpush.msra.mxu3 %v2919_v54 }
  0xf6   : > { %439 = vmatmul.f32.gmra.mxu0 %v3832_v8  ;;  %1098 = vmatpush.msrb.mxu2 %v2883_v41  ;;  %v2880_v41 = vld [vmem:[%s4930_s1 + $0x348] sm:$0xff] }
  0xf7   : > { %744 = vmatmul.f32.gmra.mxu3 %v3542_v51  ;;  %v2850_v51 = vld [vmem:[%s4930_s1 + $0x2f8] sm:$0xff] }
  0xf8   : > { %960 = vmatpush.msrb.mxu1 %v2850_v51  ;;  %v2882_v51 = vld [vmem:[%s4930_s1 + $0x358] sm:$0xff] }
  0xf9   : > { %1099 = vmatpush.msrb.mxu2 %v2882_v51  ;;  %v2804_v51 = vld [vmem:[%s4930_s1 + $0x228] sm:$0xff] }
  0xfa   : > { %v3860_v60 = vpop.f32.mrf.mxu3  ;;  %961 = vmatpush.msrb.mxu1 %v2849_v9  ;;  %v2881_v9 = vld [vmem:[%s4930_s1 + $0x350] sm:$0xff]  ;;  %836 = vmatpush.msra.mxu0 %v2804_v51  ;;  %v2844_v51 = vld [vmem:[%s4930_s1 + $0x2c8] sm:$0xff] }
  0xfb   : > { %v3866_v3 = vpop.f32.mrf.mxu0  ;;  %1100 = vmatpush.msrb.mxu2 %v2881_v9  ;;  %v2879_v9 = vld [vmem:[%s4930_s1 + $0x340] sm:$0xff] }
  0xfc   : > { %4943 = vst [vmem:[#allocation12_spill] sm:$0xff] %v3866_v3  ;;  %962 = vmatpush.msrb.mxu1 %v2848_v14 }
  0xfd   : > { %1101 = vmatpush.msrb.mxu2 %v2880_v41  ;;  %v2803_v41 = vld [vmem:[%s4930_s1 + $0x220] sm:$0xff] }
  0xfe   : > { %573 = vmatmul.f32.vlgmr.msrb.gmra.mxu0 %v520_v63  ;;  %963 = vmatpush.msrb.mxu1 %v2847_v2  ;;  %v2846_v63 = vld [vmem:[%s4930_s1 + $0x2d8] sm:$0xff]  ;;  %v2845_v2 = vld [vmem:[%s4930_s1 + $0x2d0] sm:$0xff] }
  0xff   : > { %747 = vmatmul.f32.gmra.mxu3 %v3574_v61  ;;  %v2918_v61 = vld [vmem:[%s4930_s1 + $0x3d8] sm:$0xff]  ;;  %1102 = vmatpush.msrb.mxu2 %v2879_v9 }
 0x100   : > { %1233 = vmatpush.msra.mxu3 %v2918_v61  ;;  %964 = vmatpush.msrb.mxu1 %v2846_v63  ;;  %v2916_v61 = vld [vmem:[%s4930_s1 + $0x3c8] sm:$0xff]  ;;  %v3930_v63 = vpop.f32.mrf.mxu1  ;;  %v2914_v9 = vld [vmem:[%s4930_s1 + $0x3b8] sm:$0xff] }
 0x101   : > { %837 = vmatpush.msra.mxu0 %v2803_v41  ;;  %1103 = vmatpush.msrb.mxu2 %v2878_v5  ;;  %v2876_v41 = vld [vmem:[%s4930_s1 + $0x328] sm:$0xff]  ;;  %v3965_v5 = vld [vmem:[%s3380_s6 + $0x1a] sm:$0xff] }
 0x102   : > { %v3910_v14 = vpop.f32.mrf.mxu3  ;;  %1234 = vmatpush.msra.mxu3 %v2917_v11  ;;  %965 = vmatpush.msrb.mxu1 %v2845_v2  ;;  %v2915_v11 = vld [vmem:[%s4930_s1 + $0x3c0] sm:$0xff]  ;;  %v2802_v2 = vld [vmem:[%s4930_s1 + $0x218] sm:$0xff] }
 0x103   : > { %v3915_v54 = vpop.f32.mrf.mxu0  ;;  %838 = vmatpush.msra.mxu0 %v2802_v2  ;;  %v2801_v2 = vld [vmem:[%s4930_s1 + $0x210] sm:$0xff] }
 0x104   : > { %4944 = vst [vmem:[#allocation13_spill] sm:$0xff] %v3915_v54  ;;  %966 = vmatpush.msrb.mxu1 %v2844_v51  ;;  %1235 = vmatpush.msra.mxu3 %v2916_v61  ;;  %v2842_v51 = vld [vmem:[%s4930_s1 + $0x2b8] sm:$0xff] }
 0x105   : > { %839 = vmatpush.msra.mxu0 %v2801_v2  ;;  %v2872_v2 = vld [vmem:[%s4930_s1 + $0x308] sm:$0xff] }
 0x106   : > { %576 = vmatmul.f32.gmra.mxu0 %v521_v56  ;;  %v2843_v56 = vld [vmem:[%s4930_s1 + $0x2c0] sm:$0xff]  ;;  %1236 = vmatpush.msra.mxu3 %v2915_v11 }
 0x107   : > { %750 = vmatmul.f32.gmra.mxu3 %v3607_v7  ;;  %v2877_v7 = vld [vmem:[%s4930_s1 + $0x330] sm:$0xff]  ;;  %967 = vmatpush.msrb.mxu1 %v2843_v56  ;;  %v2875_v11 = vld [vmem:[%s4930_s1 + $0x320] sm:$0xff] }
 0x108   : > { %1104 = vmatpush.msrb.mxu2 %v2877_v7  ;;  %v2913_v56 = vld [vmem:[%s4930_s1 + $0x3b0] sm:$0xff]  ;;  %1237 = vmatpush.msra.mxu3 %v2914_v9  ;;  %v2912_v7 = vld [vmem:[%s4930_s1 + $0x3a8] sm:$0xff] }
 0x109   : > { %968 = vmatpush.msrb.mxu1 %v2842_v51  ;;  %v2840_v9 = vld [vmem:[%s4930_s1 + $0x2a8] sm:$0xff]  ;;  %v2874_v51 = vld [vmem:[%s4930_s1 + $0x318] sm:$0xff] }
 0x10a   : > { %v3957_v61 = vpop.f32.mrf.mxu3  ;;  %1105 = vmatpush.msrb.mxu2 %v2876_v41  ;;  %1238 = vmatpush.msra.mxu3 %v2913_v56  ;;  %v2800_v41 = vld [vmem:[%s4930_s1 + $0x208] sm:$0xff]  ;;  %v3996_v56 = vpop.f32.mrf.mxu1 }
 0x10b   : > { %v3962_v62 = vpop.f32.mrf.mxu0  ;;  %969 = vmatpush.msrb.mxu1 %v2841_v55  ;;  %v2911_v55 = vld [vmem:[%s4930_s1 + $0x3a0] sm:$0xff]  ;;  %840 = vmatpush.msra.mxu0 %v2800_v41  ;;  %v2837_v41 = vld [vmem:[%s4930_s1 + $0x290] sm:$0xff] }
 0x10c   : > { %4945 = vst [vmem:[#allocation14_spill] sm:$0xff] %v3962_v62  ;;  %1106 = vmatpush.msrb.mxu2 %v2875_v11  ;;  %1239 = vmatpush.msra.mxu3 %v2912_v7  ;;  %v2839_v62 = vld [vmem:[%s4930_s1 + $0x2a0] sm:$0xff]  ;;  %v2910_v11 = vld [vmem:[%s4930_s1 + $0x398] sm:$0xff] }
 0x10d   : > { %970 = vmatpush.msrb.mxu1 %v2840_v9  ;;  %v2838_v7 = vld [vmem:[%s4930_s1 + $0x298] sm:$0xff]  ;;  %v523_v9 = vld [vmem:[%s3380_s6 + $0x22] sm:$0xff] }
 0x10e   : > { %579 = vmatmul.f32.gmra.mxu0 %v3965_v5  ;;  %1107 = vmatpush.msrb.mxu2 %v2874_v51  ;;  %v2909_v51 = vld [vmem:[%s4930_s1 + $0x390] sm:$0xff] }
 0x10f   : > { %753 = vmatmul.f32.gmra.mxu3 %v3638_v16  ;;  %v2873_v16 = vld [vmem:[%s4930_s1 + $0x310] sm:$0xff]  ;;  %971 = vmatpush.msrb.mxu1 %v2839_v62  ;;  %v2871_v62 = vld [vmem:[%s4930_s1 + $0x300] sm:$0xff] }
 0x110   : > { %1240 = vmatpush.msra.mxu3 %v2911_v55  ;;  %1108 = vmatpush.msrb.mxu2 %v2873_v16  ;;  %v2799_v55 = vld [vmem:[%s4930_s1 + $0x200] sm:$0xff]  ;;  %v2908_v16 = vld [vmem:[%s4930_s1 + $0x388] sm:$0xff] }
 0x111   : > { %972 = vmatpush.msrb.mxu1 %v2838_v7  ;;  %841 = vmatpush.msra.mxu0 %v2799_v55  ;;  %v2958_v7 = vld [vmem:[%s4930_s1 + $0x478] sm:$0xff] }
 0x112   : > { %v4007_v54 = vpop.f32.mrf.mxu3  ;;  %1241 = vmatpush.msra.mxu3 %v2910_v11  ;;  %1109 = vmatpush.msrb.mxu2 %v2872_v2  ;;  %v2836_v11 = vld [vmem:[%s4930_s1 + $0x288] sm:$0xff]  ;;  %v2907_v2 = vld [vmem:[%s4930_s1 + $0x380] sm:$0xff] }
 0x113   : > { %v4015_v3 = vpop.f32.mrf.mxu0  ;;  %973 = vmatpush.msrb.mxu1 %v2837_v41  ;;  %1363 = vmatpush.msrb.mxu0 %v2958_v7  ;;  %v4068_v7 = vld [vmem:[%s3380_s6 + $0x3a] sm:$0xff] }
 0x114   : > { %4946 = vst [vmem:[#allocation15_spill] sm:$0xff] %v4015_v3  ;;  %1242 = vmatpush.msra.mxu3 %v2909_v51  ;;  %1110 = vmatpush.msrb.mxu2 %v2871_v62  ;;  %v4047_v51 = vpop.f32.mrf.mxu1  ;;  %v4054_v62 = vld [vmem:[%s3380_s6 + $0x32] sm:$0xff] }
 0x115   : > { %1111 = vmatmul.f32.vlgmr.msrb.gmra.mxu2 %v3635_v15  ;;  %974 = vmatpush.msrb.mxu1 %v2836_v11  ;;  %v2957_v15 = vld [vmem:[%s4930_s1 + $0x470] sm:$0xff] }
 0x116   : > { %582 = vmatmul.f32.gmra.mxu0 %v523_v9  ;;  %1243 = vmatpush.msra.mxu3 %v2908_v16 }
 0x117   : > { %756 = vmatmul.f32.gmra.mxu3 %v3654_v20  ;;  %v2835_v20 = vld [vmem:[%s4930_s1 + $0x280] sm:$0xff]  ;;  %1364 = vmatpush.msrb.mxu0 %v2957_v15  ;;  %v4086_v15 = vld [vmem:[%s3380_s6 + $0x4a] sm:$0xff] }
 0x118   : > { %1244 = vmatpush.msra.mxu3 %v2907_v2  ;;  %975 = vmatpush.msrb.mxu1 %v2835_v20  ;;  %v4073_v2 = vld [vmem:[%s3380_s6 + $0xf0] sm:$0xff] }
 0x119   : > { %976 = vmatmul.f32.vlgmr.msrb.gmra.mxu1 %v3965_v5 }
 0x11a   : > { %v4049_v55 = vpop.f32.mrf.mxu3 }
 0x11b   : > { %v4051_v41 = vpop.f32.mrf.mxu0 }
 0x11c   : > { %4947 = vst [vmem:[#allocation16_spill] sm:$0xff] %v4051_v41  ;;  %v4070_v5 = vpop.f32.mrf.mxu1  ;;  %v4089_v41 = vld [vmem:[%s3380_s6 + $0xf8] sm:$0xff] }
 0x11d   : > { %1114 = vmatmul.f32.gmra.mxu2 %v3651_v19  ;;  %4948 = vst [vmem:[#allocation17_spill] sm:$0xff] %v4070_v5  ;;  %v2956_v19 = vld [vmem:[%s4930_s1 + $0x468] sm:$0xff]  ;;  %v4105_v5 = vpop.f32.mrf.mxu2 }
 0x11e   : > { %585 = vmatmul.f32.gmra.mxu0 %v4054_v62  ;;  %4951 = vst [vmem:[#allocation20_spill] sm:$0xff] %v4105_v5 }
 0x11f   : > { %759 = vmatmul.f32.gmra.mxu3 %v3670_v24  ;;  %1365 = vmatpush.msrb.mxu0 %v2956_v19  ;;  %v2955_v19 = vld [vmem:[%s4930_s1 + $0x460] sm:$0xff] }
 0x121   : > { %979 = vmatmul.f32.gmra.mxu1 %v523_v9  ;;  %1366 = vmatpush.msrb.mxu0 %v2955_v19 }
 0x122   : > { %v4063_v16 = vpop.f32.mrf.mxu3 }
 0x123   : > { %v4065_v11 = vpop.f32.mrf.mxu0 }
 0x124   : > { %v4092_v9 = vpop.f32.mrf.mxu1 }
 0x125   : > { %1117 = vmatmul.f32.gmra.mxu2 %v3667_v23  ;;  %4949 = vst [vmem:[#allocation18_spill] sm:$0xff] %v4092_v9  ;;  %v4122_v19 = vpop.f32.mrf.mxu2 }
 0x126   : > { %588 = vmatmul.f32.gmra.mxu0 %v4068_v7  ;;  %4953 = vst [vmem:[#allocation22_spill] sm:$0xff] %v4122_v19 }
 0x127   : > { %762 = vmatmul.f32.gmra.mxu3 %v4073_v2 }
 0x129   : > { %982 = vmatmul.f32.gmra.mxu1 %v4054_v62 }
 0x12a   : > { %v4078_v24 = vpop.f32.mrf.mxu3 }
 0x12b   : > { %v4083_v20 = vpop.f32.mrf.mxu0 }
 0x12c   : > { %v4109_v9 = vpop.f32.mrf.mxu1 }
 0x12d   : > { %1120 = vmatmul.f32.gmra.mxu2 %v3683_v27 }
 0x12e   : > { %591 = vmatmul.f32.gmra.mxu0 %v4086_v15 }
 0x12f   : > { %765 = vmatmul.f32.gmra.mxu3 %v4089_v41 }
 0x131   : > { %985 = vmatmul.f32.gmra.mxu1 %v4068_v7 }
 0x132   : > { %v4097_v23 = vpop.f32.mrf.mxu3 }
 0x133   : > { %4950 = vst [vmem:[#allocation19_spill] sm:$0xff] %v4097_v23  ;;  %v4099_v3 = vpop.f32.mrf.mxu0 }
 0x135   : > { %1123 = vmatmul.f32.gmra.mxu2 %v3696_v30  ;;  %v4125_v30 = vpop.f32.mrf.mxu1 }
 0x136   : > { %842 = vmatmul.f32.vlgmr.msra.gmra.mxu0 %v3565_v58  ;;  %v2954_v58 = vld [vmem:[%s4930_s1 + $0x458] sm:$0xff]  ;;  %4954 = vst [vmem:[#allocation23_spill] sm:$0xff] %v4125_v30 }
 0x137   : > { %1245 = vmatmul.f32.vlgmr.msra.gmra.mxu3 %v3629_v13  ;;  %1367 = vmatpush.msrb.mxu0 %v2954_v58 }
 0x139   : > { %988 = vmatmul.f32.gmra.mxu1 %v4086_v15 }
 0x13a   : > { %v4112_v27 = vpop.f32.mrf.mxu3 }
 0x13b   : > { %v4114_v23 = vpop.f32.mrf.mxu0 }
 0x13c   : > { %4952 = vst [vmem:[#allocation21_spill] sm:$0xff] %v4114_v23 }
 0x13d   : > { %1126 = vmatmul.f32.gmra.mxu2 %v3709_v33  ;;  %v601_v33 = vpop.f32.mrf.mxu2  ;;  %v4142_v30 = vpop.f32.mrf.mxu1 }
 0x13e   : > { %845 = vmatmul.f32.gmra.mxu0 %v3598_v4  ;;  %v2953_v4 = vld [vmem:[%s4930_s1 + $0x450] sm:$0xff]  ;;  %4957 = vst [vmem:[#allocation26_spill] sm:$0xff] %v4142_v30 }
 0x13f   : > { %1248 = vmatmul.f32.gmra.mxu3 %v3648_v18  ;;  %1368 = vmatpush.msrb.mxu0 %v2953_v4 }
 0x141   : > { %991 = vmatmul.f32.gmra.mxu1 %v3617_v10 }
 0x142   : > { %v4127_v5 = vpop.f32.mrf.mxu3 }
 0x143   : > { %v4129_v23 = vpop.f32.mrf.mxu0 }
 0x144   : > { %4955 = vst [vmem:[#allocation24_spill] sm:$0xff] %v4129_v23 }
 0x145   : > { %1129 = vmatmul.f32.gmra.mxu2 %v3722_v36  ;;  %v2952_v36 = vld [vmem:[%s4930_s1 + $0x448] sm:$0xff]  ;;  %v604_v4 = vpop.f32.mrf.mxu2 }
 0x146   : > { %848 = vmatmul.f32.gmra.mxu0 %v3629_v13 }
 0x147   : > { %1251 = vmatmul.f32.gmra.mxu3 %v3664_v22  ;;  %1369 = vmatpush.msrb.mxu0 %v2952_v36 }
 0x149   : > { %994 = vmatmul.f32.gmra.mxu1 %v3642_v17  ;;  %v487_v17 = vpop.f32.mrf.mxu1 }
 0x14a   : > { %v4138_v58 = vpop.f32.mrf.mxu3 }
 0x14b   : > { %v4140_v19 = vpop.f32.mrf.mxu0 }
 0x14c   : > { %4956 = vst [vmem:[#allocation25_spill] sm:$0xff] %v4140_v19  ;;  %v488_v19 = vadd.f32 %v487_v17, %v4065_v11  ;;  %v2862_v17 = vld [vmem:[%s3380_s6 + $0xb0] sm:$0xff] }
 0x14d   : > { %1132 = vmatmul.f32.gmra.mxu2 %v3735_v39 }
 0x14e   : > { %851 = vmatmul.f32.gmra.mxu0 %v3648_v18  ;;  %v643_v36 = vadd.f32 %v601_v33, %v488_v19 }
 0x14f   : > { %1254 = vmatmul.f32.gmra.mxu3 %v3680_v26 }
 0x151   : > { %997 = vmatmul.f32.gmra.mxu1 %v3658_v21  ;;  %v607_v21 = vpop.f32.mrf.mxu2 }
 0x152   : > { %v4148_v10 = vpop.f32.mrf.mxu3 }
 0x153   : > { %v4150_v13 = vpop.f32.mrf.mxu0 }
 0x154   : > { %4958 = vst [vmem:[#allocation27_spill] sm:$0xff] %v4150_v13  ;;  %v2951_v13 = vld [vmem:[%s4930_s1 + $0x440] sm:$0xff] }
 0x155   : > { %1135 = vmatmul.f32.gmra.mxu2 %v3748_v43  ;;  %1370 = vmatpush.msrb.mxu0 %v2951_v13  ;;  %v490_v43 = vpop.f32.mrf.mxu1 }
 0x156   : > { %854 = vmatmul.f32.gmra.mxu0 %v3664_v22  ;;  %v2860_v22 = vld [vmem:[%s3380_s6 + $0x98] sm:$0xff]  ;;  %v491_v11 = vadd.f32 %v490_v43, %v4083_v20 }
 0x157   : > { %1257 = vmatmul.f32.gmra.mxu3 %v3693_v29 }
 0x159   : > { %1000 = vmatmul.f32.gmra.mxu1 %v3674_v25  ;;  %v2861_v25 = vld [vmem:[%s3380_s6 + $0xa8] sm:$0xff]  ;;  %v4183_v19 = vpop.f32.mrf.mxu2 }
 0x15a   : > { %v4159_v18 = vpop.f32.mrf.mxu3  ;;  %4960 = vst [vmem:[#allocation29_spill] sm:$0xff] %v4183_v19 }
 0x15b   : > { %4959 = vst [vmem:[#allocation28_spill] sm:$0xff] %v4159_v18  ;;  %v4161_v39 = vpop.f32.mrf.mxu0 }
 0x15d   : > { %1138 = vmatmul.f32.gmra.mxu2 %v2860_v22  ;;  %v493_v33 = vpop.f32.mrf.mxu1 }
 0x15e   : > { %857 = vmatmul.f32.gmra.mxu0 %v3680_v26  ;;  %v2950_v26 = vld [vmem:[%s4930_s1 + $0x438] sm:$0xff] }
 0x15f   : > { %1260 = vmatmul.f32.gmra.mxu3 %v3706_v32  ;;  %1371 = vmatpush.msrb.mxu0 %v2950_v26 }
 0x161   : > { %1003 = vmatmul.f32.gmra.mxu1 %v3687_v28  ;;  %v4197_v43 = vpop.f32.mrf.mxu2 }
 0x162   : > { %v736_v23 = vpop.f32.mrf.mxu3  ;;  %4961 = vst [vmem:[#allocation30_spill] sm:$0xff] %v4197_v43  ;;  %v2936_v43 = vld [vmem:[%s3380_s6 + $0xca] sm:$0xff] }
 0x163   : > { %v4171_v18 = vadd.f32 %v736_v23, %v643_v36  ;;  %v4173_v30 = vpop.f32.mrf.mxu0  ;;  %v644_v23 = vadd.f32 %v604_v4, %v491_v11  ;;  %v2949_v4 = vld [vmem:[%s4930_s1 + $0x430] sm:$0xff] }
 0x164   : > { %1372 = vmatpush.msrb.mxu0 %v2949_v4 }
 0x165   : > { %1141 = vmatmul.f32.gmra.mxu2 %v2861_v25  ;;  %v2948_v25 = vld [vmem:[%s4930_s1 + $0x428] sm:$0xff] }
 0x166   : > { %860 = vmatmul.f32.gmra.mxu0 %v3693_v29  ;;  %v494_v29 = vadd.f32 %v493_v33, %v4099_v3  ;;  %v2947_v33 = vld [vmem:[%s4930_s1 + $0x420] sm:$0xff] }
 0x167   : > { %1263 = vmatmul.f32.gmra.mxu3 %v3719_v35  ;;  %1373 = vmatpush.msrb.mxu0 %v2948_v25 }
 0x168   : > { %v645_v22 = vadd.f32 %v607_v21, %v494_v29 }
 0x169   : > { %1006 = vmatmul.f32.gmra.mxu1 %v3700_v31  ;;  %v2863_v31 = vld [vmem:[%s3380_s6 + $0xc0] sm:$0xff]  ;;  %v4214_v26 = vpop.f32.mrf.mxu2  ;;  %1374 = vmatpush.msrb.mxu0 %v2947_v33 }
 0x16a   : > { %v739_v13 = vpop.f32.mrf.mxu3  ;;  %4963 = vst [vmem:[#allocation32_spill] sm:$0xff] %v4214_v26  ;;  %v2935_v26 = vld [vmem:[%s3380_s6 + $0xc2] sm:$0xff] }
 0x16b   : > { %v4185_v20 = vadd.f32 %v739_v13, %v644_v23  ;;  %v4187_v28 = vpop.f32.mrf.mxu0 }
 0x16d   : > { %1144 = vmatmul.f32.gmra.mxu2 %v2862_v17  ;;  %v2866_v17 = vld [vmem:[%s3380_s6 + $0xe0] sm:$0xff] }
 0x16e   : > { %863 = vmatmul.f32.gmra.mxu0 %v3706_v32 }
 0x16f   : > { %1266 = vmatmul.f32.gmra.mxu3 %v3732_v38 }
 0x171   : > { %1009 = vmatmul.f32.gmra.mxu1 %v3713_v34  ;;  %v2864_v34 = vld [vmem:[%s3380_s6 + $0xc8] sm:$0xff]  ;;  %v4228_v13 = vpop.f32.mrf.mxu2 }
 0x172   : > { %v742_v36 = vpop.f32.mrf.mxu3  ;;  %4965 = vst [vmem:[#allocation34_spill] sm:$0xff] %v4228_v13 }
 0x173   : > { %v4199_v11 = vadd.f32 %v742_v36, %v645_v22  ;;  %v4201_v3 = vpop.f32.mrf.mxu0  ;;  %v509_v36 = vadd.f32 %v3860_v60, %v4161_v39 }
 0x175   : > { %1147 = vmatmul.f32.gmra.mxu2 %v2863_v31 }
 0x176   : > { %866 = vmatmul.f32.gmra.mxu0 %v3719_v35 }
 0x177   : > { %1269 = vmatmul.f32.gmra.mxu3 %v3745_v42 }
 0x179   : > { %1012 = vmatmul.f32.gmra.mxu1 %v3726_v37  ;;  %v2865_v37 = vld [vmem:[%s3380_s6 + $0xd8] sm:$0xff] }
 0x17a   : > { %v4207_v32 = vpop.f32.mrf.mxu3 }
 0x17b   : > { %4962 = vst [vmem:[#allocation31_spill] sm:$0xff] %v4207_v32  ;;  %v4209_v21 = vpop.f32.mrf.mxu0 }
 0x17d   : > { %1150 = vmatmul.f32.gmra.mxu2 %v2864_v34 }
 0x17e   : > { %869 = vmatmul.f32.gmra.mxu0 %v3732_v38 }
 0x17f   : > { %1272 = vmatmul.f32.gmra.mxu3 %v3758_v45 }
 0x181   : > { %1015 = vmatmul.f32.gmra.mxu1 %v3739_v40  ;;  %v2946_v40 = vld [vmem:[%s4930_s1 + $0x418] sm:$0xff] }
 0x182   : > { %v4220_v35 = vpop.f32.mrf.mxu3  ;;  %1375 = vmatpush.msrb.mxu0 %v2946_v40 }
 0x183   : > { %4964 = vst [vmem:[#allocation33_spill] sm:$0xff] %v4220_v35  ;;  %v4222_v23 = vpop.f32.mrf.mxu0 }
 0x185   : > { %1153 = vmatmul.f32.gmra.mxu2 %v2865_v37  ;;  %v2944_v37 = vld [vmem:[%s4930_s1 + $0x408] sm:$0xff] }
 0x186   : > { %872 = vmatmul.f32.gmra.mxu0 %v3745_v42  ;;  %v622_v42 = vpop.f32.mrf.mxu2 }
 0x187   : > { %1275 = vmatmul.f32.gmra.mxu3 %v3767_v47 }
 0x189   : > { %1018 = vmatmul.f32.gmra.mxu1 %v3752_v44  ;;  %v2945_v44 = vld [vmem:[%s4930_s1 + $0x410] sm:$0xff] }
 0x18a   : > { %v4233_v38 = vpop.f32.mrf.mxu3  ;;  %1376 = vmatpush.msrb.mxu0 %v2945_v44 }
 0x18b   : > { %4966 = vst [vmem:[#allocation35_spill] sm:$0xff] %v4233_v38  ;;  %v4235_v29 = vpop.f32.mrf.mxu0 }
 0x18c   : > { %1377 = vmatpush.msrb.mxu0 %v2944_v37  ;;  %v2906_v37 = vld [vmem:[%s3380_s6 + $0x111] sm:$0xff] }
 0x18d   : > { %1156 = vmatmul.f32.gmra.mxu2 %v2866_v17  ;;  %v4281_v17 = vld [vmem:[%s3380_s6 + $0xf2] sm:$0xff] }
 0x18e   : > { %875 = vmatmul.f32.gmra.mxu0 %v3758_v45  ;;  %v650_v45 = vadd.f32 %v622_v42, %v509_v36  ;;  %v625_v31 = vpop.f32.mrf.mxu2 }
 0x18f   : > { %1278 = vmatmul.f32.gmra.mxu3 %v3776_v49 }
 0x191   : > { %1021 = vmatmul.f32.gmra.mxu1 %v3762_v46  ;;  %v512_v46 = vadd.f32 %v3910_v14, %v4173_v30 }
 0x192   : > { %v4244_v4 = vpop.f32.mrf.mxu3 }
 0x193   : > { %4967 = vst [vmem:[#allocation36_spill] sm:$0xff] %v4244_v4  ;;  %v4246_v22 = vpop.f32.mrf.mxu0  ;;  %v2934_v4 = vld [vmem:[%s3380_s6 + $0xb2] sm:$0xff] }
 0x195   : > { %1159 = vmatmul.f32.gmra.mxu2 %v4073_v2 }
 0x196   : > { %878 = vmatmul.f32.gmra.mxu0 %v3767_v47  ;;  %v651_v47 = vadd.f32 %v625_v31, %v512_v46  ;;  %v628_v14 = vpop.f32.mrf.mxu2 }
 0x197   : > { %1281 = vmatmul.f32.gmra.mxu3 %v3787_v53 }
 0x199   : > { %1024 = vmatmul.f32.gmra.mxu1 %v3771_v48  ;;  %v515_v48 = vadd.f32 %v3957_v61, %v4187_v28  ;;  %v2870_v28 = vld [vmem:[%s3380_s6 + $0x110] sm:$0xff] }
 0x19a   : > { %v757_v25 = vpop.f32.mrf.mxu3 }
 0x19b   : > { %v4257_v34 = vadd.f32 %v757_v25, %v650_v45  ;;  %v4259_v33 = vpop.f32.mrf.mxu0  ;;  %v4297_v45 = vld [vmem:[%s3380_s6 + $0xfa] sm:$0xff] }
 0x19c   : > { %v2904_v25 = vld [vmem:[%s3380_s6 + $0xf9] sm:$0xff] }
 0x19d   : > { %1162 = vmatmul.f32.gmra.mxu2 %v4089_v41  ;;  %v652_v41 = vadd.f32 %v628_v14, %v515_v48 }
 0x19e   : > { %881 = vmatmul.f32.gmra.mxu0 %v3776_v49  ;;  %v2869_v49 = vld [vmem:[%s3380_s6 + $0x108] sm:$0xff]  ;;  %v631_v61 = vpop.f32.mrf.mxu2 }
 0x19f   : > { %1284 = vmatmul.f32.gmra.mxu3 %v3802_v59 }
 0x1a1   : > { %1027 = vmatmul.f32.gmra.mxu1 %v3780_v50  ;;  %v2943_v50 = vld [vmem:[%s4930_s1 + $0x400] sm:$0xff] }
 0x1a2   : > { %v760_v60 = vpop.f32.mrf.mxu3  ;;  %1378 = vmatpush.msrb.mxu0 %v2943_v50  ;;  %v2928_v50 = vld [vmem:[%s3380_s6 + $0x6a] sm:$0xff] }
 0x1a3   : > { %v4267_v2 = vadd.f32 %v760_v60, %v651_v47  ;;  %v4269_v39 = vpop.f32.mrf.mxu0  ;;  %v2905_v47 = vld [vmem:[%s3380_s6 + $0x109] sm:$0xff] }
 0x1a5   : > { %1165 = vmatmul.f32.gmra.mxu2 %v2869_v49  ;;  %v2926_v49 = vld [vmem:[%s3380_s6 + $0x52] sm:$0xff] }
 0x1a6   : > { %884 = vmatmul.f32.gmra.mxu0 %v3787_v53  ;;  %v518_v53 = vadd.f32 %v4007_v54, %v4201_v3  ;;  %v2903_v3 = vld [vmem:[%s3380_s6 + $0xf1] sm:$0xff] }
 0x1a7   : > { %1287 = vmatmul.f32.gmra.mxu3 %v3817_v1 }
 0x1a8   : > { %v653_v36 = vadd.f32 %v631_v61, %v518_v53  ;;  %v2929_v53 = vld [vmem:[%s3380_s6 + $0x7a] sm:$0xff]  ;;  %v2930_v61 = vld [vmem:[%s3380_s6 + $0x82] sm:$0xff] }
 0x1a9   : > { %1030 = vmatmul.f32.gmra.mxu1 %v4281_v17 }
 0x1aa   : > { %v763_v30 = vpop.f32.mrf.mxu3 }
 0x1ab   : > { %v4283_v40 = vadd.f32 %v763_v30, %v652_v41  ;;  %v4285_v42 = vpop.f32.mrf.mxu0  ;;  %v2927_v30 = vld [vmem:[%s3380_s6 + $0x62] sm:$0xff] }
 0x1ad   : > { %1168 = vmatmul.f32.gmra.mxu2 %v2870_v28 }
 0x1ae   : > { %887 = vmatmul.f32.gmra.mxu0 %v3802_v59 }
 0x1af   : > { %1290 = vmatmul.f32.gmra.mxu3 %v3832_v8 }
 0x1b1   : > { %1033 = vmatmul.f32.gmra.mxu1 %v4297_v45 }
 0x1b2   : > { %v766_v44 = vpop.f32.mrf.mxu3 }
 0x1b3   : > { %v4299_v31 = vadd.f32 %v766_v44, %v653_v36  ;;  %v4301_v54 = vpop.f32.mrf.mxu0  ;;  %v2931_v36 = vld [vmem:[%s3380_s6 + $0x92] sm:$0xff]  ;;  %v4343_v44 = vpop.f32.mrf.mxu1 }
 0x1b6   : > { %890 = vmatmul.f32.gmra.mxu0 %v3817_v1 }
 0x1b7   : > { %1293 = vmatmul.f32.gmra.mxu3 %v2903_v3 }
 0x1bb   : > { %v4306_v59 = vpop.f32.mrf.mxu0 }
 0x1be   : > { %893 = vmatmul.f32.gmra.mxu0 %v3832_v8 }
 0x1bf   : > { %1296 = vmatmul.f32.gmra.mxu3 %v2904_v25 }
 0x1c3   : > { %v4310_v46 = vpop.f32.mrf.mxu0 }
 0x1c6   : > { %896 = vmatmul.f32.gmra.mxu0 %v2903_v3 }
 0x1c7   : > { %1299 = vmatmul.f32.gmra.mxu3 %v2905_v47  ;;  %v977_v47 = vpop.f32.mrf.mxu1 }
 0x1cb   : > { %v4313_v60 = vpop.f32.mrf.mxu0 }
 0x1ce   : > { %899 = vmatmul.f32.gmra.mxu0 %v2904_v25  ;;  %v2932_v25 = vld [vmem:[%s3380_s6 + $0x9a] sm:$0xff] }
 0x1cf   : > { %1302 = vmatmul.f32.gmra.mxu3 %v2906_v37 }
 0x1d3   : > { %v4316_v1 = vpop.f32.mrf.mxu0 }
 0x1d6   : > { %1379 = vmatmul.f32.vlgmr.msrb.gmra.mxu0 %v4054_v62 }
 0x1db   : > { %v4319_v8 = vpop.f32.mrf.mxu0 }
 0x1de   : > { %1382 = vmatmul.f32.gmra.mxu0 %v4068_v7 }
 0x1e3   : > { %v4322_v14 = vpop.f32.mrf.mxu0 }
 0x1e6   : > { %1385 = vmatmul.f32.gmra.mxu0 %v4086_v15 }
 0x1eb   : > { %v4325_v48 = vpop.f32.mrf.mxu0 }
 0x1ee   : > { %1388 = vmatmul.f32.gmra.mxu0 %v2926_v49  ;;  %v2933_v49 = vld [vmem:[%s3380_s6 + $0xaa] sm:$0xff] }
 0x1f3   : > { %v4328_v41 = vpop.f32.mrf.mxu0 }
 0x1f6   : > { %1391 = vmatmul.f32.gmra.mxu0 %v2927_v30  ;;  %v1112_v30 = vpop.f32.mrf.mxu2 }
 0x1fb   : > { %v4331_v62 = vpop.f32.mrf.mxu0 }
 0x1fe   : > { %1394 = vmatmul.f32.gmra.mxu0 %v2928_v50  ;;  %v1246_v50 = vpop.f32.mrf.mxu3 }
 0x203   : > { %v4334_v7 = vpop.f32.mrf.mxu0 }
 0x206   : > { %1397 = vmatmul.f32.gmra.mxu0 %v2929_v53  ;;  %v980_v53 = vpop.f32.mrf.mxu1  ;;  %v1249_v13 = vpop.f32.mrf.mxu3 }
 0x20b   : > { %v4337_v15 = vpop.f32.mrf.mxu0 }
 0x20c   : > { %4968 = vst [vmem:[#allocation37_spill] sm:$0xff] %v4337_v15 }
 0x20e   : > { %1400 = vmatmul.f32.gmra.mxu0 %v2930_v61 }
 0x213   : > { %v4340_v28 = vpop.f32.mrf.mxu0 }
 0x214   : > { %4969 = vst [vmem:[#allocation38_spill] sm:$0xff] %v4340_v28  ;;  %v1252_v28 = vpop.f32.mrf.mxu3 }
 0x216   : > { %1403 = vmatmul.f32.gmra.mxu0 %v2931_v36  ;;  %v1115_v36 = vpop.f32.mrf.mxu2 }
 0x21b   : > { %v4345_v3 = vpop.f32.mrf.mxu0 }
 0x21c   : > { %4970 = vst [vmem:[#allocation39_spill] sm:$0xff] %v4345_v3  ;;  %v983_v3 = vpop.f32.mrf.mxu1 }
 0x21e   : > { %1406 = vmatmul.f32.gmra.mxu0 %v2932_v25 }
 0x223   : > { %v4348_v37 = vpop.f32.mrf.mxu0 }
 0x224   : > { %4971 = vst [vmem:[#allocation40_spill] sm:$0xff] %v4348_v37  ;;  %v1118_v37 = vpop.f32.mrf.mxu2 }
 0x226   : > { %1409 = vmatmul.f32.gmra.mxu0 %v2933_v49 }
 0x22b   : > { %v4351_v61 = vpop.f32.mrf.mxu0 }
 0x22c   : > { %4972 = vst [vmem:[#allocation41_spill] sm:$0xff] %v4351_v61  ;;  %v986_v61 = vpop.f32.mrf.mxu1  ;;  %v4365_v19 = vpop.f32.mrf.mxu2 }
 0x22e   : > { %1412 = vmatmul.f32.gmra.mxu0 %v2934_v4  ;;  %v461_v4 = vadd.f32 %v3877_v12, %v3784_v52  ;;  %v1255_v52 = vpop.f32.mrf.mxu3 }
 0x230   : > { %v634_v32 = vadd.f32 %v4209_v21, %v461_v4 }
 0x233   : > { %v891_v38 = vpop.f32.mrf.mxu0 }
 0x234   : > { %v4356_v25 = vadd.f32 %v891_v38, %v4257_v34  ;;  %v2937_v34 = vld [vmem:[%s3380_s6 + $0xda] sm:$0xff] }
 0x236   : > { %4973 = vst [vmem:[#allocation42_spill] sm:$0xff] %v4356_v25  ;;  %1415 = vmatmul.f32.gmra.mxu0 %v2935_v26  ;;  %v769_v26 = vadd.f32 %v4049_v55, %v634_v32  ;;  %v4381_v32 = vpop.f32.mrf.mxu2 }
 0x23b   : > { %v894_v35 = vpop.f32.mrf.mxu0 }
 0x23c   : > { %v4360_v49 = vadd.f32 %v894_v35, %v4267_v2  ;;  %v464_v35 = vadd.f32 %v3930_v63, %v3799_v57  ;;  %v903_v2 = vadd.f32 %v4301_v54, %v769_v26  ;;  %v467_v57 = vadd.f32 %v3996_v56, %v3814_v0  ;;  %v4387_v54 = vpop.f32.mrf.mxu3 }
 0x23d   : > { %v470_v56 = vadd.f32 %v4047_v51, %v3829_v6 }
 0x23e   : > { %4974 = vst [vmem:[#allocation43_spill] sm:$0xff] %v4360_v49  ;;  %1418 = vmatmul.f32.gmra.mxu0 %v2936_v43  ;;  %v635_v12 = vadd.f32 %v4222_v23, %v464_v35  ;;  %v989_v43 = vpop.f32.mrf.mxu1  ;;  %v1037_v21 = vadd.f32 %v977_v47, %v903_v2  ;;  %v2938_v49 = vld [vmem:[%s3380_s6 + $0xe2] sm:$0xff]  ;;  %v636_v23 = vadd.f32 %v4235_v29, %v467_v57 }
 0x240   : > { %v770_v15 = vadd.f32 %v4063_v16, %v635_v12  ;;  %v1172_v63 = vadd.f32 %v1112_v30, %v1037_v21  ;;  %v4392_v16 = vld [vmem:[%s4931_s2] ss:$0 sm:$0xff]  ;;  %v771_v26 = vadd.f32 %v4078_v24, %v636_v23  ;;  %v1127_v30 = vpop.f32.mrf.mxu2 }
 0x241   : > { %v4975_v12 = vld [vmem:[#allocation19_spill] sm:$0xff] }
 0x242   : > { %v1306_v47 = vadd.f32 %v1246_v50, %v1172_v63  ;;  %v905_v29 = vadd.f32 %v4310_v46, %v771_v26  ;;  %v637_v50 = vadd.f32 %v4246_v22, %v470_v56  ;;  %v4977_v46 = vld [vmem:[#allocation17_spill] sm:$0xff] }
 0x243   : > { %v897_v38 = vpop.f32.mrf.mxu0 }
 0x244   : > { %v4370_v25 = vadd.f32 %v897_v38, %v4283_v40  ;;  %v904_v40 = vadd.f32 %v4306_v59, %v770_v15  ;;  %v1039_v35 = vadd.f32 %v983_v3, %v905_v29  ;;  %v1261_v2 = vpop.f32.mrf.mxu3  ;;  %v772_v21 = vadd.f32 %v4975_v12, %v637_v50  ;;  %v4980_v12 = vld [vmem:[#allocation14_spill] sm:$0xff] }
 0x246   : > { %1421 = vmatmul.f32.gmra.mxu0 %v2937_v34  ;;  %v1038_v38 = vadd.f32 %v980_v53, %v904_v40  ;;  %v1174_v57 = vadd.f32 %v1118_v37, %v1039_v35 }
 0x248   : > { %v1173_v59 = vadd.f32 %v1115_v36, %v1038_v38  ;;  %v4976_v36 = vld [vmem:[#allocation12_spill] sm:$0xff]  ;;  %v1130_v3 = vpop.f32.mrf.mxu2  ;;  %v1308_v40 = vadd.f32 %v1252_v28, %v1174_v57 }
 0x249   : > { %v2941_v38 = vld [vmem:[%s3380_s6 + $0x10a] sm:$0xff] }
 0x24b   : > { %v900_v4 = vpop.f32.mrf.mxu0 }
 0x24c   : > { %v4379_v55 = vadd.f32 %v900_v4, %v4299_v31  ;;  %v992_v31 = vpop.f32.mrf.mxu1  ;;  %v473_v4 = vadd.f32 %v4977_v46, %v4976_v36  ;;  %v1264_v37 = vpop.f32.mrf.mxu3 }
 0x24e   : > { %1424 = vmatmul.f32.gmra.mxu0 %v2938_v49  ;;  %v1307_v49 = vadd.f32 %v1249_v13, %v1173_v59  ;;  %v638_v13 = vadd.f32 %v4259_v33, %v473_v4 }
 0x253   : > { %v1380_v34 = vpop.f32.mrf.mxu0 }
 0x254   : > { %v1440_v0 = vadd.f32 %v1380_v34, %v1306_v47  ;;  %v995_v51 = vpop.f32.mrf.mxu1  ;;  %v773_v34 = vadd.f32 %v4112_v27, %v638_v13  ;;  %v1133_v27 = vpop.f32.mrf.mxu2 }
 0x256   : > { %v1464_v15 = vadd.f32 %v4392_v16, %v1440_v0  ;;  %1427 = vmatmul.f32.gmra.mxu0 %v4281_v17  ;;  %v906_v17 = vadd.f32 %v4313_v60, %v772_v21  ;;  %v4978_v0 = vld [vmem:[#allocation13_spill] sm:$0xff]  ;;  %v4979_v60 = vld [vmem:[#allocation18_spill] sm:$0xff] }
 0x257   : > { %v476_v56 = vadd.f32 %v4979_v60, %v4978_v0  ;;  %v4984_v60 = vld [vmem:[#allocation16_spill] sm:$0xff] }
 0x258   : > { %v1484_v53 = vmax.f32 %v1464_v15, 0.0  ;;  %v1040_v23 = vadd.f32 %v986_v61, %v906_v17 }
 0x259   : > { %v639_v61 = vadd.f32 %v4269_v39, %v476_v56  ;;  %v1267_v39 = vpop.f32.mrf.mxu3  ;;  %v4985_v56 = vld [vmem:[#allocation26_spill] sm:$0xff] }
 0x25a   : > { %1504 = vst [vmem:[#allocation2 + $0x1] sm:$0xff] %v1484_v53  ;;  %v1175_v59 = vadd.f32 %v4365_v19, %v1040_v23  ;;  %v479_v19 = vadd.f32 %v4109_v9, %v4980_v12 }
 0x25b   : > { %v1383_v24 = vpop.f32.mrf.mxu0  ;;  %v774_v35 = vadd.f32 %v4127_v5, %v639_v61 }
 0x25c   : > { %v1441_v6 = vadd.f32 %v1383_v24, %v1307_v49  ;;  %v998_v28 = vpop.f32.mrf.mxu1  ;;  %v1309_v15 = vadd.f32 %v1255_v52, %v1175_v59  ;;  %v2942_v49 = vld [vmem:[%s3380_s6 + $0x112] sm:$0xff]  ;;  %v640_v52 = vadd.f32 %v4285_v42, %v479_v19  ;;  %v1136_v17 = vpop.f32.mrf.mxu2  ;;  %v485_v59 = vadd.f32 %v4985_v56, %v4984_v60 }
 0x25d   : > { %v908_v21 = vadd.f32 %v4319_v8, %v774_v35 }
 0x25e   : > { %v1465_v63 = vadd.f32 %v4392_v16, %v1441_v6  ;;  %1430 = vmatmul.f32.gmra.mxu0 %v4297_v45  ;;  %v907_v45 = vadd.f32 %v4316_v1, %v773_v34  ;;  %v775_v57 = vadd.f32 %v4138_v58, %v640_v52 }
 0x25f   : > { %v1042_v4 = vadd.f32 %v992_v31, %v908_v21 }
 0x260   : > { %v1485_v22 = vmax.f32 %v1465_v63, 0.0  ;;  %v1041_v50 = vadd.f32 %v989_v43, %v907_v45  ;;  %v4982_v63 = vld [vmem:[#allocation23_spill] sm:$0xff] }
 0x261   : > { %v1177_v13 = vadd.f32 %v1127_v30, %v1042_v4  ;;  %v1270_v23 = vpop.f32.mrf.mxu3 }
 0x262   : > { %1505 = vst [vmem:[#allocation2 + $0x9] sm:$0xff] %v1485_v22  ;;  %v1176_v1 = vadd.f32 %v4381_v32, %v1041_v50  ;;  %v4981_v32 = vld [vmem:[#allocation15_spill] sm:$0xff]  ;;  %v909_v22 = vadd.f32 %v4322_v14, %v775_v57 }
 0x263   : > { %v1386_v47 = vpop.f32.mrf.mxu0  ;;  %v482_v8 = vadd.f32 %v4982_v63, %v4981_v32 }
 0x264   : > { %v1442_v26 = vadd.f32 %v1386_v47, %v1308_v40  ;;  %v1001_v36 = vpop.f32.mrf.mxu1  ;;  %v1310_v46 = vadd.f32 %v4387_v54, %v1176_v1  ;;  %v4983_v47 = vld [vmem:[#allocation20_spill] sm:$0xff]  ;;  %v1311_v54 = vadd.f32 %v1261_v2, %v1177_v13  ;;  %v1043_v31 = vadd.f32 %v995_v51, %v909_v22 }
 0x266   : > { %v1466_v33 = vadd.f32 %v4392_v16, %v1442_v26  ;;  %1433 = vmatmul.f32.gmra.mxu0 %v2941_v38  ;;  %v641_v38 = vadd.f32 %v4983_v47, %v482_v8  ;;  %v1178_v30 = vadd.f32 %v1130_v3, %v1043_v31  ;;  %v4988_v47 = vld [vmem:[#allocation21_spill] sm:$0xff] }
 0x267   : > { %v4989_v31 = vld [vmem:[#allocation37_spill] sm:$0xff] }
 0x268   : > { %v1486_v29 = vmax.f32 %v1466_v33, 0.0  ;;  %v776_v58 = vadd.f32 %v4148_v10, %v641_v38  ;;  %v1139_v33 = vpop.f32.mrf.mxu2  ;;  %v1312_v2 = vadd.f32 %v1264_v37, %v1178_v30  ;;  %v497_v38 = vadd.f32 %v4343_v44, %v4988_v47  ;;  %v4993_v44 = vld [vmem:[#allocation9_spill] sm:$0xff] }
 0x269   : > { %v1273_v50 = vpop.f32.mrf.mxu3 }
 0x26a   : > { %1506 = vst [vmem:[#allocation2 + $0x19] sm:$0xff] %v1486_v29  ;;  %v910_v14 = vadd.f32 %v4325_v48, %v776_v58  ;;  %v4986_v29 = vld [vmem:[#allocation22_spill] sm:$0xff]  ;;  %v4990_v58 = vld [vmem:[#allocation29_spill] sm:$0xff] }
 0x26b   : > { %v1389_v53 = vpop.f32.mrf.mxu0 }
 0x26c   : > { %v1443_v24 = vadd.f32 %v1389_v53, %v1309_v15  ;;  %v1004_v34 = vpop.f32.mrf.mxu1  ;;  %v642_v15 = vadd.f32 %v4986_v29, %v485_v59  ;;  %v1044_v51 = vadd.f32 %v998_v28, %v910_v14  ;;  %v4991_v14 = vld [vmem:[#allocation31_spill] sm:$0xff] }
 0x26e   : > { %v1467_v6 = vadd.f32 %v4392_v16, %v1443_v24  ;;  %1436 = vmatmul.f32.gmra.mxu0 %v2942_v49  ;;  %v4987_v49 = vld [vmem:[#allocation28_spill] sm:$0xff]  ;;  %v1179_v12 = vadd.f32 %v1133_v27, %v1044_v51 }
 0x26f   : > { %v777_v10 = vadd.f32 %v4987_v49, %v642_v15  ;;  %v4995_v49 = vld [vmem:[#allocation30_spill] sm:$0xff] }
 0x270   : > { %v1487_v43 = vmax.f32 %v1467_v6, 0.0  ;;  %v1142_v1 = vpop.f32.mrf.mxu2  ;;  %v1313_v21 = vadd.f32 %v1267_v39, %v1179_v12 }
 0x271   : > { %v911_v3 = vadd.f32 %v4328_v41, %v777_v10  ;;  %v1276_v28 = vpop.f32.mrf.mxu3 }
 0x272   : > { %1507 = vst [vmem:[#allocation2 + $0x21] sm:$0xff] %v1487_v43 }
 0x273   : > { %v1392_v5 = vpop.f32.mrf.mxu0  ;;  %v1045_v6 = vadd.f32 %v1001_v36, %v911_v3  ;;  %v913_v36 = vadd.f32 %v4334_v7, %v4185_v20 }
 0x274   : > { %v1444_v9 = vadd.f32 %v1392_v5, %v1310_v46  ;;  %v1007_v24 = vpop.f32.mrf.mxu1  ;;  %v912_v46 = vadd.f32 %v4331_v62, %v4171_v18 }
 0x275   : > { %v1180_v43 = vadd.f32 %v1136_v17, %v1045_v6  ;;  %v1047_v62 = vadd.f32 %v1007_v24, %v913_v36  ;;  %v4997_v6 = vld [vmem:[#allocation25_spill] sm:$0xff] }
 0x276   : > { %v1468_v40 = vadd.f32 %v4392_v16, %v1444_v9  ;;  %v1046_v41 = vadd.f32 %v1004_v34, %v912_v46  ;;  %v914_v34 = vadd.f32 %v4989_v31, %v4199_v11 }
 0x277   : > { %v1314_v57 = vadd.f32 %v1270_v23, %v1180_v43  ;;  %v4999_v43 = vld [vmem:[#allocation39_spill] sm:$0xff] }
 0x278   : > { %v1488_v42 = vmax.f32 %v1468_v40, 0.0  ;;  %v1145_v9 = vpop.f32.mrf.mxu2  ;;  %v1181_v39 = vadd.f32 %v1139_v33, %v1046_v41 }
 0x279   : > { %v1279_v17 = vpop.f32.mrf.mxu3 }
 0x27a   : > { %1508 = vst [vmem:[#allocation2 + $0x31] sm:$0xff] %v1488_v42  ;;  %v1315_v18 = vadd.f32 %v1273_v50, %v1181_v39  ;;  %v5001_v39 = vld [vmem:[#allocation35_spill] sm:$0xff] }
 0x27b   : > { %v1395_v26 = vpop.f32.mrf.mxu0 }
 0x27c   : > { %v1445_v0 = vadd.f32 %v1395_v26, %v1311_v54  ;;  %v1010_v5 = vpop.f32.mrf.mxu1  ;;  %v1182_v54 = vadd.f32 %v1142_v1, %v1047_v62 }
 0x27d   : > { %v1048_v56 = vadd.f32 %v1010_v5, %v914_v34 }
 0x27e   : > { %v1469_v45 = vadd.f32 %v4392_v16, %v1445_v0  ;;  %v646_v0 = vadd.f32 %v4990_v58, %v497_v38  ;;  %v1316_v60 = vadd.f32 %v1276_v28, %v1182_v54  ;;  %v5005_v54 = vld [vmem:[#allocation34_spill] sm:$0xff]  ;;  %v5006_v58 = vld [vmem:[#allocation36_spill] sm:$0xff] }
 0x27f   : > { %v1183_v15 = vadd.f32 %v1145_v9, %v1048_v56 }
 0x280   : > { %v1489_v61 = vmax.f32 %v1469_v45, 0.0  ;;  %v1148_v23 = vpop.f32.mrf.mxu2  ;;  %v781_v45 = vadd.f32 %v4991_v14, %v646_v0 }
 0x281   : > { %v1282_v26 = vpop.f32.mrf.mxu3 }
 0x282   : > { %1509 = vst [vmem:[#allocation2 + $0x39] sm:$0xff] %v1489_v61  ;;  %v4992_v61 = vld [vmem:[#allocation24_spill] sm:$0xff] }
 0x283   : > { %v1398_v53 = vpop.f32.mrf.mxu0  ;;  %v500_v29 = vadd.f32 %v4993_v44, %v4992_v61 }
 0x284   : > { %v1446_v35 = vadd.f32 %v1398_v53, %v1312_v2  ;;  %v1013_v22 = vpop.f32.mrf.mxu1  ;;  %v4994_v2 = vld [vmem:[#allocation38_spill] sm:$0xff] }
 0x285   : > { %v915_v11 = vadd.f32 %v4994_v2, %v781_v45  ;;  %v647_v10 = vadd.f32 %v4995_v49, %v500_v29 }
 0x286   : > { %v1470_v48 = vadd.f32 %v4392_v16, %v1446_v35  ;;  %v1317_v35 = vadd.f32 %v1279_v17, %v1183_v15 }
 0x287   : > { %v1049_v24 = vadd.f32 %v1013_v22, %v915_v11  ;;  %v5003_v22 = vld [vmem:[#allocation11_spill] sm:$0xff] }
 0x288   : > { %v1490_v19 = vmax.f32 %v1470_v48, 0.0  ;;  %v1151_v50 = vpop.f32.mrf.mxu2  ;;  %v4996_v48 = vld [vmem:[#allocation33_spill] sm:$0xff] }
 0x289   : > { %v1285_v12 = vpop.f32.mrf.mxu3  ;;  %v1184_v28 = vadd.f32 %v1148_v23, %v1049_v24 }
 0x28a   : > { %1510 = vst [vmem:[#allocation2 + $0x49] sm:$0xff] %v1490_v19  ;;  %v782_v19 = vadd.f32 %v4996_v48, %v647_v10 }
 0x28b   : > { %v1401_v52 = vpop.f32.mrf.mxu0  ;;  %v1318_v9 = vadd.f32 %v1282_v26, %v1184_v28 }
 0x28c   : > { %v1447_v37 = vadd.f32 %v1401_v52, %v1313_v21  ;;  %v1016_v59 = vpop.f32.mrf.mxu1  ;;  %v4998_v52 = vld [vmem:[#allocation10_spill] sm:$0xff]  ;;  %v916_v46 = vadd.f32 %v4999_v43, %v782_v19 }
 0x28e   : > { %v1471_v4 = vadd.f32 %v4392_v16, %v1447_v37  ;;  %v503_v37 = vadd.f32 %v4998_v52, %v4997_v6 }
 0x290   : > { %v1491_v27 = vmax.f32 %v1471_v4, 0.0 }
 0x291   : > { %v1288_v17 = vpop.f32.mrf.mxu3 }
 0x292   : > { %1511 = vst [vmem:[#allocation2 + $0x51] sm:$0xff] %v1491_v27  ;;  %v1154_v27 = vpop.f32.mrf.mxu2 }
 0x293   : > { %v1404_v32 = vpop.f32.mrf.mxu0 }
 0x294   : > { %v1448_v63 = vadd.f32 %v1404_v32, %v1314_v57  ;;  %v1019_v21 = vpop.f32.mrf.mxu1  ;;  %v5000_v57 = vld [vmem:[#allocation32_spill] sm:$0xff]  ;;  %v1050_v32 = vadd.f32 %v1016_v59, %v916_v46  ;;  %v5007_v59 = vld [vmem:[#allocation41_spill] sm:$0xff] }
 0x295   : > { %v648_v41 = vadd.f32 %v5000_v57, %v503_v37  ;;  %v5009_v37 = vld [vmem:[#allocation43_spill] sm:$0xff] }
 0x296   : > { %v1472_v8 = vadd.f32 %v4392_v16, %v1448_v63  ;;  %v1185_v62 = vadd.f32 %v1151_v50, %v1050_v32 }
 0x297   : > { %v783_v36 = vadd.f32 %v5001_v39, %v648_v41 }
 0x298   : > { %v1492_v13 = vmax.f32 %v1472_v8, 0.0  ;;  %v1319_v34 = vadd.f32 %v1285_v12, %v1185_v62 }
 0x299   : > { %v1291_v45 = vpop.f32.mrf.mxu3 }
 0x29a   : > { %1512 = vst [vmem:[#allocation2 + $0x61] sm:$0xff] %v1492_v13  ;;  %v5002_v13 = vld [vmem:[#allocation27_spill] sm:$0xff] }
 0x29b   : > { %v1407_v40 = vpop.f32.mrf.mxu0 }
 0x29c   : > { %v1449_v42 = vadd.f32 %v1407_v40, %v1315_v18  ;;  %v506_v18 = vadd.f32 %v5003_v22, %v5002_v13  ;;  %v5004_v40 = vld [vmem:[#allocation40_spill] sm:$0xff]  ;;  %v1022_v47 = vpop.f32.mrf.mxu1 }
 0x29e   : > { %v1473_v20 = vadd.f32 %v4392_v16, %v1449_v42  ;;  %v917_v42 = vadd.f32 %v5004_v40, %v783_v36  ;;  %v649_v31 = vadd.f32 %v5005_v54, %v506_v18 }
 0x2a0   : > { %v1493_v7 = vmax.f32 %v1473_v20, 0.0  ;;  %v1051_v20 = vadd.f32 %v1019_v21, %v917_v42  ;;  %v784_v0 = vadd.f32 %v5006_v58, %v649_v31 }
 0x2a1   : > { %v1294_v49 = vpop.f32.mrf.mxu3 }
 0x2a2   : > { %1513 = vst [vmem:[#allocation2 + $0x69] sm:$0xff] %v1493_v7  ;;  %v1157_v7 = vpop.f32.mrf.mxu2  ;;  %v1186_v56 = vadd.f32 %v1154_v27, %v1051_v20 }
 0x2a3   : > { %v1410_v30 = vpop.f32.mrf.mxu0 }
 0x2a4   : > { %v1450_v33 = vadd.f32 %v1410_v30, %v1316_v60  ;;  %v918_v30 = vadd.f32 %v5007_v59, %v784_v0  ;;  %v1025_v61 = vpop.f32.mrf.mxu1  ;;  %v1320_v44 = vadd.f32 %v1288_v17, %v1186_v56 }
 0x2a6   : > { %v1474_v51 = vadd.f32 %v4392_v16, %v1450_v33  ;;  %v1052_v29 = vadd.f32 %v1022_v47, %v918_v30 }
 0x2a8   : > { %v1494_v53 = vmax.f32 %v1474_v51, 0.0  ;;  %v1187_v51 = vadd.f32 %v1157_v7, %v1052_v29 }
 0x2a9   : > { %v1297_v43 = vpop.f32.mrf.mxu3 }
 0x2aa   : > { %1514 = vst [vmem:[#allocation2 + $0x79] sm:$0xff] %v1494_v53  ;;  %v1160_v11 = vpop.f32.mrf.mxu2  ;;  %v1321_v10 = vadd.f32 %v1291_v45, %v1187_v51 }
 0x2ab   : > { %v1413_v3 = vpop.f32.mrf.mxu0 }
 0x2ac   : > { %v1451_v1 = vadd.f32 %v1413_v3, %v1317_v35  ;;  %v5008_v35 = vld [vmem:[#allocation42_spill] sm:$0xff]  ;;  %v1028_v12 = vpop.f32.mrf.mxu1 }
 0x2ad   : > { %v1053_v24 = vadd.f32 %v1025_v61, %v5008_v35  ;;  %v1054_v28 = vadd.f32 %v1028_v12, %v5009_v37 }
 0x2ae   : > { %v1475_v4 = vadd.f32 %v4392_v16, %v1451_v1 }
 0x2af   : > { %v1188_v19 = vadd.f32 %v1160_v11, %v1053_v24 }
 0x2b0   : > { %v1495_v5 = vmax.f32 %v1475_v4, 0.0 }
 0x2b1   : > { %v1322_v52 = vadd.f32 %v1294_v49, %v1188_v19 }
 0x2b2   : > { %1515 = vst [vmem:[#allocation2 + $0x81] sm:$0xff] %v1495_v5  ;;  %v1163_v21 = vpop.f32.mrf.mxu2 }
 0x2b3   : > { %v1416_v63 = vpop.f32.mrf.mxu0  ;;  %v1189_v27 = vadd.f32 %v1163_v21, %v1054_v28 }
 0x2b4   : > { %v1452_v8 = vadd.f32 %v1416_v63, %v1318_v9  ;;  %v1031_v5 = vpop.f32.mrf.mxu1 }
 0x2b5   : > { %v1323_v32 = vadd.f32 %v1297_v43, %v1189_v27  ;;  %v1055_v63 = vadd.f32 %v1031_v5, %v4370_v25 }
 0x2b6   : > { %v1476_v23 = vadd.f32 %v4392_v16, %v1452_v8  ;;  %v1300_v8 = vpop.f32.mrf.mxu3 }
 0x2b8   : > { %v1496_v38 = vmax.f32 %v1476_v23, 0.0 }
 0x2ba   : > { %1516 = vst [vmem:[#allocation2 + $0x91] sm:$0xff] %v1496_v38  ;;  %v1166_v9 = vpop.f32.mrf.mxu2 }
 0x2bb   : > { %v1419_v26 = vpop.f32.mrf.mxu0  ;;  %v1190_v17 = vadd.f32 %v1166_v9, %v1055_v63 }
 0x2bc   : > { %v1453_v60 = vadd.f32 %v1419_v26, %v1319_v34  ;;  %v1034_v22 = vpop.f32.mrf.mxu1 }
 0x2bd   : > { %v1324_v62 = vadd.f32 %v1300_v8, %v1190_v17  ;;  %v1056_v40 = vadd.f32 %v1034_v22, %v4379_v55 }
 0x2be   : > { %v1477_v14 = vadd.f32 %v4392_v16, %v1453_v60  ;;  %v1303_v25 = vpop.f32.mrf.mxu3 }
 0x2c0   : > { %v1497_v33 = vmax.f32 %v1477_v14, 0.0 }
 0x2c2   : > { %1517 = vst [vmem:[#allocation2 + $0x99] sm:$0xff] %v1497_v33  ;;  %v1169_v42 = vpop.f32.mrf.mxu2 }
 0x2c3   : > { %v1422_v15 = vpop.f32.mrf.mxu0  ;;  %v1191_v38 = vadd.f32 %v1169_v42, %v1056_v40 }
 0x2c4   : > { %v1454_v2 = vadd.f32 %v1422_v15, %v1320_v44 }
 0x2c5   : > { %v1325_v34 = vadd.f32 %v1303_v25, %v1191_v38 }
 0x2c6   : > { %v1478_v50 = vadd.f32 %v4392_v16, %v1454_v2 }
 0x2c8   : > { %v1498_v53 = vmax.f32 %v1478_v50, 0.0 }
 0x2ca   : > { %1518 = vst [vmem:[#allocation2 + $0xa9] sm:$0xff] %v1498_v53 }
 0x2cb   : > { %v1425_v3 = vpop.f32.mrf.mxu0 }
 0x2cc   : > { %v1455_v48 = vadd.f32 %v1425_v3, %v1321_v10 }
 0x2ce   : > { %v1479_v1 = vadd.f32 %v4392_v16, %v1455_v48 }
 0x2d0   : > { %v1499_v6 = vmax.f32 %v1479_v1, 0.0 }
 0x2d2   : > { %1519 = vst [vmem:[#allocation2 + $0xb1] sm:$0xff] %v1499_v6 }
 0x2d3   : > { %v1428_v46 = vpop.f32.mrf.mxu0 }
 0x2d4   : > { %v1456_v4 = vadd.f32 %v1428_v46, %v1322_v52 }
 0x2d6   : > { %v1480_v57 = vadd.f32 %v4392_v16, %v1456_v4 }
 0x2d8   : > { %v1500_v41 = vmax.f32 %v1480_v57, 0.0 }
 0x2da   : > { %1520 = vst [vmem:[#allocation2 + $0xc1] sm:$0xff] %v1500_v41 }
 0x2db   : > { %v1431_v39 = vpop.f32.mrf.mxu0 }
 0x2dc   : > { %v1457_v36 = vadd.f32 %v1431_v39, %v1323_v32 }
 0x2de   : > { %v1481_v13 = vadd.f32 %v4392_v16, %v1457_v36 }
 0x2e0   : > { %v1501_v18 = vmax.f32 %v1481_v13, 0.0 }
 0x2e2   : > { %1521 = vst [vmem:[#allocation2 + $0xc9] sm:$0xff] %v1501_v18 }
 0x2e3   : > { %v1434_v23 = vpop.f32.mrf.mxu0 }
 0x2e4   : > { %v1458_v47 = vadd.f32 %v1434_v23, %v1324_v62 }
 0x2e6   : > { %v1482_v54 = vadd.f32 %v4392_v16, %v1458_v47 }
 0x2e8   : > { %v1502_v31 = vmax.f32 %v1482_v54, 0.0 }
 0x2ea   : > { %1522 = vst [vmem:[#allocation2 + $0xd9] sm:$0xff] %v1502_v31 }
 0x2eb   : > { %v1437_v20 = vpop.f32.mrf.mxu0 }
 0x2ec   : > { %v1459_v7 = vadd.f32 %v1437_v20, %v1325_v34 }
 0x2ee   : > { %v1483_v26 = vadd.f32 %v4392_v16, %v1459_v7  ;;  %1526 = sbr.rel (%p2710_p4) target bundleno = 759 (0x2f7), region = 52 }
 0x2f0   : > { %v1503_v58 = vmax.f32 %v1483_v26, 0.0 }
 0x2f2   : > { %1523 = vst [vmem:[#allocation2 + $0xe1] sm:$0xff] %v1503_v58 }
 0x2f3   : > { %v3244_v55 = vmov 0.0  }
 0x2f4   : > { %1527 = vst [vmem:[#allocation2] sm:$0xff] %v3244_v55 }
 0x2f5   : > { %1528 = vst [vmem:[#allocation2 + $0x8] sm:$0xff] %v3244_v55 }
 0x2f6   : > { %1529 = vst [vmem:[#allocation2 + $0x10] sm:$0x3] %v3244_v55 }
 0x2f7 PF: > { %p2960_p5 = scmp.ne.s32.totalorder %s3222_s21, 1 }
 0x2f9   : > { %1533 = sbr.rel (%p2960_p5) target bundleno = 770 (0x302), region = 56 }
 0x2fe   : > { %v3245_v0 = vmov 0.0  }
 0x2ff   : > { %1535 = vst [vmem:[#allocation2 + $0xd8] sm:$0xff] %v3245_v0 }
 0x300   : > { %1536 = vst [vmem:[#allocation2 + $0xe0] sm:$0xff] %v3245_v0 }
 0x301   : > { %1537 = vst [vmem:[#allocation2 + $0xe8] sm:$0x3] %v3245_v0 }
 0x302 PF: > { %v1602_v60 = vld [vmem:[#allocation3 + $0xf8] sm:$0xff]  ;;  %v1601_v59 = vld [vmem:[#allocation3 + $0xf0] sm:$0xff]  ;;  %v1600_v45 = vld [vmem:[#allocation3 + $0xe8] sm:$0xff]  ;;  %s2968_s10 = sshll.u32 %s3222_s21, 4  ;;  %s2964_s11 = sshll.u32 %s3226_s22, 5 }
 0x303   : > { %v1569_v16 = vld [vmem:[#allocation3 + $0x78] sm:$0xff]  ;;  %1603 = vmatpush.msra.mxu1 %v1602_v60  ;;  %v1568_v30 = vld [vmem:[#allocation3 + $0x70] sm:$0xff]  ;;  %v1567_v33 = vld [vmem:[#allocation3 + $0x68] sm:$0xff]  ;;  %s2598_s13 = sadd.s32 %s2968_s10, %s2964_s11  ;;  %s2601_s30 = sshll.u32 %s3382_s26, 4  ;;  %s2602_s30 = int_to_ptr.vmem [resolvable:$true] %s2601_s30 }
 0x304   : > { %v1765_v56 = vld [vmem:[#allocation3 + $0x178] sm:$0xff]  ;;  %1668 = vmatpush.msra.mxu2 %v1569_v16  ;;  %v1764_v14 = vld [vmem:[#allocation3 + $0x170] sm:$0xff]  ;;  %v1763_v61 = vld [vmem:[#allocation3 + $0x168] sm:$0xff]  ;;  %s2965_s14 = sshll.u32 %s2598_s13, 3  ;;  %s5010_s27 = sand.u32 1, %s3214_s19  }
 0x305   : > { %1766 = vmatpush.msrb.mxu3 %v1765_v56  ;;  %1604 = vmatpush.msra.mxu1 %v1601_v59  ;;  %v1599_v44 = vld [vmem:[#allocation3 + $0xe0] sm:$0xff]  ;;  %v1598_v2 = vld [vmem:[#allocation3 + $0xd8] sm:$0xff]  ;;  %v1597_v50 = vld [vmem:[#allocation3 + $0xd0] sm:$0xff]  ;;  %s2600_s22 = scalar_lea.hbm %s4934_s5, %s2965_s14  ;;  %s2586_s12 = scalar_lea.sflag [#allocation5], %s5010_s27 }
 0x306   : > { %1669 = vmatpush.msra.mxu2 %v1568_v30  ;;  %v1566_v29 = vld [vmem:[#allocation3 + $0x60] sm:$0xff]  ;;  %v1565_v11 = vld [vmem:[#allocation3 + $0x58] sm:$0xff]  ;;  %v1564_v53 = vld [vmem:[#allocation3 + $0x50] sm:$0xff]  ;;  %s2603_s17 = sshll.u32 %s2600_s22, 4  ;;  %s3160_s13 = scalar_lea.hbm %s4934_s5, 512  ;;  %s2604_s17 = int_to_ptr.hbm [resolvable:$true] %s2603_s17 }
 0x307   : > { %1767 = vmatpush.msrb.mxu3 %v1764_v14  ;;  %1605 = vmatpush.msra.mxu1 %v1600_v45  ;;  %v1762_v15 = vld [vmem:[#allocation3 + $0x160] sm:$0xff]  ;;  %v1761_v51 = vld [vmem:[#allocation3 + $0x158] sm:$0xff]  ;;  %v1760_v49 = vld [vmem:[#allocation3 + $0x150] sm:$0xff]  ;;  %s3154_s6 = sshra.s32 %s2604_s17, 4  ;;  %s3155_s6 = int_to_ptr.hbm [resolvable:$true] %s3154_s6 }
 0x308   : > { %1670 = vmatpush.msra.mxu2 %v1567_v33  ;;  %v1596_v10 = vld [vmem:[#allocation3 + $0xc8] sm:$0xff]  ;;  %v1595_v12 = vld [vmem:[#allocation3 + $0xc0] sm:$0xff]  ;;  %v1594_v19 = vld [vmem:[#allocation3 + $0xb8] sm:$0xff]  ;;  %s3156_s9 = scalar_lea.hbm %s3155_s6, 128  ;;  %p3161_p10 = scmp.lt.s32.totalorder %s3155_s6, %s4934_s5 }
 0x309   : > { %1768 = vmatpush.msrb.mxu3 %v1763_v61  ;;  %1606 = vmatpush.msra.mxu1 %v1599_v44  ;;  %v1563_v35 = vld [vmem:[#allocation3 + $0x48] sm:$0xff]  ;;  %v1562_v3 = vld [vmem:[#allocation3 + $0x40] sm:$0xff]  ;;  %v1561_v1 = vld [vmem:[#allocation3 + $0x38] sm:$0xff]  ;;  %p3157_p6 = scmp.ne.s32.totalorder %s3155_s6, %s3156_s9  ;;  %p3162_p11 = scmp.lt.s32.totalorder %s3160_s13, %s3156_s9 }
 0x30a   : > { %1671 = vmatpush.msra.mxu2 %v1566_v29  ;;  %v1759_v24 = vld [vmem:[#allocation3 + $0x148] sm:$0xff]  ;;  %v1758_v48 = vld [vmem:[#allocation3 + $0x140] sm:$0xff]  ;;  %v1757_v21 = vld [vmem:[#allocation3 + $0x138] sm:$0xff] }
 0x30b   : > { %1769 = vmatpush.msrb.mxu3 %v1762_v15  ;;  %1607 = vmatpush.msra.mxu1 %v1598_v2  ;;  %v1593_v6 = vld [vmem:[#allocation3 + $0xb0] sm:$0xff]  ;;  %v1592_v28 = vld [vmem:[#allocation3 + $0xa8] sm:$0xff]  ;;  %v1591_v4 = vld [vmem:[#allocation3 + $0xa0] sm:$0xff]  ;;  %p3158_p7 = pnand %p3157_p6, %p3330_p3  ;;  %p3163_p12 = por %p3162_p11, %p3161_p10 }
 0x30c   : > { %1672 = vmatpush.msra.mxu2 %v1565_v11  ;;  %v1560_v52 = vld [vmem:[#allocation3 + $0x30] sm:$0xff]  ;;  %v1559_v43 = vld [vmem:[#allocation3 + $0x28] sm:$0xff]  ;;  %v1558_v5 = vld [vmem:[#allocation3 + $0x20] sm:$0xff] }
 0x30d   : > { %1770 = vmatpush.msrb.mxu3 %v1761_v51  ;;  %1608 = vmatpush.msra.mxu1 %v1597_v50  ;;  %v1756_v37 = vld [vmem:[#allocation3 + $0x130] sm:$0xff]  ;;  %v1755_v46 = vld [vmem:[#allocation3 + $0x128] sm:$0xff]  ;;  %v1754_v27 = vld [vmem:[#allocation3 + $0x120] sm:$0xff]  ;;  %p3159_p9 = pneg %p3158_p7 }
 0x30e   : > { %1673 = vmatpush.msra.mxu2 %v1564_v53  ;;  %v1590_v57 = vld [vmem:[#allocation3 + $0x98] sm:$0xff]  ;;  %v1589_v32 = vld [vmem:[#allocation3 + $0x90] sm:$0xff]  ;;  %v1588_v36 = vld [vmem:[#allocation3 + $0x88] sm:$0xff] }
 0x30f   : > { %1771 = vmatpush.msrb.mxu3 %v1760_v49  ;;  %1609 = vmatpush.msra.mxu1 %v1596_v10  ;;  %v1557_v41 = vld [vmem:[#allocation3 + $0x18] sm:$0xff]  ;;  %v1556_v63 = vld [vmem:[#allocation3 + $0x10] sm:$0xff]  ;;  %v1555_v8 = vld [vmem:[#allocation3 + $0x8] sm:$0xff]  ;;  %p3164_p13 = pnand %p3163_p12, %p3159_p9 }
 0x310   : > { %1674 = vmatpush.msra.mxu2 %v1563_v35  ;;  %v1753_v9 = vld [vmem:[#allocation3 + $0x118] sm:$0xff]  ;;  %v1752_v39 = vld [vmem:[#allocation3 + $0x110] sm:$0xff]  ;;  %v1751_v17 = vld [vmem:[#allocation3 + $0x108] sm:$0xff] }
 0x311   : > { %1772 = vmatpush.msrb.mxu3 %v1759_v24  ;;  %1610 = vmatpush.msra.mxu1 %v1595_v12  ;;  %v1587_v13 = vld [vmem:[#allocation3 + $0x80] sm:$0xff]  ;;  %v1570_v62 = vld [vmem:[#allocation2 + $0x1] sm:$0xff]  ;;  %v1992_v25 = vld [vmem:[#allocation3 + $0x268] sm:$0xff] }
 0x312   : > { %1675 = vmatpush.msra.mxu2 %v1562_v3  ;;  %v1554_v22 = vld [vmem:[#allocation3] sm:$0xff]  ;;  %v1538_v40 = vld [vmem:[#allocation2] sm:$0xff]  ;;  %v1994_v23 = vld [vmem:[#allocation3 + $0x278] sm:$0xff] }
 0x313   : > { %1773 = vmatpush.msrb.mxu3 %v1758_v48  ;;  %1611 = vmatpush.msra.mxu1 %v1594_v19  ;;  %v1750_v18 = vld [vmem:[#allocation3 + $0x100] sm:$0xff]  ;;  %v1733_v42 = vld [vmem:[#allocation2 + $0x2] sm:$0xff]  ;;  %v1878_v31 = vld [vmem:[#allocation3 + $0x1e8] sm:$0xff] }
 0x314   : > { %1676 = vmatpush.msra.mxu2 %v1561_v1  ;;  %v1880_v47 = vld [vmem:[#allocation3 + $0x1f8] sm:$0xff]  ;;  %v1993_v38 = vld [vmem:[#allocation3 + $0x270] sm:$0xff]  ;;  %v1991_v20 = vld [vmem:[#allocation3 + $0x260] sm:$0xff] }
 0x315   : > { %1774 = vmatpush.msrb.mxu3 %v1757_v21  ;;  %1612 = vmatpush.msra.mxu1 %v1593_v6  ;;  %v1879_v54 = vld [vmem:[#allocation3 + $0x1f0] sm:$0xff]  ;;  %v1571_v34 = vld [vmem:[#allocation2 + $0x9] sm:$0xff]  ;;  %v4488_v59 = vld [vmem:[#allocation2 + $0x18] sm:$0xff] }
 0x316   : > { %1677 = vmatpush.msra.mxu2 %v1560_v52  ;;  %v1539_v7 = vld [vmem:[#allocation2 + $0x8] sm:$0xff]  ;;  %v1877_v58 = vld [vmem:[#allocation3 + $0x1e0] sm:$0xff]  ;;  %v1989_v60 = vld [vmem:[#allocation3 + $0x250] sm:$0xff] }
 0x317   : > { %1775 = vmatpush.msrb.mxu3 %v1756_v37  ;;  %1613 = vmatpush.msra.mxu1 %v1592_v28  ;;  %v1734_v26 = vld [vmem:[#allocation2 + $0xa] sm:$0xff]  ;;  %v1875_v16 = vld [vmem:[#allocation3 + $0x1d0] sm:$0xff]  ;;  %v1988_v14 = vld [vmem:[#allocation3 + $0x248] sm:$0xff] }
 0x318   : > { %1678 = vmatpush.msra.mxu2 %v1559_v43  ;;  %v1990_v55 = vld [vmem:[#allocation3 + $0x258] sm:$0xff]  ;;  %v4486_v56 = vld [vmem:[#allocation2 + $0x19] sm:$0xff]  ;;  %v1987_v29 = vld [vmem:[#allocation3 + $0x240] sm:$0xff] }
 0x319   : > { %1776 = vmatpush.msrb.mxu3 %v1755_v46  ;;  %1614 = vmatpush.msra.mxu1 %v1591_v4  ;;  %v1876_v0 = vld [vmem:[#allocation3 + $0x1d8] sm:$0xff]  ;;  %v4490_v30 = vld [vmem:[#allocation2 + $0x1a] sm:$0xff]  ;;  %v1873_v15 = vld [vmem:[#allocation3 + $0x1c0] sm:$0xff] }
 0x31a   : > { %1679 = vmatpush.msra.mxu2 %v1558_v5  ;;  %v1874_v45 = vld [vmem:[#allocation3 + $0x1c8] sm:$0xff]  ;;  %v4495_v33 = vld [vmem:[#allocation2 + $0x21] sm:$0xff]  ;;  %v4506_v11 = vld [vmem:[#allocation2 + $0x30] sm:$0xff] }
 0x31b   : > { %1777 = vmatpush.msrb.mxu3 %v1754_v27  ;;  %1615 = vmatpush.msra.mxu1 %v1590_v57  ;;  %v4497_v61 = vld [vmem:[#allocation2 + $0x20] sm:$0xff]  ;;  %v4504_v2 = vld [vmem:[#allocation2 + $0x31] sm:$0xff]  ;;  %v1986_v50 = vld [vmem:[#allocation3 + $0x238] sm:$0xff] }
 0x31c   : > { %1680 = vmatpush.msra.mxu2 %v1557_v41  ;;  %v4499_v44 = vld [vmem:[#allocation2 + $0x22] sm:$0xff]  ;;  %v4508_v51 = vld [vmem:[#allocation2 + $0x32] sm:$0xff]  ;;  %v4517_v35 = vld [vmem:[#allocation2 + $0x3a] sm:$0xff] }
 0x31d   : > { %1778 = vmatpush.msrb.mxu3 %v1753_v9  ;;  %1616 = vmatpush.msra.mxu1 %v1589_v32  ;;  %v1872_v53 = vld [vmem:[#allocation3 + $0x1b8] sm:$0xff]  ;;  %v4513_v49 = vld [vmem:[#allocation2 + $0x39] sm:$0xff]  ;;  %v4531_v6 = vld [vmem:[#allocation2 + $0x51] sm:$0xff] }
 0x31e   : > { %1681 = vmatpush.msra.mxu2 %v1556_v63  ;;  %v4515_v10 = vld [vmem:[#allocation2 + $0x38] sm:$0xff]  ;;  %v1985_v24 = vld [vmem:[#allocation3 + $0x230] sm:$0xff]  ;;  %v4522_v3 = vld [vmem:[#allocation2 + $0x49] sm:$0xff] }
 0x31f   : > { %1779 = vmatpush.msrb.mxu3 %v1752_v39  ;;  %1617 = vmatpush.msra.mxu1 %v1588_v36  ;;  %v1871_v12 = vld [vmem:[#allocation3 + $0x1b0] sm:$0xff]  ;;  %v4524_v48 = vld [vmem:[#allocation2 + $0x48] sm:$0xff]  ;;  %v1984_v1 = vld [vmem:[#allocation3 + $0x228] sm:$0xff] }
 0x320   : > { %1682 = vmatpush.msra.mxu2 %v1555_v8  ;;  %v4526_v19 = vld [vmem:[#allocation2 + $0x4a] sm:$0xff]  ;;  %v1870_v21 = vld [vmem:[#allocation3 + $0x1a8] sm:$0xff]  ;;  %v4540_v46 = vld [vmem:[#allocation2 + $0x61] sm:$0xff] }
 0x321   : > { %1780 = vmatpush.msrb.mxu3 %v1751_v17  ;;  %1618 = vmatpush.msra.mxu1 %v1587_v13  ;;  %v4533_v52 = vld [vmem:[#allocation2 + $0x50] sm:$0xff]  ;;  %v4542_v4 = vld [vmem:[#allocation2 + $0x60] sm:$0xff]  ;;  %v1982_v27 = vld [vmem:[#allocation3 + $0x218] sm:$0xff] }
 0x322   : > { %1683 = vmatpush.msra.mxu2 %v1554_v22  ;;  %1619 = vmatmul.f32.vlgmr.msra.gmra.mxu1 %v1570_v62  ;;  %v4535_v37 = vld [vmem:[#allocation2 + $0x52] sm:$0xff]  ;;  %v4544_v5 = vld [vmem:[#allocation2 + $0x62] sm:$0xff]  ;;  %v4553_v8 = vld [vmem:[#allocation2 + $0x6a] sm:$0xff] }
 0x323   : > { %1781 = vmatpush.msrb.mxu3 %v1750_v18  ;;  %1684 = vmatmul.f32.vlgmr.msra.gmra.mxu2 %v1538_v40  ;;  %v1983_v28 = vld [vmem:[#allocation3 + $0x220] sm:$0xff]  ;;  %v2108_v57 = vld [vmem:[#allocation3 + $0x2f8] sm:$0xff]  ;;  %v2107_v41 = vld [vmem:[#allocation3 + $0x2f0] sm:$0xff] }
 0x324   : > { %1782 = vmatmul.f32.vlgmr.msrb.gmra.mxu3 %v1733_v42  ;;  %1995 = vmatpush.msrb.mxu2 %v1994_v23  ;;  %v1869_v43 = vld [vmem:[#allocation3 + $0x1a0] sm:$0xff]  ;;  %v1868_v9 = vld [vmem:[#allocation3 + $0x198] sm:$0xff]  ;;  %v2106_v32 = vld [vmem:[#allocation3 + $0x2e8] sm:$0xff] }
 0x325   : > { %1881 = vmatpush.msrb.mxu1 %v1880_v47  ;;  %2109 = vmatpush.msra.mxu3 %v2108_v57  ;;  %v4549_v63 = vld [vmem:[#allocation2 + $0x69] sm:$0xff]  ;;  %v1981_v17 = vld [vmem:[#allocation3 + $0x210] sm:$0xff]  ;;  %v2102_v40 = vld [vmem:[#allocation3 + $0x2c8] sm:$0xff] }
 0x326   : > { %1996 = vmatpush.msrb.mxu2 %v1993_v38  ;;  %v2105_v39 = vld [vmem:[#allocation3 + $0x2e0] sm:$0xff]  ;;  %v4551_v36 = vld [vmem:[#allocation2 + $0x68] sm:$0xff]  ;;  %v2103_v22 = vld [vmem:[#allocation3 + $0x2d0] sm:$0xff] }
 0x327   : > { %1882 = vmatpush.msrb.mxu1 %v1879_v54  ;;  %2110 = vmatpush.msra.mxu3 %v2107_v41  ;;  %v2104_v13 = vld [vmem:[#allocation3 + $0x2d8] sm:$0xff]  ;;  %v1867_v62 = vld [vmem:[#allocation3 + $0x190] sm:$0xff]  ;;  %v4563_v23 = vld [vmem:[#allocation3 + $0x368] sm:$0xff] }
 0x328   : > { %1997 = vmatpush.msrb.mxu2 %v1992_v25  ;;  %v4558_v18 = vld [vmem:[#allocation3 + $0x378] sm:$0xff]  ;;  %v4561_v42 = vld [vmem:[#allocation3 + $0x370] sm:$0xff]  ;;  %v2101_v38 = vld [vmem:[#allocation3 + $0x2c0] sm:$0xff] }
 0x329   : > { %1883 = vmatpush.msrb.mxu1 %v1878_v31  ;;  %2111 = vmatpush.msra.mxu3 %v2106_v32  ;;  %v4565_v47 = vld [vmem:[#allocation2 + $0x79] sm:$0xff]  ;;  %v2093_v41 = vld [vmem:[#allocation3 + $0x280] sm:$0xff]  ;;  %v2451_v32 = vld [vmem:[#allocation3 + $0x478] sm:$0xff] }
 0x32a   : > { %1622 = vmatmul.f32.gmra.mxu1 %v1571_v34  ;;  %1998 = vmatpush.msrb.mxu2 %v1991_v20  ;;  %v4568_v54 = vld [vmem:[#allocation2 + $0x78] sm:$0xff]  ;;  %v2100_v34 = vld [vmem:[#allocation3 + $0x2b8] sm:$0xff]  ;;  %v4576_v20 = vld [vmem:[#allocation3 + $0x360] sm:$0xff] }
 0x32b   : > { %1687 = vmatmul.f32.gmra.mxu2 %v1539_v7  ;;  %1884 = vmatpush.msrb.mxu1 %v1877_v58  ;;  %v4570_v25 = vld [vmem:[#allocation2 + $0x7a] sm:$0xff]  ;;  %v4608_v57 = vld [vmem:[#allocation2 + $0x92] sm:$0xff] }
 0x32c   : > { %1785 = vmatmul.f32.gmra.mxu3 %v1734_v26  ;;  %1999 = vmatpush.msrb.mxu2 %v1990_v55  ;;  %v1980_v31 = vld [vmem:[#allocation3 + $0x208] sm:$0xff]  ;;  %v2099_v7 = vld [vmem:[#allocation3 + $0x2b0] sm:$0xff]  ;;  %v4578_v26 = vld [vmem:[#allocation3 + $0x358] sm:$0xff] }
 0x32d   : > { %1885 = vmatpush.msrb.mxu1 %v1876_v0  ;;  %2112 = vmatpush.msra.mxu3 %v2105_v39  ;;  %v1866_v58 = vld [vmem:[#allocation3 + $0x188] sm:$0xff]  ;;  %v4581_v0 = vld [vmem:[#allocation3 + $0x350] sm:$0xff]  ;;  %v2212_v39 = vld [vmem:[#allocation3 + $0x320] sm:$0xff] }
 0x32e   : > { %2000 = vmatpush.msrb.mxu2 %v1989_v60  ;;  %2224 = vmatpush.msra.mxu0 %v4558_v18  ;;  %v2098_v55 = vld [vmem:[#allocation3 + $0x2a8] sm:$0xff]  ;;  %v4583_v60 = vld [vmem:[#allocation2 + $0x81] sm:$0xff] }
 0x32f   : > { %1886 = vmatpush.msrb.mxu1 %v1875_v16  ;;  %2113 = vmatpush.msra.mxu3 %v2104_v13  ;;  %v2097_v16 = vld [vmem:[#allocation3 + $0x2a0] sm:$0xff]  ;;  %v4616_v13 = vld [vmem:[#allocation2 + $0x99] sm:$0xff] }
 0x330   : > { %2001 = vmatpush.msrb.mxu2 %v1988_v14  ;;  %2225 = vmatpush.msra.mxu0 %v4561_v42  ;;  %v4586_v14 = vld [vmem:[#allocation2 + $0x80] sm:$0xff] }
 0x331   : > { %1887 = vmatpush.msrb.mxu1 %v1874_v45  ;;  %2114 = vmatpush.msra.mxu3 %v2103_v22  ;;  %v4588_v45 = vld [vmem:[#allocation2 + $0x82] sm:$0xff] }
 0x332   : > { %1625 = vmatmul.f32.gmra.mxu1 %v4486_v56  ;;  %2002 = vmatpush.msrb.mxu2 %v1987_v29  ;;  %v4591_v29 = vld [vmem:[#allocation3 + $0x348] sm:$0xff]  ;;  %v4618_v22 = vld [vmem:[#allocation3 + $0x310] sm:$0xff] }
 0x333   : > { %1690 = vmatmul.f32.gmra.mxu2 %v4488_v59  ;;  %1888 = vmatpush.msrb.mxu1 %v1873_v15  ;;  %v1979_v15 = vld [vmem:[#allocation3 + $0x200] sm:$0xff] }
 0x334   : > { %1788 = vmatmul.f32.gmra.mxu3 %v4490_v30  ;;  %2003 = vmatpush.msrb.mxu2 %v1986_v50  ;;  %v2096_v50 = vld [vmem:[#allocation3 + $0x298] sm:$0xff] }
 0x335   : > { %1889 = vmatpush.msrb.mxu1 %v1872_v53  ;;  %2115 = vmatpush.msra.mxu3 %v2102_v40  ;;  %v4596_v53 = vld [vmem:[#allocation3 + $0x340] sm:$0xff]  ;;  %v4623_v40 = vld [vmem:[#allocation2 + $0x9a] sm:$0xff] }
 0x336   : > { %2004 = vmatpush.msrb.mxu2 %v1985_v24  ;;  %2226 = vmatpush.msra.mxu0 %v4563_v23  ;;  %v2095_v24 = vld [vmem:[#allocation3 + $0x290] sm:$0xff] }
 0x337   : > { %1890 = vmatpush.msrb.mxu1 %v1871_v12  ;;  %2116 = vmatpush.msra.mxu3 %v2101_v38  ;;  %v1865_v12 = vld [vmem:[#allocation3 + $0x180] sm:$0xff]  ;;  %v2337_v38 = vld [vmem:[#allocation3 + $0x3f8] sm:$0xff] }
 0x338   : > { %2005 = vmatpush.msrb.mxu2 %v1984_v1  ;;  %2227 = vmatpush.msra.mxu0 %v4576_v20  ;;  %v4599_v1 = vld [vmem:[#allocation3 + $0x338] sm:$0xff] }
 0x339   : > { %1891 = vmatpush.msrb.mxu1 %v1870_v21  ;;  %2117 = vmatpush.msra.mxu3 %v2100_v34  ;;  %v4602_v21 = vld [vmem:[#allocation2 + $0x91] sm:$0xff] }
 0x33a   : > { %1628 = vmatmul.f32.gmra.mxu1 %v4495_v33  ;;  %2006 = vmatpush.msrb.mxu2 %v1983_v28  ;;  %v2094_v28 = vld [vmem:[#allocation3 + $0x288] sm:$0xff]  ;;  %v2208_v34 = vld [vmem:[#allocation3 + $0x300] sm:$0xff] }
 0x33b   : > { %1693 = vmatmul.f32.gmra.mxu2 %v4497_v61  ;;  %1892 = vmatpush.msrb.mxu1 %v1869_v43  ;;  %v4604_v43 = vld [vmem:[#allocation3 + $0x330] sm:$0xff] }
 0x33c   : > { %1791 = vmatmul.f32.gmra.mxu3 %v4499_v44  ;;  %2007 = vmatpush.msrb.mxu2 %v1982_v27  ;;  %v4606_v27 = vld [vmem:[#allocation2 + $0x90] sm:$0xff] }
 0x33d   : > { %1893 = vmatpush.msrb.mxu1 %v1868_v9  ;;  %2118 = vmatpush.msra.mxu3 %v2099_v7  ;;  %v2213_v9 = vld [vmem:[#allocation3 + $0x328] sm:$0xff]  ;;  %v4637_v7 = vld [vmem:[#allocation2 + $0xaa] sm:$0xff] }
 0x33e   : > { %2008 = vmatpush.msrb.mxu2 %v1981_v17  ;;  %2228 = vmatpush.msra.mxu0 %v4578_v26  ;;  %v2211_v17 = vld [vmem:[#allocation3 + $0x318] sm:$0xff] }
 0x33f   : > { %1894 = vmatpush.msrb.mxu1 %v1867_v62  ;;  %2119 = vmatpush.msra.mxu3 %v2098_v55  ;;  %v4621_v62 = vld [vmem:[#allocation2 + $0x98] sm:$0xff] }
 0x340   : > { %2009 = vmatpush.msrb.mxu2 %v1980_v31  ;;  %2229 = vmatpush.msra.mxu0 %v4581_v0  ;;  %v2209_v31 = vld [vmem:[#allocation3 + $0x308] sm:$0xff] }
 0x341   : > { %1895 = vmatpush.msrb.mxu1 %v1866_v58  ;;  %2120 = vmatpush.msra.mxu3 %v2097_v16  ;;  %v2336_v58 = vld [vmem:[#allocation3 + $0x3f0] sm:$0xff]  ;;  %v4644_v55 = vld [vmem:[#allocation2 + $0xb1] sm:$0xff] }
 0x342   : > { %1631 = vmatmul.f32.gmra.mxu1 %v4504_v2  ;;  %2230 = vmatpush.msra.mxu0 %v4591_v29  ;;  %v2335_v16 = vld [vmem:[#allocation3 + $0x3e8] sm:$0xff] }
 0x343   : > { %1696 = vmatmul.f32.gmra.mxu2 %v4506_v11  ;;  %2121 = vmatpush.msra.mxu3 %v2096_v50  ;;  %v2334_v50 = vld [vmem:[#allocation3 + $0x3e0] sm:$0xff] }
 0x344   : > { %1794 = vmatmul.f32.gmra.mxu3 %v4508_v51  ;;  %2010 = vmatpush.msrb.mxu2 %v1979_v15 }
 0x345   : > { %1896 = vmatpush.msrb.mxu1 %v1865_v12  ;;  %2231 = vmatpush.msra.mxu0 %v4596_v53 }
 0x346   : > { %2122 = vmatpush.msra.mxu3 %v2095_v24  ;;  %2452 = vmatpush.msra.mxu2 %v2451_v32 }
 0x347   : > { %2232 = vmatpush.msra.mxu0 %v4599_v1  ;;  %2338 = vmatpush.msra.mxu1 %v2337_v38 }
 0x348   : > { %2123 = vmatpush.msra.mxu3 %v2094_v28 }
 0x349   : > { %2233 = vmatpush.msra.mxu0 %v4604_v43  ;;  %2339 = vmatpush.msra.mxu1 %v2336_v58 }
 0x34a   : > { %1634 = vmatmul.f32.gmra.mxu1 %v4513_v49  ;;  %2124 = vmatpush.msra.mxu3 %v2093_v41  ;;  %v2333_v41 = vld [vmem:[#allocation3 + $0x3d8] sm:$0xff] }
 0x34b   : > { %1699 = vmatmul.f32.gmra.mxu2 %v4515_v10  ;;  %2234 = vmatpush.msra.mxu0 %v2213_v9 }
 0x34c   : > { %1797 = vmatmul.f32.gmra.mxu3 %v4517_v35  ;;  %2340 = vmatpush.msra.mxu1 %v2335_v16 }
 0x34d   : > { %3001 = vmatpush.msrb.mxu3 %v4558_v18  ;;  %2235 = vmatpush.msra.mxu0 %v2212_v39  ;;  %v2450_v18 = vld [vmem:[#allocation3 + $0x470] sm:$0xff] }
 0x34e   : > { %2453 = vmatpush.msra.mxu2 %v2450_v18  ;;  %2341 = vmatpush.msra.mxu1 %v2334_v50  ;;  %v2331_v18 = vld [vmem:[#allocation3 + $0x3c8] sm:$0xff] }
 0x34f   : > { %3002 = vmatpush.msrb.mxu3 %v4561_v42  ;;  %2236 = vmatpush.msra.mxu0 %v2211_v17  ;;  %v4631_v42 = vld [vmem:[#allocation2 + $0xa9] sm:$0xff] }
 0x350   : > { %2342 = vmatpush.msra.mxu1 %v2333_v41 }
 0x351   : > { %3003 = vmatpush.msrb.mxu3 %v4563_v23  ;;  %2237 = vmatpush.msra.mxu0 %v4618_v22  ;;  %v4635_v23 = vld [vmem:[#allocation2 + $0xa8] sm:$0xff] }
 0x352   : > { %1637 = vmatmul.f32.gmra.mxu1 %v4522_v3 }
 0x353   : > { %1702 = vmatmul.f32.gmra.mxu2 %v4524_v48  ;;  %2238 = vmatpush.msra.mxu0 %v2209_v31 }
 0x354   : > { %1800 = vmatmul.f32.gmra.mxu3 %v4526_v19 }
 0x355   : > { %3004 = vmatpush.msrb.mxu3 %v4576_v20  ;;  %2239 = vmatpush.msra.mxu0 %v2208_v34  ;;  %v2449_v20 = vld [vmem:[#allocation3 + $0x468] sm:$0xff] }
 0x356   : > { %2240 = vmatmul.f32.vlgmr.msra.gmra.mxu0 %v4506_v11  ;;  %2454 = vmatpush.msra.mxu2 %v2449_v20 }
 0x357   : > { %3005 = vmatpush.msrb.mxu3 %v4578_v26  ;;  %v4648_v26 = vld [vmem:[#allocation2 + $0xb0] sm:$0xff] }
 0x359   : > { %3006 = vmatpush.msrb.mxu3 %v4581_v0  ;;  %v4650_v0 = vld [vmem:[#allocation2 + $0xb2] sm:$0xff] }
 0x35a   : > { %1640 = vmatmul.f32.gmra.mxu1 %v4531_v6 }
 0x35b   : > { %1705 = vmatmul.f32.gmra.mxu2 %v4533_v52  ;;  %3007 = vmatpush.msrb.mxu3 %v4591_v29  ;;  %v2448_v29 = vld [vmem:[#allocation3 + $0x460] sm:$0xff] }
 0x35c   : > { %1803 = vmatmul.f32.gmra.mxu3 %v4535_v37  ;;  %2455 = vmatpush.msra.mxu2 %v2448_v29 }
 0x35d   : > { %3008 = vmatpush.msrb.mxu3 %v4596_v53  ;;  %v2447_v53 = vld [vmem:[#allocation3 + $0x458] sm:$0xff] }
 0x35e   : > { %2243 = vmatmul.f32.gmra.mxu0 %v4515_v10  ;;  %2456 = vmatpush.msra.mxu2 %v2447_v53 }
 0x35f   : > { %3009 = vmatpush.msrb.mxu3 %v4599_v1 }
 0x361   : > { %3010 = vmatpush.msrb.mxu3 %v4604_v43 }
 0x362   : > { %1643 = vmatmul.f32.gmra.mxu1 %v4540_v46 }
 0x363   : > { %1708 = vmatmul.f32.gmra.mxu2 %v4542_v4  ;;  %3011 = vmatpush.msrb.mxu3 %v2213_v9 }
 0x364   : > { %1806 = vmatmul.f32.gmra.mxu3 %v4544_v5 }
 0x365   : > { %3012 = vmatpush.msrb.mxu3 %v2212_v39 }
 0x366   : > { %2246 = vmatmul.f32.gmra.mxu0 %v4524_v48 }
 0x367   : > { %3013 = vmatpush.msrb.mxu3 %v2211_v17  ;;  %v2332_v17 = vld [vmem:[#allocation3 + $0x3d0] sm:$0xff] }
 0x368   : > { %2343 = vmatpush.msra.mxu1 %v2332_v17 }
 0x369   : > { %3014 = vmatpush.msrb.mxu3 %v4618_v22 }
 0x36a   : > { %1646 = vmatmul.f32.gmra.mxu1 %v4549_v63 }
 0x36b   : > { %1711 = vmatmul.f32.gmra.mxu2 %v4551_v36  ;;  %3015 = vmatpush.msrb.mxu3 %v2209_v31 }
 0x36c   : > { %1809 = vmatmul.f32.gmra.mxu3 %v4553_v8  ;;  %2344 = vmatpush.msra.mxu1 %v2331_v18 }
 0x36d   : > { %3016 = vmatpush.msrb.mxu3 %v2208_v34 }
 0x36e   : > { %2249 = vmatmul.f32.gmra.mxu0 %v4533_v52 }
 0x372   : > { %1649 = vmatmul.f32.gmra.mxu1 %v4565_v47 }
 0x373   : > { %1714 = vmatmul.f32.gmra.mxu2 %v4568_v54 }
 0x374   : > { %1812 = vmatmul.f32.gmra.mxu3 %v4570_v25 }
 0x376   : > { %2252 = vmatmul.f32.gmra.mxu0 %v4542_v4 }
 0x37a   : > { %1652 = vmatmul.f32.gmra.mxu1 %v4583_v60 }
 0x37b   : > { %1717 = vmatmul.f32.gmra.mxu2 %v4586_v14 }
 0x37c   : > { %1815 = vmatmul.f32.gmra.mxu3 %v4588_v45 }
 0x37e   : > { %2255 = vmatmul.f32.gmra.mxu0 %v4551_v36 }
 0x382   : > { %1655 = vmatmul.f32.gmra.mxu1 %v4602_v21 }
 0x383   : > { %1720 = vmatmul.f32.gmra.mxu2 %v4606_v27 }
 0x384   : > { %1818 = vmatmul.f32.gmra.mxu3 %v4608_v57 }
 0x386   : > { %2258 = vmatmul.f32.gmra.mxu0 %v4568_v54 }
 0x38a   : > { %1658 = vmatmul.f32.gmra.mxu1 %v4616_v13 }
 0x38b   : > { %1723 = vmatmul.f32.gmra.mxu2 %v4621_v62 }
 0x38c   : > { %1821 = vmatmul.f32.gmra.mxu3 %v4623_v40 }
 0x38e   : > { %2261 = vmatmul.f32.gmra.mxu0 %v4586_v14 }
 0x392   : > { %1661 = vmatmul.f32.gmra.mxu1 %v4631_v42 }
 0x393   : > { %1726 = vmatmul.f32.gmra.mxu2 %v4635_v23 }
 0x394   : > { %1824 = vmatmul.f32.gmra.mxu3 %v4637_v7 }
 0x396   : > { %2264 = vmatmul.f32.gmra.mxu0 %v4606_v27 }
 0x39a   : > { %1664 = vmatmul.f32.gmra.mxu1 %v4644_v55 }
 0x39b   : > { %1729 = vmatmul.f32.gmra.mxu2 %v4648_v26 }
 0x39c   : > { %1827 = vmatmul.f32.gmra.mxu3 %v4650_v0 }
 0x39e   : > { %2267 = vmatmul.f32.gmra.mxu0 %v4621_v62 }
 0x39f   : > { %v1620_v15 = vpop.f32.mrf.mxu1 }
 0x3a2   : > { %1897 = vmatmul.f32.vlgmr.msrb.gmra.mxu1 %v4488_v59 }
 0x3a3   : > { %2011 = vmatmul.f32.vlgmr.msrb.gmra.mxu2 %v4486_v56  ;;  %v2446_v56 = vld [vmem:[#allocation3 + $0x450] sm:$0xff] }
 0x3a4   : > { %2125 = vmatmul.f32.vlgmr.msra.gmra.mxu3 %v4490_v30  ;;  %2457 = vmatpush.msra.mxu2 %v2446_v56 }
 0x3a6   : > { %v1685_v24 = vpop.f32.mrf.mxu2  ;;  %2270 = vmatmul.f32.gmra.mxu0 %v4635_v23 }
 0x3a7   : > { %v1783_v12 = vpop.f32.mrf.mxu3  ;;  %v1686_v1 = vadd.f32 %v1685_v24, %v1620_v15  ;;  %v1623_v28 = vpop.f32.mrf.mxu1  ;;  %v2330_v15 = vld [vmem:[#allocation3 + $0x3c0] sm:$0xff] }
 0x3a8   : > { %2345 = vmatpush.msra.mxu1 %v2330_v15 }
 0x3a9   : > { %v4663_v43 = vadd.f32 %v1783_v12, %v1686_v1 }
 0x3aa   : > { %1900 = vmatmul.f32.gmra.mxu1 %v4497_v61 }
 0x3ab   : > { %2014 = vmatmul.f32.gmra.mxu2 %v4495_v33  ;;  %v2445_v33 = vld [vmem:[#allocation3 + $0x448] sm:$0xff] }
 0x3ac   : > { %2128 = vmatmul.f32.gmra.mxu3 %v4499_v44  ;;  %2458 = vmatpush.msra.mxu2 %v2445_v33 }
 0x3ae   : > { %v1688_v59 = vpop.f32.mrf.mxu2  ;;  %2273 = vmatmul.f32.gmra.mxu0 %v4648_v26 }
 0x3af   : > { %v1786_v30 = vpop.f32.mrf.mxu3  ;;  %v1689_v9 = vadd.f32 %v1688_v59, %v1623_v28  ;;  %v1626_v32 = vpop.f32.mrf.mxu1  ;;  %v2329_v28 = vld [vmem:[#allocation3 + $0x3b8] sm:$0xff] }
 0x3b0   : > { %2346 = vmatpush.msra.mxu1 %v2329_v28  ;;  %v2203_v28 = vld [vmem:[#allocation2 + $0xc0] sm:$0xff] }
 0x3b1   : > { %v4669_v39 = vadd.f32 %v1786_v30, %v1689_v9 }
 0x3b2   : > { %1903 = vmatmul.f32.gmra.mxu1 %v4506_v11  ;;  %v2444_v11 = vld [vmem:[#allocation3 + $0x440] sm:$0xff] }
 0x3b3   : > { %2017 = vmatmul.f32.gmra.mxu2 %v4504_v2 }
 0x3b4   : > { %2131 = vmatmul.f32.gmra.mxu3 %v4508_v51  ;;  %2459 = vmatpush.msra.mxu2 %v2444_v11 }
 0x3b6   : > { %v1691_v61 = vpop.f32.mrf.mxu2  ;;  %2276 = vmatmul.f32.gmra.mxu0 %v2203_v28 }
 0x3b7   : > { %v1789_v44 = vpop.f32.mrf.mxu3  ;;  %v1692_v22 = vadd.f32 %v1691_v61, %v1626_v32  ;;  %v1629_v38 = vpop.f32.mrf.mxu1  ;;  %v2328_v32 = vld [vmem:[#allocation3 + $0x3b0] sm:$0xff] }
 0x3b8   : > { %2347 = vmatpush.msra.mxu1 %v2328_v32  ;;  %v2324_v32 = vld [vmem:[#allocation3 + $0x390] sm:$0xff] }
 0x3b9   : > { %v4675_v31 = vadd.f32 %v1789_v44, %v1692_v22 }
 0x3ba   : > { %1906 = vmatmul.f32.gmra.mxu1 %v4515_v10  ;;  %v2443_v10 = vld [vmem:[#allocation3 + $0x438] sm:$0xff] }
 0x3bb   : > { %2020 = vmatmul.f32.gmra.mxu2 %v4513_v49 }
 0x3bc   : > { %2134 = vmatmul.f32.gmra.mxu3 %v4517_v35  ;;  %2460 = vmatpush.msra.mxu2 %v2443_v10 }
 0x3be   : > { %v1694_v34 = vpop.f32.mrf.mxu2 }
 0x3bf   : > { %v1792_v58 = vpop.f32.mrf.mxu3  ;;  %v1695_v20 = vadd.f32 %v1694_v34, %v1629_v38  ;;  %v1632_v16 = vpop.f32.mrf.mxu1  ;;  %v2327_v38 = vld [vmem:[#allocation3 + $0x3a8] sm:$0xff] }
 0x3c0   : > { %2348 = vmatpush.msra.mxu1 %v2327_v38 }
 0x3c1   : > { %v4681_v29 = vadd.f32 %v1792_v58, %v1695_v20 }
 0x3c2   : > { %1909 = vmatmul.f32.gmra.mxu1 %v4524_v48  ;;  %v2442_v48 = vld [vmem:[#allocation3 + $0x430] sm:$0xff] }
 0x3c3   : > { %2023 = vmatmul.f32.gmra.mxu2 %v4522_v3 }
 0x3c4   : > { %2137 = vmatmul.f32.gmra.mxu3 %v4526_v19  ;;  %2461 = vmatpush.msra.mxu2 %v2442_v48 }
 0x3c6   : > { %v1697_v50 = vpop.f32.mrf.mxu2 }
 0x3c7   : > { %v1795_v53 = vpop.f32.mrf.mxu3  ;;  %v1698_v24 = vadd.f32 %v1697_v50, %v1632_v16  ;;  %v1635_v12 = vpop.f32.mrf.mxu1  ;;  %v2326_v16 = vld [vmem:[#allocation3 + $0x3a0] sm:$0xff] }
 0x3c8   : > { %2349 = vmatpush.msra.mxu1 %v2326_v16 }
 0x3c9   : > { %v4687_v1 = vadd.f32 %v1795_v53, %v1698_v24 }
 0x3ca   : > { %1912 = vmatmul.f32.gmra.mxu1 %v4533_v52  ;;  %v2441_v52 = vld [vmem:[#allocation3 + $0x428] sm:$0xff] }
 0x3cb   : > { %2026 = vmatmul.f32.gmra.mxu2 %v4531_v6 }
 0x3cc   : > { %2140 = vmatmul.f32.gmra.mxu3 %v4535_v37  ;;  %2462 = vmatpush.msra.mxu2 %v2441_v52  ;;  %v2204_v52 = vld [vmem:[#allocation2 + $0xc8] sm:$0xff] }
 0x3cd   : > { %2279 = vmatmul.f32.gmra.mxu0 %v2204_v52 }
 0x3ce   : > { %v1700_v41 = vpop.f32.mrf.mxu2 }
 0x3cf   : > { %v1798_v56 = vpop.f32.mrf.mxu3  ;;  %v1701_v59 = vadd.f32 %v1700_v41, %v1635_v12  ;;  %v1638_v30 = vpop.f32.mrf.mxu1  ;;  %v2325_v12 = vld [vmem:[#allocation3 + $0x398] sm:$0xff] }
 0x3d0   : > { %2350 = vmatpush.msra.mxu1 %v2325_v12 }
 0x3d1   : > { %v4693_v9 = vadd.f32 %v1798_v56, %v1701_v59 }
 0x3d2   : > { %1915 = vmatmul.f32.gmra.mxu1 %v4542_v4  ;;  %v2440_v4 = vld [vmem:[#allocation3 + $0x420] sm:$0xff] }
 0x3d3   : > { %2029 = vmatmul.f32.gmra.mxu2 %v4540_v46  ;;  %2351 = vmatpush.msra.mxu1 %v2324_v32 }
 0x3d4   : > { %2143 = vmatmul.f32.gmra.mxu3 %v4544_v5  ;;  %2463 = vmatpush.msra.mxu2 %v2440_v4  ;;  %v2323_v4 = vld [vmem:[#allocation3 + $0x388] sm:$0xff] }
 0x3d5   : > { %2352 = vmatpush.msra.mxu1 %v2323_v4 }
 0x3d6   : > { %v1703_v17 = vpop.f32.mrf.mxu2 }
 0x3d7   : > { %v1801_v33 = vpop.f32.mrf.mxu3  ;;  %v1704_v61 = vadd.f32 %v1703_v17, %v1638_v30  ;;  %v1641_v44 = vpop.f32.mrf.mxu1 }
 0x3d9   : > { %v4699_v22 = vadd.f32 %v1801_v33, %v1704_v61 }
 0x3da   : > { %1918 = vmatmul.f32.gmra.mxu1 %v4551_v36  ;;  %v2439_v36 = vld [vmem:[#allocation3 + $0x418] sm:$0xff] }
 0x3db   : > { %2032 = vmatmul.f32.gmra.mxu2 %v4549_v63 }
 0x3dc   : > { %2146 = vmatmul.f32.gmra.mxu3 %v4553_v8  ;;  %2464 = vmatpush.msra.mxu2 %v2439_v36  ;;  %v2322_v36 = vld [vmem:[#allocation3 + $0x380] sm:$0xff] }
 0x3dd   : > { %2353 = vmatpush.msra.mxu1 %v2322_v36 }
 0x3de   : > { %v1706_v18 = vpop.f32.mrf.mxu2 }
 0x3df   : > { %v1804_v11 = vpop.f32.mrf.mxu3  ;;  %v1707_v34 = vadd.f32 %v1706_v18, %v1641_v44  ;;  %v1644_v58 = vpop.f32.mrf.mxu1 }
 0x3e1   : > { %v4705_v20 = vadd.f32 %v1804_v11, %v1707_v34 }
 0x3e2   : > { %1921 = vmatmul.f32.gmra.mxu1 %v4568_v54  ;;  %v2438_v54 = vld [vmem:[#allocation3 + $0x410] sm:$0xff] }
 0x3e3   : > { %2035 = vmatmul.f32.gmra.mxu2 %v4565_v47 }
 0x3e4   : > { %2149 = vmatmul.f32.gmra.mxu3 %v4570_v25  ;;  %2465 = vmatpush.msra.mxu2 %v2438_v54 }
 0x3e6   : > { %v1709_v15 = vpop.f32.mrf.mxu2 }
 0x3e7   : > { %v1807_v10 = vpop.f32.mrf.mxu3  ;;  %v1710_v50 = vadd.f32 %v1709_v15, %v1644_v58  ;;  %v1647_v53 = vpop.f32.mrf.mxu1 }
 0x3e9   : > { %v4711_v24 = vadd.f32 %v1807_v10, %v1710_v50 }
 0x3ea   : > { %1924 = vmatmul.f32.gmra.mxu1 %v4586_v14  ;;  %v2437_v14 = vld [vmem:[#allocation3 + $0x408] sm:$0xff] }
 0x3eb   : > { %2038 = vmatmul.f32.gmra.mxu2 %v4583_v60 }
 0x3ec   : > { %2152 = vmatmul.f32.gmra.mxu3 %v4588_v45  ;;  %2466 = vmatpush.msra.mxu2 %v2437_v14 }
 0x3ee   : > { %v1712_v48 = vpop.f32.mrf.mxu2 }
 0x3ef   : > { %v1810_v41 = vpop.f32.mrf.mxu3  ;;  %v1713_v56 = vadd.f32 %v1712_v48, %v1647_v53  ;;  %v1650_v59 = vpop.f32.mrf.mxu1 }
 0x3f1   : > { %v4716_v30 = vadd.f32 %v1810_v41, %v1713_v56  ;;  %v4736_v41 = vld [vmem:[#allocation2 + $0xc1] sm:$0xff] }
 0x3f2   : > { %1927 = vmatmul.f32.gmra.mxu1 %v4606_v27  ;;  %v2436_v27 = vld [vmem:[#allocation3 + $0x400] sm:$0xff]  ;;  %v4738_v56 = vld [vmem:[#allocation2 + $0xc2] sm:$0xff] }
 0x3f3   : > { %2041 = vmatmul.f32.gmra.mxu2 %v4602_v21 }
 0x3f4   : > { %2155 = vmatmul.f32.gmra.mxu3 %v4608_v57  ;;  %2467 = vmatpush.msra.mxu2 %v2436_v27 }
 0x3f6   : > { %v1715_v17 = vpop.f32.mrf.mxu2 }
 0x3f7   : > { %v1813_v33 = vpop.f32.mrf.mxu3  ;;  %v1716_v61 = vadd.f32 %v1715_v17, %v1650_v59  ;;  %v1653_v44 = vpop.f32.mrf.mxu1 }
 0x3f9   : > { %v4721_v38 = vadd.f32 %v1813_v33, %v1716_v61  ;;  %v4744_v33 = vld [vmem:[#allocation2 + $0xc9] sm:$0xff] }
 0x3fa   : > { %1930 = vmatmul.f32.gmra.mxu1 %v4621_v62  ;;  %v4746_v61 = vld [vmem:[#allocation2 + $0xca] sm:$0xff] }
 0x3fb   : > { %2044 = vmatmul.f32.gmra.mxu2 %v4616_v13 }
 0x3fc   : > { %2158 = vmatmul.f32.gmra.mxu3 %v4623_v40 }
 0x3fe   : > { %v1718_v18 = vpop.f32.mrf.mxu2 }
 0x3ff   : > { %v1816_v11 = vpop.f32.mrf.mxu3  ;;  %v1719_v34 = vadd.f32 %v1718_v18, %v1653_v44  ;;  %v1656_v58 = vpop.f32.mrf.mxu1 }
 0x401   : > { %v4726_v16 = vadd.f32 %v1816_v11, %v1719_v34  ;;  %v2205_v11 = vld [vmem:[#allocation2 + $0xd8] sm:$0xff] }
 0x402   : > { %1933 = vmatmul.f32.gmra.mxu1 %v4635_v23 }
 0x403   : > { %2047 = vmatmul.f32.gmra.mxu2 %v4631_v42 }
 0x404   : > { %2161 = vmatmul.f32.gmra.mxu3 %v4637_v7 }
 0x406   : > { %v1721_v62 = vpop.f32.mrf.mxu2 }
 0x407   : > { %v1819_v15 = vpop.f32.mrf.mxu3  ;;  %v1722_v10 = vadd.f32 %v1721_v62, %v1656_v58  ;;  %v1659_v50 = vpop.f32.mrf.mxu1 }
 0x409   : > { %v4731_v53 = vadd.f32 %v1819_v15, %v1722_v10  ;;  %v2206_v15 = vld [vmem:[#allocation2 + $0xe0] sm:$0xff] }
 0x40a   : > { %1936 = vmatmul.f32.gmra.mxu1 %v4648_v26 }
 0x40b   : > { %2050 = vmatmul.f32.gmra.mxu2 %v4644_v55 }
 0x40c   : > { %2164 = vmatmul.f32.gmra.mxu3 %v4650_v0 }
 0x40e   : > { %v1724_v12 = vpop.f32.mrf.mxu2 }
 0x40f   : > { %v1822_v54 = vpop.f32.mrf.mxu3  ;;  %v1725_v23 = vadd.f32 %v1724_v12, %v1659_v50  ;;  %v1662_v48 = vpop.f32.mrf.mxu1 }
 0x411   : > { %v4740_v59 = vadd.f32 %v1822_v54, %v1725_v23 }
 0x412   : > { %1939 = vmatmul.f32.gmra.mxu1 %v2203_v28 }
 0x413   : > { %2053 = vmatmul.f32.gmra.mxu2 %v4736_v41 }
 0x414   : > { %2167 = vmatmul.f32.gmra.mxu3 %v4738_v56 }
 0x416   : > { %v1727_v26 = vpop.f32.mrf.mxu2 }
 0x417   : > { %v1825_v32 = vpop.f32.mrf.mxu3  ;;  %v1728_v14 = vadd.f32 %v1727_v26, %v1662_v48  ;;  %v1665_v17 = vpop.f32.mrf.mxu1 }
 0x419   : > { %v4748_v44 = vadd.f32 %v1825_v32, %v1728_v14 }
 0x41a   : > { %1942 = vmatmul.f32.gmra.mxu1 %v2204_v52 }
 0x41b   : > { %2056 = vmatmul.f32.gmra.mxu2 %v4744_v33 }
 0x41c   : > { %2170 = vmatmul.f32.gmra.mxu3 %v4746_v61 }
 0x41e   : > { %v1730_v28 = vpop.f32.mrf.mxu2 }
 0x41f   : > { %v1731_v4 = vadd.f32 %v1730_v28, %v1665_v17  ;;  %v1898_v27 = vpop.f32.mrf.mxu1  ;;  %v1828_v18 = vpop.f32.mrf.mxu3 }
 0x420   : > { %v1946_v58 = vadd.f32 %v1898_v27, %v4663_v43 }
 0x421   : > { %v4752_v34 = vadd.f32 %v1828_v18, %v1731_v4 }
 0x422   : > { %2354 = vmatmul.f32.vlgmr.msra.gmra.mxu1 %v4504_v2 }
 0x423   : > { %2468 = vmatmul.f32.vlgmr.msra.gmra.mxu2 %v4508_v51 }
 0x424   : > { %2282 = vmatmul.f32.vlgmr.msrb.gmra.mxu3 %v2205_v11 }
 0x426   : > { %v2012_v36 = vpop.f32.mrf.mxu2 }
 0x427   : > { %v4757_v52 = vadd.f32 %v2012_v36, %v1946_v58  ;;  %v1901_v62 = vpop.f32.mrf.mxu1 }
 0x428   : > { %v1947_v10 = vadd.f32 %v1901_v62, %v4669_v39 }
 0x42a   : > { %2357 = vmatmul.f32.gmra.mxu1 %v4513_v49 }
 0x42b   : > { %2471 = vmatmul.f32.gmra.mxu2 %v4517_v35 }
 0x42c   : > { %2285 = vmatmul.f32.gmra.mxu3 %v2206_v15 }
 0x42e   : > { %v2015_v50 = vpop.f32.mrf.mxu2 }
 0x42f   : > { %v4762_v12 = vadd.f32 %v2015_v50, %v1947_v10  ;;  %v1904_v2 = vpop.f32.mrf.mxu1  ;;  %v2319_v50 = vld [vmem:[#allocation2 + $0xd9] sm:$0xff] }
 0x430   : > { %v1948_v51 = vadd.f32 %v1904_v2, %v4675_v31  ;;  %v2433_v2 = vld [vmem:[#allocation2 + $0xda] sm:$0xff] }
 0x432   : > { %2360 = vmatmul.f32.gmra.mxu1 %v4522_v3 }
 0x433   : > { %2474 = vmatmul.f32.gmra.mxu2 %v4526_v19 }
 0x436   : > { %v2018_v43 = vpop.f32.mrf.mxu2 }
 0x437   : > { %v4767_v54 = vadd.f32 %v2018_v43, %v1948_v51  ;;  %v1907_v23 = vpop.f32.mrf.mxu1 }
 0x438   : > { %v1949_v49 = vadd.f32 %v1907_v23, %v4681_v29 }
 0x43a   : > { %2363 = vmatmul.f32.gmra.mxu1 %v4531_v6 }
 0x43b   : > { %2477 = vmatmul.f32.gmra.mxu2 %v4535_v37 }
 0x43e   : > { %v2021_v35 = vpop.f32.mrf.mxu2 }
 0x43f   : > { %v4772_v39 = vadd.f32 %v2021_v35, %v1949_v49  ;;  %v1910_v48 = vpop.f32.mrf.mxu1  ;;  %v2434_v49 = vld [vmem:[#allocation2 + $0xe2] sm:$0xff] }
 0x440   : > { %v1950_v3 = vadd.f32 %v1910_v48, %v4687_v1 }
 0x442   : > { %2366 = vmatmul.f32.gmra.mxu1 %v4540_v46 }
 0x443   : > { %2480 = vmatmul.f32.gmra.mxu2 %v4544_v5 }
 0x446   : > { %v2024_v19 = vpop.f32.mrf.mxu2 }
 0x447   : > { %v4777_v31 = vadd.f32 %v2024_v19, %v1950_v3  ;;  %v1913_v26 = vpop.f32.mrf.mxu1 }
 0x448   : > { %v1951_v6 = vadd.f32 %v1913_v26, %v4693_v9 }
 0x44a   : > { %2369 = vmatmul.f32.gmra.mxu1 %v4549_v63 }
 0x44b   : > { %2483 = vmatmul.f32.gmra.mxu2 %v4553_v8 }
 0x44e   : > { %v2027_v37 = vpop.f32.mrf.mxu2 }
 0x44f   : > { %v4782_v29 = vadd.f32 %v2027_v37, %v1951_v6  ;;  %v1916_v32 = vpop.f32.mrf.mxu1 }
 0x450   : > { %v1952_v46 = vadd.f32 %v1916_v32, %v4699_v22 }
 0x452   : > { %2372 = vmatmul.f32.gmra.mxu1 %v4565_v47 }
 0x453   : > { %2486 = vmatmul.f32.gmra.mxu2 %v4570_v25 }
 0x456   : > { %v2030_v5 = vpop.f32.mrf.mxu2 }
 0x457   : > { %v4787_v1 = vadd.f32 %v2030_v5, %v1952_v46  ;;  %v1919_v14 = vpop.f32.mrf.mxu1  ;;  %v4834_v46 = vld [vmem:[%s4933_s4] ss:$0 sm:$0xff] }
 0x458   : > { %v1953_v63 = vadd.f32 %v1919_v14, %v4705_v20 }
 0x45a   : > { %2375 = vmatmul.f32.gmra.mxu1 %v4583_v60 }
 0x45b   : > { %2489 = vmatmul.f32.gmra.mxu2 %v4588_v45  ;;  %v2126_v45 = vpop.f32.mrf.mxu3 }
 0x45c   : > { %v2174_v3 = vadd.f32 %v2126_v45, %v4757_v52 }
 0x45e   : > { %v2033_v8 = vpop.f32.mrf.mxu2 }
 0x45f   : > { %v4792_v9 = vadd.f32 %v2033_v8, %v1953_v63  ;;  %v1922_v17 = vpop.f32.mrf.mxu1 }
 0x460   : > { %v1954_v47 = vadd.f32 %v1922_v17, %v4711_v24 }
 0x462   : > { %2378 = vmatmul.f32.gmra.mxu1 %v4602_v21 }
 0x463   : > { %2492 = vmatmul.f32.gmra.mxu2 %v4608_v57 }
 0x466   : > { %v2036_v25 = vpop.f32.mrf.mxu2 }
 0x467   : > { %v4797_v22 = vadd.f32 %v2036_v25, %v1954_v47  ;;  %v1925_v28 = vpop.f32.mrf.mxu1 }
 0x468   : > { %v1955_v60 = vadd.f32 %v1925_v28, %v4716_v30  ;;  %v2129_v30 = vpop.f32.mrf.mxu3 }
 0x469   : > { %v2175_v5 = vadd.f32 %v2129_v30, %v4762_v12 }
 0x46a   : > { %2381 = vmatmul.f32.gmra.mxu1 %v4616_v13 }
 0x46b   : > { %2495 = vmatmul.f32.gmra.mxu2 %v4623_v40 }
 0x46e   : > { %v2039_v20 = vpop.f32.mrf.mxu2 }
 0x46f   : > { %v4802_v4 = vadd.f32 %v2039_v20, %v1955_v60  ;;  %v1928_v27 = vpop.f32.mrf.mxu1 }
 0x470   : > { %v1956_v24 = vadd.f32 %v1928_v27, %v4721_v38 }
 0x472   : > { %2384 = vmatmul.f32.gmra.mxu1 %v4631_v42  ;;  %v2132_v42 = vpop.f32.mrf.mxu3 }
 0x473   : > { %2498 = vmatmul.f32.gmra.mxu2 %v4637_v7  ;;  %v2241_v7 = vpop.f32.mrf.mxu0  ;;  %v2176_v45 = vadd.f32 %v2132_v42, %v4767_v54 }
 0x474   : > { %v2289_v6 = vadd.f32 %v2241_v7, %v2174_v3 }
 0x476   : > { %v2042_v21 = vpop.f32.mrf.mxu2 }
 0x477   : > { %v4807_v57 = vadd.f32 %v2042_v21, %v1956_v24  ;;  %v1931_v18 = vpop.f32.mrf.mxu1 }
 0x478   : > { %v1957_v13 = vadd.f32 %v1931_v18, %v4726_v16 }
 0x47a   : > { %2387 = vmatmul.f32.gmra.mxu1 %v4644_v55 }
 0x47b   : > { %2501 = vmatmul.f32.gmra.mxu2 %v4650_v0  ;;  %v2135_v0 = vpop.f32.mrf.mxu3 }
 0x47e   : > { %v2045_v40 = vpop.f32.mrf.mxu2 }
 0x47f   : > { %v4812_v11 = vadd.f32 %v2045_v40, %v1957_v13  ;;  %v1934_v58 = vpop.f32.mrf.mxu1  ;;  %v2177_v40 = vadd.f32 %v2135_v0, %v4772_v39 }
 0x480   : > { %v1958_v38 = vadd.f32 %v1934_v58, %v4731_v53 }
 0x482   : > { %2390 = vmatmul.f32.gmra.mxu1 %v4736_v41  ;;  %v2244_v41 = vpop.f32.mrf.mxu0 }
 0x483   : > { %2504 = vmatmul.f32.gmra.mxu2 %v4738_v56  ;;  %v2138_v51 = vpop.f32.mrf.mxu3  ;;  %v2290_v17 = vadd.f32 %v2244_v41, %v2175_v5 }
 0x486   : > { %v2048_v36 = vpop.f32.mrf.mxu2 }
 0x487   : > { %v4817_v62 = vadd.f32 %v2048_v36, %v1958_v38  ;;  %v1937_v16 = vpop.f32.mrf.mxu1 }
 0x488   : > { %v1959_v55 = vadd.f32 %v1937_v16, %v4740_v59 }
 0x48a   : > { %2393 = vmatmul.f32.gmra.mxu1 %v4744_v33  ;;  %v2320_v33 = vld [vmem:[#allocation2 + $0xe1] sm:$0xff]  ;;  %v2247_v35 = vpop.f32.mrf.mxu0 }
 0x48b   : > { %2507 = vmatmul.f32.gmra.mxu2 %v4746_v61  ;;  %v2141_v26 = vpop.f32.mrf.mxu3  ;;  %v2291_v12 = vadd.f32 %v2247_v35, %v2176_v45 }
 0x48e   : > { %v2051_v15 = vpop.f32.mrf.mxu2 }
 0x48f   : > { %v4822_v10 = vadd.f32 %v2051_v15, %v1959_v55  ;;  %v1940_v53 = vpop.f32.mrf.mxu1 }
 0x490   : > { %v1960_v56 = vadd.f32 %v1940_v53, %v4748_v44  ;;  %v2178_v53 = vadd.f32 %v2138_v51, %v4777_v31 }
 0x492   : > { %2396 = vmatmul.f32.gmra.mxu1 %v2319_v50  ;;  %v2250_v37 = vpop.f32.mrf.mxu0 }
 0x493   : > { %2510 = vmatmul.f32.gmra.mxu2 %v2433_v2  ;;  %v2144_v8 = vpop.f32.mrf.mxu3  ;;  %v2292_v54 = vadd.f32 %v2250_v37, %v2177_v40 }
 0x494   : > { %v2180_v37 = vadd.f32 %v2144_v8, %v4787_v1 }
 0x496   : > { %v2054_v43 = vpop.f32.mrf.mxu2 }
 0x497   : > { %v4825_v23 = vadd.f32 %v2054_v43, %v1960_v56  ;;  %v1943_v59 = vpop.f32.mrf.mxu1 }
 0x498   : > { %v1961_v61 = vadd.f32 %v1943_v59, %v4752_v34 }
 0x49a   : > { %2399 = vmatmul.f32.gmra.mxu1 %v2320_v33  ;;  %v2253_v28 = vpop.f32.mrf.mxu0  ;;  %v2179_v33 = vadd.f32 %v2141_v26, %v4782_v29 }
 0x49b   : > { %2513 = vmatmul.f32.gmra.mxu2 %v2434_v49  ;;  %v2147_v18 = vpop.f32.mrf.mxu3  ;;  %v2293_v0 = vadd.f32 %v2253_v28, %v2178_v53 }
 0x49e   : > { %v2057_v48 = vpop.f32.mrf.mxu2 }
 0x49f   : > { %v4829_v44 = vadd.f32 %v2057_v48, %v1961_v61  ;;  %v2355_v19 = vpop.f32.mrf.mxu1 }
 0x4a0   : > { %v2403_v32 = vadd.f32 %v2355_v19, %v2289_v6 }
 0x4a2   : > { %v2256_v7 = vpop.f32.mrf.mxu0 }
 0x4a3   : > { %v2150_v55 = vpop.f32.mrf.mxu3  ;;  %v2294_v31 = vadd.f32 %v2256_v7, %v2179_v33 }
 0x4a6   : > { %v2469_v34 = vpop.f32.mrf.mxu2 }
 0x4a7   : > { %v2517_v14 = vadd.f32 %v2469_v34, %v2403_v32  ;;  %v2358_v63 = vpop.f32.mrf.mxu1 }
 0x4a8   : > { %v2404_v25 = vadd.f32 %v2358_v63, %v2290_v17 }
 0x4a9   : > { %v2537_v52 = vadd.f32 %v4834_v46, %v2517_v14 }
 0x4aa   : > { %v2259_v39 = vpop.f32.mrf.mxu0 }
 0x4ab   : > { %v2553_v47 = vmax.f32 %v2537_v52, 0.0  ;;  %v2153_v35 = vpop.f32.mrf.mxu3  ;;  %v2295_v26 = vadd.f32 %v2259_v39, %v2180_v37 }
 0x4ac   : > { %v2183_v7 = vadd.f32 %v2153_v35, %v4802_v4 }
 0x4ad   : > { %2569 = vst [vmem:[%s3382_s26] sm:$0xff] %v2553_v47  ;;  %v2181_v47 = vadd.f32 %v2147_v18, %v4792_v9 }
 0x4ae   : > { %v2472_v60 = vpop.f32.mrf.mxu2 }
 0x4af   : > { %v2518_v20 = vadd.f32 %v2472_v60, %v2404_v25  ;;  %v2361_v27 = vpop.f32.mrf.mxu1 }
 0x4b0   : > { %v2405_v30 = vadd.f32 %v2361_v27, %v2291_v12 }
 0x4b1   : > { %v2538_v24 = vadd.f32 %v4834_v46, %v2518_v20 }
 0x4b2   : > { %v2262_v3 = vpop.f32.mrf.mxu0 }
 0x4b3   : > { %v2554_v21 = vmax.f32 %v2538_v24, 0.0  ;;  %v2156_v29 = vpop.f32.mrf.mxu3  ;;  %v2296_v1 = vadd.f32 %v2262_v3, %v2181_v47  ;;  %v2182_v24 = vadd.f32 %v2150_v55, %v4797_v22 }
 0x4b5   : > { %2570 = vst [vmem:[%s3382_s26 + $0x8] sm:$0xff] %v2554_v21 }
 0x4b6   : > { %v2475_v13 = vpop.f32.mrf.mxu2 }
 0x4b7   : > { %v2519_v58 = vadd.f32 %v2475_v13, %v2405_v30  ;;  %v2364_v38 = vpop.f32.mrf.mxu1 }
 0x4b8   : > { %v2406_v16 = vadd.f32 %v2364_v38, %v2292_v54 }
 0x4b9   : > { %v2539_v36 = vadd.f32 %v4834_v46, %v2519_v58 }
 0x4ba   : > { %v2265_v52 = vpop.f32.mrf.mxu0 }
 0x4bb   : > { %v2555_v42 = vmax.f32 %v2539_v36, 0.0  ;;  %v2159_v45 = vpop.f32.mrf.mxu3  ;;  %v2297_v9 = vadd.f32 %v2265_v52, %v2182_v24 }
 0x4bd   : > { %2571 = vst [vmem:[%s3382_s26 + $0x10] sm:$0xff] %v2555_v42 }
 0x4be   : > { %v2478_v15 = vpop.f32.mrf.mxu2 }
 0x4bf   : > { %v2520_v50 = vadd.f32 %v2478_v15, %v2406_v16  ;;  %v2367_v41 = vpop.f32.mrf.mxu1 }
 0x4c0   : > { %v2407_v43 = vadd.f32 %v2367_v41, %v2293_v0 }
 0x4c1   : > { %v2540_v56 = vadd.f32 %v4834_v46, %v2520_v50  ;;  %v2184_v50 = vadd.f32 %v2156_v29, %v4807_v57 }
 0x4c2   : > { %v2268_v30 = vpop.f32.mrf.mxu0 }
 0x4c3   : > { %v2556_v2 = vmax.f32 %v2540_v56, 0.0  ;;  %v2162_v58 = vpop.f32.mrf.mxu3  ;;  %v2298_v16 = vadd.f32 %v2268_v30, %v2183_v7 }
 0x4c4   : > { %v2186_v37 = vadd.f32 %v2162_v58, %v4817_v62 }
 0x4c5   : > { %2572 = vst [vmem:[%s3382_s26 + $0x18] sm:$0xff] %v2556_v2 }
 0x4c6   : > { %v2481_v59 = vpop.f32.mrf.mxu2 }
 0x4c7   : > { %v2521_v61 = vadd.f32 %v2481_v59, %v2407_v43  ;;  %v2370_v49 = vpop.f32.mrf.mxu1 }
 0x4c8   : > { %v2408_v19 = vadd.f32 %v2370_v49, %v2294_v31 }
 0x4c9   : > { %v2541_v48 = vadd.f32 %v4834_v46, %v2521_v61  ;;  %v2185_v61 = vadd.f32 %v2159_v45, %v4812_v11 }
 0x4ca   : > { %v2271_v22 = vpop.f32.mrf.mxu0 }
 0x4cb   : > { %v2557_v51 = vmax.f32 %v2541_v48, 0.0  ;;  %v2165_v39 = vpop.f32.mrf.mxu3  ;;  %v2299_v4 = vadd.f32 %v2271_v22, %v2184_v50 }
 0x4cc   : > { %v2187_v52 = vadd.f32 %v2165_v39, %v4822_v10 }
 0x4cd   : > { %2573 = vst [vmem:[%s3382_s26 + $0x20] sm:$0xff] %v2557_v51 }
 0x4ce   : > { %v2484_v6 = vpop.f32.mrf.mxu2 }
 0x4cf   : > { %v2522_v32 = vadd.f32 %v2484_v6, %v2408_v19  ;;  %v2373_v34 = vpop.f32.mrf.mxu1 }
 0x4d0   : > { %v2409_v63 = vadd.f32 %v2373_v34, %v2295_v26 }
 0x4d1   : > { %v2542_v5 = vadd.f32 %v4834_v46, %v2522_v32 }
 0x4d2   : > { %v2274_v43 = vpop.f32.mrf.mxu0 }
 0x4d3   : > { %v2558_v14 = vmax.f32 %v2542_v5, 0.0  ;;  %v2168_v57 = vpop.f32.mrf.mxu3  ;;  %v2300_v31 = vadd.f32 %v2274_v43, %v2185_v61 }
 0x4d4   : > { %v2188_v24 = vadd.f32 %v2168_v57, %v4825_v23 }
 0x4d5   : > { %2574 = vst [vmem:[%s3382_s26 + $0x28] sm:$0xff] %v2558_v14 }
 0x4d6   : > { %v2487_v17 = vpop.f32.mrf.mxu2 }
 0x4d7   : > { %v2523_v25 = vadd.f32 %v2487_v17, %v2409_v63  ;;  %v2376_v28 = vpop.f32.mrf.mxu1 }
 0x4d8   : > { %v2410_v20 = vadd.f32 %v2376_v28, %v2296_v1 }
 0x4d9   : > { %v2543_v60 = vadd.f32 %v4834_v46, %v2523_v25 }
 0x4da   : > { %v2277_v19 = vpop.f32.mrf.mxu0 }
 0x4db   : > { %v2559_v8 = vmax.f32 %v2543_v60, 0.0  ;;  %v2301_v11 = vadd.f32 %v2277_v19, %v2186_v37  ;;  %v2171_v26 = vpop.f32.mrf.mxu3 }
 0x4dd   : > { %2575 = vst [vmem:[%s3382_s26 + $0x30] sm:$0xff] %v2559_v8 }
 0x4de   : > { %v2490_v27 = vpop.f32.mrf.mxu2 }
 0x4df   : > { %v2524_v12 = vadd.f32 %v2490_v27, %v2410_v20  ;;  %v2379_v21 = vpop.f32.mrf.mxu1 }
 0x4e0   : > { %v2411_v40 = vadd.f32 %v2379_v21, %v2297_v9 }
 0x4e1   : > { %v2544_v13 = vadd.f32 %v4834_v46, %v2524_v12 }
 0x4e2   : > { %v2280_v25 = vpop.f32.mrf.mxu0 }
 0x4e3   : > { %v2560_v18 = vmax.f32 %v2544_v13, 0.0  ;;  %v2302_v28 = vadd.f32 %v2280_v25, %v2187_v52  ;;  %v2283_v8 = vpop.f32.mrf.mxu3 }
 0x4e4   : > { %v2303_v12 = vadd.f32 %v2283_v8, %v2188_v24 }
 0x4e5   : > { %2576 = vst [vmem:[%s3382_s26 + $0x38] sm:$0xff] %v2560_v18 }
 0x4e6   : > { %v2493_v38 = vpop.f32.mrf.mxu2 }
 0x4e7   : > { %v2525_v36 = vadd.f32 %v2493_v38, %v2411_v40  ;;  %v2382_v54 = vpop.f32.mrf.mxu1  ;;  %v2189_v40 = vadd.f32 %v2171_v26, %v4829_v44 }
 0x4e8   : > { %v2412_v15 = vadd.f32 %v2382_v54, %v2298_v16 }
 0x4e9   : > { %v2545_v42 = vadd.f32 %v4834_v46, %v2525_v36 }
 0x4eb   : > { %v2561_v55 = vmax.f32 %v2545_v42, 0.0  ;;  %v2286_v18 = vpop.f32.mrf.mxu3 }
 0x4ec   : > { %v2304_v38 = vadd.f32 %v2286_v18, %v2189_v40 }
 0x4ed   : > { %2577 = vst [vmem:[%s3382_s26 + $0x40] sm:$0xff] %v2561_v55 }
 0x4ee   : > { %v2496_v53 = vpop.f32.mrf.mxu2 }
 0x4ef   : > { %v2526_v41 = vadd.f32 %v2496_v53, %v2412_v15  ;;  %v2385_v56 = vpop.f32.mrf.mxu1 }
 0x4f0   : > { %v2413_v59 = vadd.f32 %v2385_v56, %v2299_v4 }
 0x4f1   : > { %v2546_v0 = vadd.f32 %v4834_v46, %v2526_v41 }
 0x4f3   : > { %v2562_v2 = vmax.f32 %v2546_v0, 0.0 }
 0x4f5   : > { %2578 = vst [vmem:[%s3382_s26 + $0x48] sm:$0xff] %v2562_v2 }
 0x4f6   : > { %v2499_v33 = vpop.f32.mrf.mxu2 }
 0x4f7   : > { %v2527_v49 = vadd.f32 %v2499_v33, %v2413_v59  ;;  %v2388_v35 = vpop.f32.mrf.mxu1 }
 0x4f8   : > { %v2414_v3 = vadd.f32 %v2388_v35, %v2300_v31 }
 0x4f9   : > { %v2547_v48 = vadd.f32 %v4834_v46, %v2527_v49 }
 0x4fb   : > { %v2563_v51 = vmax.f32 %v2547_v48, 0.0 }
 0x4fd   : > { %2579 = vst [vmem:[%s3382_s26 + $0x50] sm:$0xff] %v2563_v51 }
 0x4fe   : > { %v2502_v6 = vpop.f32.mrf.mxu2 }
 0x4ff   : > { %v2528_v32 = vadd.f32 %v2502_v6, %v2414_v3  ;;  %v2391_v34 = vpop.f32.mrf.mxu1 }
 0x500   : > { %v2415_v14 = vadd.f32 %v2391_v34, %v2301_v11 }
 0x501   : > { %v2548_v5 = vadd.f32 %v4834_v46, %v2528_v32 }
 0x503   : > { %v2564_v29 = vmax.f32 %v2548_v5, 0.0 }
 0x505   : > { %2580 = vst [vmem:[%s3382_s26 + $0x58] sm:$0xff] %v2564_v29 }
 0x506   : > { %v2505_v63 = vpop.f32.mrf.mxu2 }
 0x507   : > { %v2529_v17 = vadd.f32 %v2505_v63, %v2415_v14  ;;  %v2394_v47 = vpop.f32.mrf.mxu1 }
 0x508   : > { %v2416_v1 = vadd.f32 %v2394_v47, %v2302_v28 }
 0x509   : > { %v2549_v62 = vadd.f32 %v4834_v46, %v2529_v17 }
 0x50b   : > { %v2565_v60 = vmax.f32 %v2549_v62, 0.0 }
 0x50d   : > { %2581 = vst [vmem:[%s3382_s26 + $0x60] sm:$0xff] %v2565_v60 }
 0x50e   : > { %v2508_v45 = vpop.f32.mrf.mxu2 }
 0x50f   : > { %v2530_v20 = vadd.f32 %v2508_v45, %v2416_v1  ;;  %v2397_v27 = vpop.f32.mrf.mxu1 }
 0x510   : > { %v2417_v30 = vadd.f32 %v2397_v27, %v2303_v12 }
 0x511   : > { %v2550_v10 = vadd.f32 %v4834_v46, %v2530_v20 }
 0x513   : > { %v2566_v21 = vmax.f32 %v2550_v10, 0.0 }
 0x515   : > { %2582 = vst [vmem:[%s3382_s26 + $0x68] sm:$0xff] %v2566_v21 }
 0x516   : > { %v2511_v13 = vpop.f32.mrf.mxu2 }
 0x517   : > { %v2531_v9 = vadd.f32 %v2511_v13, %v2417_v30  ;;  %v2400_v23 = vpop.f32.mrf.mxu1 }
 0x518   : > { %v2418_v36 = vadd.f32 %v2400_v23, %v2304_v38 }
 0x519   : > { %v2551_v58 = vadd.f32 %v4834_v46, %v2531_v9 }
 0x51b   : > { %v2567_v7 = vmax.f32 %v2551_v58, 0.0 }
 0x51d   : > { %2583 = vst [vmem:[%s3382_s26 + $0x70] sm:$0xff] %v2567_v7 }
 0x51e   : > { %v2514_v54 = vpop.f32.mrf.mxu2 }
 0x51f   : > { %v2532_v42 = vadd.f32 %v2514_v54, %v2418_v36 }
 0x521   : > { %v2552_v44 = vadd.f32 %v4834_v46, %v2532_v42 }
 0x523   : > { %v2568_v22 = vmax.f32 %v2552_v44, 0.0 }
 0x525   : > { %2584 = vst [vmem:[%s3382_s26 + $0x78] sm:$0xff] %v2568_v22 }
 0x526   : > { %3167 = shalt.err (!%p3164_p13)
}
 0x527   : > { %s3246_s26 = smov 128   ;;  %s3247_s21 = smov 8  }
 0x528   : > { %3023 = dma.vmem_to_hbm [thread:$0]  (%p3330_p3), %s2602_s30, 2048, %s2604_s17, %s2586_s12, %s3246_s26, %s3246_s26, %s3247_s21  }
 0x529 PF: > { %p3035_p0 = scmp.ge.s32.totalorder %s3238_s25, 2  ;;  %s2618_s22 = sand.u32 1, %s3210_s18  }
 0x52a   : > { %s2619_s27 = scalar_lea.sflag [#allocation5], %s2618_s22 }
 0x52b   : > { %p3030_p1 = pnand %p3035_p0, %p3339_p8 }
 0x52d   : > { %p3031_p2 = pneg %p3030_p1 }
 0x52f   : > { %3205 = dma.done.wait (%p3031_p2), %s2619_s27, 2048  }
 0x530   : > { %3207 = vsyncadd (%p3031_p2), %s2619_s27, 4294965248  ;;  %s19_s25 = sadd.s32 1, %s3238_s25   ;;  %s5011_s18 = smov %s3214_s19 }
 0x531   : > { %p16_p4 = scmp.ge.s32.totalorder %s19_s25, 6   ;;  %s5012_s19 = smov %s3218_s20 }
 0x532   : > { %s5013_s20 = smov %s3360_s16  ;;  %s5014_s21 = smov %s3230_s23 }
 0x533   : > { %s5015_s22 = smov %s3234_s24  ;;  %s5016_s23 = smov %s5019_s28 }
 0x534   : > { %s5017_s24 = smov %s5023_s29  ;;  %18 = sbr.rel (!%p16_p4) target bundleno = 6 (0x6), region = 113 }
 0x539   :  { %2625 = vsyncpa [#allocation4], 1 }
 0x53a   :  { %2627 = vsyncpa [#allocation4 + $0x1], 1 }
 0x53b   :  { %2628 = vsyncpa [#allocation5], 1 }
 0x53c   :  { %2630 = vsyncpa [#allocation5 + $0x1], 1 }

</bundles_post_ra>
